<compile_context>
chip_gen: v5e
topology: v5e:2x2
jax: 0.10.0
libtpu: 0.0.40
codegen_flags: <defaults>
</compile_context>

<pallas_src>
import functools
import math

import jax
import jax.numpy as jnp
from jax.experimental import pallas as pl
from jax.experimental.pallas import tpu as pltpu

MATMUL_DTYPE = jnp.float32   # set to jnp.bfloat16 on v6e/v7x for 2x MXU/DMA


# ----------------------------- Pallas kernels -------------------------------

def _linear_kernel(x_ref, w_ref, b_ref, o_ref, *, activation):
    y = jnp.dot(x_ref[...].astype(MATMUL_DTYPE),
                w_ref[...].astype(MATMUL_DTYPE),
                preferred_element_type=jnp.float32)
    y = y + b_ref[...]
    if activation == "relu":
        y = jnp.maximum(y, 0.0)
    o_ref[...] = y.astype(o_ref.dtype)


def pallas_linear(x, w, b, activation=None, block_m=512):
    """Fused y = act(x @ w + b); x:(M,K), w:(K,N), b:(1,N) -> (M,N) f32."""
    M, K = x.shape
    N = w.shape[1]
    kern = functools.partial(_linear_kernel, activation=activation)
    vmem = pl.BlockSpec(memory_space=pltpu.MemorySpace.VMEM)
    if M <= block_m:
        return pl.pallas_call(
            kern,
            out_shape=jax.ShapeDtypeStruct((M, N), jnp.float32),
            in_specs=[vmem, vmem, vmem],
            out_specs=vmem,
        )(x, w, b)
    # Large-M path (big batch / large images): tile rows with a parallel grid
    # axis; weights stay resident, double-buffered (block_m, K) input tiles
    # stay far below v7x's 64 MiB VMEM, and the 2 TensorCores split rows.
    m_pad = pl.cdiv(M, block_m) * block_m
    if m_pad != M:
        x = jnp.pad(x, ((0, m_pad - M), (0, 0)))
    out = pl.pallas_call(
        kern,
        out_shape=jax.ShapeDtypeStruct((m_pad, N), jnp.float32),
        grid=(m_pad // block_m,),
        in_specs=[pl.BlockSpec((block_m, K), lambda i: (i, 0)),
                  pl.BlockSpec((K, N), lambda i: (0, 0)),
                  pl.BlockSpec((1, N), lambda i: (0, 0))],
        out_specs=pl.BlockSpec((block_m, N), lambda i: (i, 0)),
        compiler_params=pltpu.CompilerParams(
            dimension_semantics=("parallel",)),
    )(x, w, b)
    return out[:M]


def _conv3_lstm_heads_kernel(xp_ref, w3_ref, b3_ref, h0_ref, c0_ref,
                             wih_ref, whh_ref, blstm_ref,
                             whead_ref, bhead_ref,
                             h_out_ref, c_out_ref, head_ref,
                             *, n_pos, c3, hidden):
    # LSTM pre-activations: hidden-path matmul + fused bias first.
    gates = (jnp.dot(h0_ref[...].astype(MATMUL_DTYPE),
                     whh_ref[...].astype(MATMUL_DTYPE),
                     preferred_element_type=jnp.float32)
             + blstm_ref[...])
    # conv3 (3x3, s1) + ReLU + flatten + x @ W_ih^T, fused: per conv3 output
    # position, one deep (N, Cin*9) @ (Cin*9, C3) matmul, ReLU, then contract
    # the (N, C3) block against the matching W_ih row slice.  The flattened
    # feature vector never materializes (no reshape, no HBM trip).
    for p in range(n_pos):
        feat = jnp.maximum(
            jnp.dot(xp_ref[p].astype(MATMUL_DTYPE),
                    w3_ref[...].astype(MATMUL_DTYPE),
                    preferred_element_type=jnp.float32) + b3_ref[...],
            0.0)
        gates = gates + jnp.dot(
            feat.astype(MATMUL_DTYPE),
            wih_ref[p * c3:(p + 1) * c3, :].astype(MATMUL_DTYPE),
            preferred_element_type=jnp.float32)
    # PyTorch LSTMCell gate order: i, f, g, o (f32 gate math on all chips).
    i_g = jax.nn.sigmoid(gates[:, 0 * hidden:1 * hidden])
    f_g = jax.nn.sigmoid(gates[:, 1 * hidden:2 * hidden])
    g_g = jnp.tanh(gates[:, 2 * hidden:3 * hidden])
    o_g = jax.nn.sigmoid(gates[:, 3 * hidden:4 * hidden])
    c_new = f_g * c0_ref[...] + i_g * g_g
    h_new = o_g * jnp.tanh(c_new)
    h_out_ref[...] = h_new.astype(h_out_ref.dtype)
    c_out_ref[...] = c_new.astype(c_out_ref.dtype)
    # Both heads as one lane-dense (hidden, 128) matmul while h_new is in VMEM.
    head_ref[...] = (jnp.dot(h_new.astype(MATMUL_DTYPE),
                             whead_ref[...].astype(MATMUL_DTYPE),
                             preferred_element_type=jnp.float32)
                     + bhead_ref[...]).astype(head_ref.dtype)


def pallas_conv3_lstm_heads(x2_nhwc, w3_2d, b3, h0, c0, wih_t, whh_t, b_lstm,
                            w_head, b_head, *, hidden):
    """Fused conv3(3x3,s1)+ReLU + flatten + LSTMCell + actor/critic heads."""
    n, h2, w2, _ = x2_nhwc.shape
    ksz = 3
    out_h, out_w = h2 - ksz + 1, w2 - ksz + 1
    n_pos = out_h * out_w
    c3 = w3_2d.shape[1]
    head_n = w_head.shape[1]
    patches = jax.lax.conv_general_dilated_patches(
        x2_nhwc, filter_shape=(ksz, ksz), window_strides=(1, 1),
        padding="VALID", dimension_numbers=("NHWC", "HWIO", "NHWC"))
    k3 = patches.shape[-1]
    # (P, N, Cin*3*3): one conv3 output position per leading index; the kernel
    # only indexes the leading dim, leaving the (N, K3) (sublane, lane) tile
    # untouched.
    xp = patches.reshape(n, n_pos, k3).transpose(1, 0, 2)
    vmem = pl.BlockSpec(memory_space=pltpu.MemorySpace.VMEM)
    kern = functools.partial(_conv3_lstm_heads_kernel,
                             n_pos=n_pos, c3=c3, hidden=hidden)
    return pl.pallas_call(
        kern,
        out_shape=(jax.ShapeDtypeStruct((n, hidden), jnp.float32),
                   jax.ShapeDtypeStruct((n, hidden), jnp.float32),
                   jax.ShapeDtypeStruct((n, head_n), jnp.float32)),
        in_specs=[vmem] * 10,
        out_specs=(vmem, vmem, vmem),
    )(xp, w3_2d, b3, h0, c0, wih_t, whh_t, b_lstm, w_head, b_head)


# ------------------------------ conv glue ------------------------------------

def conv2d_relu_nhwc(x, w2d, b, ksize, stride):
    """Valid-padding Conv2d + ReLU on NHWC input via one fused patch gather.
    w2d: (Cin*k*k, Cout) with rows ordered (cin, kh, kw) == torch flatten
    order, which matches conv_general_dilated_patches' channel-major order.
    """
    n = x.shape[0]
    cout = w2d.shape[1]
    patches = jax.lax.conv_general_dilated_patches(
        x, filter_shape=(ksize, ksize), window_strides=(stride, stride),
        padding="VALID", dimension_numbers=("NHWC", "HWIO", "NHWC"))
    _, oh, ow, k = patches.shape
    y = pallas_linear(patches.reshape(n * oh * ow, k), w2d, b,
                      activation="relu")
    return y.reshape(n, oh, ow, cout)           # stays NHWC, no transpose back


# ------------------------- parameter initialization --------------------------

def xavier_uniform(key, shape, fan_in, fan_out):
    a = math.sqrt(6.0 / (fan_in + fan_out))
    return jax.random.uniform(key, shape, jnp.float32, -a, a)


def orthogonal(key, shape):
    # TODO(synk): torch.nn.init.orthogonal_ QRs the transposed matrix when
    # rows < cols; this n x n QR slice is an init-only numerical difference.
    rows, cols = shape
    n = max(rows, cols)
    a = jax.random.normal(key, (n, n), jnp.float32)
    q, r = jnp.linalg.qr(a)
    q = q * jnp.sign(jnp.diag(r))
    return q[:rows, :cols]


def init_params(key, state_dim, action_dim, hidden_size):
    ks = jax.random.split(key, 7)
    c_in, height, width = state_dim

    def conv_w(k, cout, cin, ksz):
        # torch xavier_uniform_ on (cout, cin, k, k): fan_in = cin*k*k,
        # fan_out = cout*k*k.
        return xavier_uniform(k, (cout, cin, ksz, ksz),
                              cin * ksz * ksz, cout * ksz * ksz)

    p, raw = {}, {}
    # Conv weights pre-lowered once to (Cin*k*k, Cout) matmul layout.
    w1 = conv_w(ks[0], 32, c_in, 8)
    raw["conv1_w"] = w1
    p["conv1_w2d"] = w1.reshape(32, -1).T
    p["conv1_b"] = jnp.zeros((1, 32), jnp.float32)
    w2 = conv_w(ks[1], 64, 32, 4)
    raw["conv2_w"] = w2
    p["conv2_w2d"] = w2.reshape(64, -1).T
    p["conv2_b"] = jnp.zeros((1, 64), jnp.float32)
    w3 = conv_w(ks[2], 64, 64, 3)
    raw["conv3_w"] = w3
    p["conv3_w2d"] = w3.reshape(64, -1).T
    p["conv3_b"] = jnp.zeros((1, 64), jnp.float32)

    # feature_size(): spatial dims after the conv stack (valid padding).
    h1, w1s = (height - 8) // 4 + 1, (width - 8) // 4 + 1
    h2, w2s = (h1 - 4) // 2 + 1, (w1s - 4) // 2 + 1
    h3, w3s = h2 - 3 + 1, w2s - 3 + 1
    feat = 64 * h3 * w3s

    # LSTMCell: orthogonal weights, zero biases except forget-gate bias == 1
    # in BOTH bias_ih and bias_hh (as in the PyTorch module), so the fused
    # bias carries 2.0 on the forget slice.
    w_ih = orthogonal(ks[3], (4 * hidden_size, feat))
    w_hh = orthogonal(ks[4], (4 * hidden_size, hidden_size))
    b_ih = jnp.zeros((4 * hidden_size,), jnp.float32).at[
        hidden_size:2 * hidden_size].set(1.0)
    b_hh = jnp.zeros((4 * hidden_size,), jnp.float32).at[
        hidden_size:2 * hidden_size].set(1.0)
    raw["lstm_wih"], raw["lstm_whh"] = w_ih, w_hh
    raw["lstm_bih"], raw["lstm_bhh"] = b_ih, b_hh
    # torch flattens conv3 output as (c, h, w); the fused tail consumes it in
    # NHWC order (h, w, c) -> permute W_ih rows once here (exact, free).
    w_ih_hwc = (w_ih.reshape(4 * hidden_size, 64, h3, w3s)
                    .transpose(0, 2, 3, 1)
                    .reshape(4 * hidden_size, feat))
    p["lstm_wih_t"] = w_ih_hwc.T                       # (feat, 4H)
    p["lstm_whh_t"] = w_hh.T                           # (H, 4H)
    p["lstm_b"] = (b_ih + b_hh).reshape(1, 4 * hidden_size)

    # Actor + critic heads fused into one lane-dense (H, 128) weight:
    # column 0 = critic, columns 1..1+action_dim = actor, rest zero padding.
    head_n = ((1 + action_dim + 127) // 128) * 128
    critic_w = xavier_uniform(ks[5], (1, hidden_size), hidden_size, 1)
    actor_w = xavier_uniform(ks[6], (action_dim, hidden_size),
                             hidden_size, action_dim)
    raw["critic_w"], raw["actor_w"] = critic_w, actor_w
    head_w = jnp.zeros((hidden_size, head_n), jnp.float32)
    head_w = head_w.at[:, 0:1].set(critic_w.T)
    head_w = head_w.at[:, 1:1 + action_dim].set(actor_w.T)
    p["head_w"] = head_w
    p["head_b"] = jnp.zeros((1, head_n), jnp.float32)  # biases are zero-init
    return p, raw


# ------------------------------ forward pass ---------------------------------

def actor_critic_forward(params, x, hidden, *, hidden_size, action_dim):
    """x: (N, C, H, W) PyTorch NCHW; hidden = (h0, c0), each (N, hidden)."""
    h0, c0 = hidden
    x = jnp.transpose(x, (0, 2, 3, 1))        # single NCHW -> NHWC transpose
    x = conv2d_relu_nhwc(x, params["conv1_w2d"], params["conv1_b"], 8, 4)
    x = conv2d_relu_nhwc(x, params["conv2_w2d"], params["conv2_b"], 4, 2)
    h_new, c_new, head = pallas_conv3_lstm_heads(
        x, params["conv3_w2d"], params["conv3_b"], h0, c0,
        params["lstm_wih_t"], params["lstm_whh_t"], params["lstm_b"],
        params["head_w"], params["head_b"], hidden=hidden_size)
    value = head[:, 0:1]
    logits = head[:, 1:1 + action_dim]
    return logits, value, (h_new, c_new)


# --------------------------- pure-JAX reference -------------------------------

def reference_forward(raw, x, hidden):
    """Plain-JAX mirror of the PyTorch forward (NCHW), for correctness check."""
    h0, c0 = hidden
    hp = jax.lax.Precision.HIGHEST

    def conv_relu(y, w, stride):
        y = jax.lax.conv_general_dilated(
            y, w, (stride, stride), "VALID",
            dimension_numbers=("NCHW", "OIHW", "NCHW"), precision=hp)
        return jnp.maximum(y, 0.0)            # conv biases are zero-initialized

    y = conv_relu(x, raw["conv1_w"], 4)
    y = conv_relu(y, raw["conv2_w"], 2)
    y = conv_relu(y, raw["conv3_w"], 1)
    feat = y.reshape(y.shape[0], -1)          # torch (c, h, w) flatten order
    gates = (jnp.dot(feat, raw["lstm_wih"].T, precision=hp) + raw["lstm_bih"]
             + jnp.dot(h0, raw["lstm_whh"].T, precision=hp) + raw["lstm_bhh"])
    i_g, f_g, g_g, o_g = jnp.split(gates, 4, axis=1)
    c_new = jax.nn.sigmoid(f_g) * c0 + jax.nn.sigmoid(i_g) * jnp.tanh(g_g)
    h_new = jax.nn.sigmoid(o_g) * jnp.tanh(c_new)
    value = jnp.dot(h_new, raw["critic_w"].T, precision=hp)
    logits = jnp.dot(h_new, raw["actor_w"].T, precision=hp)
    return logits, value, (h_new, c_new)


# --------------------------------- main ---------------------------------------

if __name__ == "__main__":
    state_dim = (4, 48, 48)      # conv stack: 48 -> 11 -> 4 -> 2 spatial
    action_dim = 6
    hidden_size = 128            # torch default 512; small demo size
    batch = 2

    key = jax.random.PRNGKey(0)
    k_param, k_x, k_h, k_c = jax.random.split(key, 4)

    params, raw = init_params(k_param, state_dim, action_dim, hidden_size)

    x = jax.random.normal(k_x, (batch,) + state_dim, jnp.float32)
    h0 = jax.random.normal(k_h, (batch, hidden_size), jnp.float32)
    c0 = jax.random.normal(k_c, (batch, hidden_size), jnp.float32)

    fwd = jax.jit(functools.partial(actor_critic_forward,
                                    hidden_size=hidden_size,
                                    action_dim=action_dim))
    logits, value, (h_new, c_new) = fwd(params, x, (h0, c0))
    jax.block_until_ready((logits, value, h_new, c_new))

    assert logits.shape == (batch, action_dim)
    assert value.shape == (batch, 1)
    assert h_new.shape == (batch, hidden_size)
    assert c_new.shape == (batch, hidden_size)

    # Correctness check against the pure-JAX reference.
    r_logits, r_value, (r_h, r_c) = jax.jit(reference_forward)(raw, x, (h0, c0))
    for got, want in ((logits, r_logits), (value, r_value),
                      (h_new, r_h), (c_new, r_c)):
        err = float(jnp.max(jnp.abs(got - want)))
        assert jnp.allclose(got, want, atol=5e-3, rtol=5e-3), err

    print("KERNEL_OK")
</pallas_src>

<mosaic_0001>
module attributes {stable_mosaic.version = 11 : i64} {
  func.func @_linear_kernel(%arg0: memref<242x256xf32, #tpu.memory_space<vmem>>, %arg1: memref<256x32xf32, #tpu.memory_space<vmem>>, %arg2: memref<1x32xf32, #tpu.memory_space<vmem>>, %arg3: memref<242x32xf32, #tpu.memory_space<vmem>>) attributes {dimension_semantics = [], scalar_prefetch = 0 : i64, scratch_operands = 0 : i64, tpu.core_type = #tpu.core_type<tc>} {
    %c0 = arith.constant 0 : index
    %c0_0 = arith.constant 0 : index
    %0 = vector.load %arg0[%c0, %c0_0] : memref<242x256xf32, #tpu.memory_space<vmem>>, vector<242x256xf32>
    %c0_1 = arith.constant 0 : index
    %c0_2 = arith.constant 0 : index
    %1 = vector.load %arg1[%c0_1, %c0_2] : memref<256x32xf32, #tpu.memory_space<vmem>>, vector<256x32xf32>
    %cst = arith.constant dense<0.000000e+00> : vector<242x32xf32>
    %2 = tpu.matmul %0, %1, %cst {dimension_numbers = #tpu.dot_dimension_numbers<[1], [0], [0], [1], [0, 0, 1, 1], [], []>} : vector<242x256xf32>, vector<256x32xf32>, vector<242x32xf32> -> vector<242x32xf32>
    %c0_3 = arith.constant 0 : index
    %c0_4 = arith.constant 0 : index
    %3 = vector.load %arg2[%c0_3, %c0_4] : memref<1x32xf32, #tpu.memory_space<vmem>>, vector<1x32xf32>
    %4 = vector.broadcast %3 : vector<1x32xf32> to vector<242x32xf32>
    %5 = arith.addf %2, %4 : vector<242x32xf32>
    %cst_5 = arith.constant 0.000000e+00 : f32
    %6 = vector.broadcast %cst_5 : f32 to vector<242x32xf32>
    %7 = arith.maximumf %5, %6 : vector<242x32xf32>
    %c0_6 = arith.constant 0 : index
    %c0_7 = arith.constant 0 : index
    %8 = vector.load %arg3[%c0_6, %c0_7] : memref<242x32xf32, #tpu.memory_space<vmem>>, vector<242x32xf32>
    tpu.vector_store %arg3[%c0_6, %c0_7], %7 {strides = array<i32>} : memref<242x32xf32, #tpu.memory_space<vmem>>, vector<242x32xf32>,
    return
  }
}

module attributes {stable_mosaic.version = 11 : i64} {
  func.func @_linear_kernel(%arg0: memref<32x512xf32, #tpu.memory_space<vmem>>, %arg1: memref<512x64xf32, #tpu.memory_space<vmem>>, %arg2: memref<1x64xf32, #tpu.memory_space<vmem>>, %arg3: memref<32x64xf32, #tpu.memory_space<vmem>>) attributes {dimension_semantics = [], scalar_prefetch = 0 : i64, scratch_operands = 0 : i64, tpu.core_type = #tpu.core_type<tc>} {
    %c0 = arith.constant 0 : index
    %c0_0 = arith.constant 0 : index
    %0 = vector.load %arg0[%c0, %c0_0] : memref<32x512xf32, #tpu.memory_space<vmem>>, vector<32x512xf32>
    %c0_1 = arith.constant 0 : index
    %c0_2 = arith.constant 0 : index
    %1 = vector.load %arg1[%c0_1, %c0_2] : memref<512x64xf32, #tpu.memory_space<vmem>>, vector<512x64xf32>
    %cst = arith.constant dense<0.000000e+00> : vector<32x64xf32>
    %2 = tpu.matmul %0, %1, %cst {dimension_numbers = #tpu.dot_dimension_numbers<[1], [0], [0], [1], [0, 0, 1, 1], [], []>} : vector<32x512xf32>, vector<512x64xf32>, vector<32x64xf32> -> vector<32x64xf32>
    %c0_3 = arith.constant 0 : index
    %c0_4 = arith.constant 0 : index
    %3 = vector.load %arg2[%c0_3, %c0_4] : memref<1x64xf32, #tpu.memory_space<vmem>>, vector<1x64xf32>
    %4 = vector.broadcast %3 : vector<1x64xf32> to vector<32x64xf32>
    %5 = arith.addf %2, %4 : vector<32x64xf32>
    %cst_5 = arith.constant 0.000000e+00 : f32
    %6 = vector.broadcast %cst_5 : f32 to vector<32x64xf32>
    %7 = arith.maximumf %5, %6 : vector<32x64xf32>
    %c0_6 = arith.constant 0 : index
    %c0_7 = arith.constant 0 : index
    %8 = vector.load %arg3[%c0_6, %c0_7] : memref<32x64xf32, #tpu.memory_space<vmem>>, vector<32x64xf32>
    tpu.vector_store %arg3[%c0_6, %c0_7], %7 {strides = array<i32>} : memref<32x64xf32, #tpu.memory_space<vmem>>, vector<32x64xf32>,
    return
  }
}

module attributes {stable_mosaic.version = 11 : i64} {
  func.func @_conv3_lstm_heads_kernel(%arg0: memref<4x2x576xf32, #tpu.memory_space<vmem>>, %arg1: memref<576x64xf32, #tpu.memory_space<vmem>>, %arg2: memref<1x64xf32, #tpu.memory_space<vmem>>, %arg3: memref<2x128xf32, #tpu.memory_space<vmem>>, %arg4: memref<2x128xf32, #tpu.memory_space<vmem>>, %arg5: memref<256x512xf32, #tpu.memory_space<vmem>>, %arg6: memref<128x512xf32, #tpu.memory_space<vmem>>, %arg7: memref<1x512xf32, #tpu.memory_space<vmem>>, %arg8: memref<128x128xf32, #tpu.memory_space<vmem>>, %arg9: memref<1x128xf32, #tpu.memory_space<vmem>>, %arg10: memref<2x128xf32, #tpu.memory_space<vmem>>, %arg11: memref<2x128xf32, #tpu.memory_space<vmem>>, %arg12: memref<2x128xf32, #tpu.memory_space<vmem>>) attributes {dimension_semantics = [], scalar_prefetch = 0 : i64, scratch_operands = 0 : i64, tpu.core_type = #tpu.core_type<tc>} {
    %c0 = arith.constant 0 : index
    %c0_0 = arith.constant 0 : index
    %0 = vector.load %arg3[%c0, %c0_0] : memref<2x128xf32, #tpu.memory_space<vmem>>, vector<2x128xf32>
    %c0_1 = arith.constant 0 : index
    %c0_2 = arith.constant 0 : index
    %1 = vector.load %arg6[%c0_1, %c0_2] : memref<128x512xf32, #tpu.memory_space<vmem>>, vector<128x512xf32>
    %cst = arith.constant dense<0.000000e+00> : vector<2x512xf32>
    %2 = tpu.matmul %0, %1, %cst {dimension_numbers = #tpu.dot_dimension_numbers<[1], [0], [0], [1], [0, 0, 1, 1], [], []>} : vector<2x128xf32>, vector<128x512xf32>, vector<2x512xf32> -> vector<2x512xf32>
    %c0_3 = arith.constant 0 : index
    %c0_4 = arith.constant 0 : index
    %3 = vector.load %arg7[%c0_3, %c0_4] : memref<1x512xf32, #tpu.memory_space<vmem>>, vector<1x512xf32>
    %4 = vector.broadcast %3 : vector<1x512xf32> to vector<2x512xf32>
    %5 = arith.addf %2, %4 : vector<2x512xf32>
    %c0_5 = arith.constant 0 : index
    %c0_6 = arith.constant 0 : index
    %c0_7 = arith.constant 0 : index
    %6 = vector.load %arg0[%c0_5, %c0_6, %c0_7] : memref<4x2x576xf32, #tpu.memory_space<vmem>>, vector<1x2x576xf32>
    %7 = vector.shape_cast %6 : vector<1x2x576xf32> to vector<2x576xf32>
    %c0_8 = arith.constant 0 : index
    %c0_9 = arith.constant 0 : index
    %8 = vector.load %arg1[%c0_8, %c0_9] : memref<576x64xf32, #tpu.memory_space<vmem>>, vector<576x64xf32>
    %cst_10 = arith.constant dense<0.000000e+00> : vector<2x64xf32>
    %9 = tpu.matmul %7, %8, %cst_10 {dimension_numbers = #tpu.dot_dimension_numbers<[1], [0], [0], [1], [0, 0, 1, 1], [], []>} : vector<2x576xf32>, vector<576x64xf32>, vector<2x64xf32> -> vector<2x64xf32>
    %c0_11 = arith.constant 0 : index
    %c0_12 = arith.constant 0 : index
    %10 = vector.load %arg2[%c0_11, %c0_12] : memref<1x64xf32, #tpu.memory_space<vmem>>, vector<1x64xf32>
    %11 = vector.broadcast %10 : vector<1x64xf32> to vector<2x64xf32>
    %12 = arith.addf %9, %11 : vector<2x64xf32>
    %cst_13 = arith.constant 0.000000e+00 : f32
    %13 = vector.broadcast %cst_13 : f32 to vector<2x64xf32>
    %14 = arith.maximumf %12, %13 : vector<2x64xf32>
    %c0_14 = arith.constant 0 : index
    %c0_15 = arith.constant 0 : index
    %15 = vector.load %arg5[%c0_14, %c0_15] : memref<256x512xf32, #tpu.memory_space<vmem>>, vector<64x512xf32>
    %cst_16 = arith.constant dense<0.000000e+00> : vector<2x512xf32>
    %16 = tpu.matmul %14, %15, %cst_16 {dimension_numbers = #tpu.dot_dimension_numbers<[1], [0], [0], [1], [0, 0, 1, 1], [], []>} : vector<2x64xf32>, vector<64x512xf32>, vector<2x512xf32> -> vector<2x512xf32>
    %17 = arith.addf %5, %16 : vector<2x512xf32>
    %c1 = arith.constant 1 : index
    %c0_17 = arith.constant 0 : index
    %c0_18 = arith.constant 0 : index
    %18 = vector.load %arg0[%c1, %c0_17, %c0_18] : memref<4x2x576xf32, #tpu.memory_space<vmem>>, vector<1x2x576xf32>
    %19 = vector.shape_cast %18 : vector<1x2x576xf32> to vector<2x576xf32>
    %c0_19 = arith.constant 0 : index
    %c0_20 = arith.constant 0 : index
    %20 = vector.load %arg1[%c0_19, %c0_20] : memref<576x64xf32, #tpu.memory_space<vmem>>, vector<576x64xf32>
    %cst_21 = arith.constant dense<0.000000e+00> : vector<2x64xf32>
    %21 = tpu.matmul %19, %20, %cst_21 {dimension_numbers = #tpu.dot_dimension_numbers<[1], [0], [0], [1], [0, 0, 1, 1], [], []>} : vector<2x576xf32>, vector<576x64xf32>, vector<2x64xf32> -> vector<2x64xf32>
    %c0_22 = arith.constant 0 : index
    %c0_23 = arith.constant 0 : index
    %22 = vector.load %arg2[%c0_22, %c0_23] : memref<1x64xf32, #tpu.memory_space<vmem>>, vector<1x64xf32>
    %23 = vector.broadcast %22 : vector<1x64xf32> to vector<2x64xf32>
    %24 = arith.addf %21, %23 : vector<2x64xf32>
    %cst_24 = arith.constant 0.000000e+00 : f32
    %25 = vector.broadcast %cst_24 : f32 to vector<2x64xf32>
    %26 = arith.maximumf %24, %25 : vector<2x64xf32>
    %c64 = arith.constant 64 : index
    %c0_25 = arith.constant 0 : index
    %27 = vector.load %arg5[%c64, %c0_25] : memref<256x512xf32, #tpu.memory_space<vmem>>, vector<64x512xf32>
    %cst_26 = arith.constant dense<0.000000e+00> : vector<2x512xf32>
    %28 = tpu.matmul %26, %27, %cst_26 {dimension_numbers = #tpu.dot_dimension_numbers<[1], [0], [0], [1], [0, 0, 1, 1], [], []>} : vector<2x64xf32>, vector<64x512xf32>, vector<2x512xf32> -> vector<2x512xf32>
    %29 = arith.addf %17, %28 : vector<2x512xf32>
    %c2 = arith.constant 2 : index
    %c0_27 = arith.constant 0 : index
    %c0_28 = arith.constant 0 : index
    %30 = vector.load %arg0[%c2, %c0_27, %c0_28] : memref<4x2x576xf32, #tpu.memory_space<vmem>>, vector<1x2x576xf32>
    %31 = vector.shape_cast %30 : vector<1x2x576xf32> to vector<2x576xf32>
    %c0_29 = arith.constant 0 : index
    %c0_30 = arith.constant 0 : index
    %32 = vector.load %arg1[%c0_29, %c0_30] : memref<576x64xf32, #tpu.memory_space<vmem>>, vector<576x64xf32>
    %cst_31 = arith.constant dense<0.000000e+00> : vector<2x64xf32>
    %33 = tpu.matmul %31, %32, %cst_31 {dimension_numbers = #tpu.dot_dimension_numbers<[1], [0], [0], [1], [0, 0, 1, 1], [], []>} : vector<2x576xf32>, vector<576x64xf32>, vector<2x64xf32> -> vector<2x64xf32>
    %c0_32 = arith.constant 0 : index
    %c0_33 = arith.constant 0 : index
    %34 = vector.load %arg2[%c0_32, %c0_33] : memref<1x64xf32, #tpu.memory_space<vmem>>, vector<1x64xf32>
    %35 = vector.broadcast %34 : vector<1x64xf32> to vector<2x64xf32>
    %36 = arith.addf %33, %35 : vector<2x64xf32>
    %cst_34 = arith.constant 0.000000e+00 : f32
    %37 = vector.broadcast %cst_34 : f32 to vector<2x64xf32>
    %38 = arith.maximumf %36, %37 : vector<2x64xf32>
    %c128 = arith.constant 128 : index
    %c0_35 = arith.constant 0 : index
    %39 = vector.load %arg5[%c128, %c0_35] : memref<256x512xf32, #tpu.memory_space<vmem>>, vector<64x512xf32>
    %cst_36 = arith.constant dense<0.000000e+00> : vector<2x512xf32>
    %40 = tpu.matmul %38, %39, %cst_36 {dimension_numbers = #tpu.dot_dimension_numbers<[1], [0], [0], [1], [0, 0, 1, 1], [], []>} : vector<2x64xf32>, vector<64x512xf32>, vector<2x512xf32> -> vector<2x512xf32>
    %41 = arith.addf %29, %40 : vector<2x512xf32>
    %c3 = arith.constant 3 : index
    %c0_37 = arith.constant 0 : index
    %c0_38 = arith.constant 0 : index
    %42 = vector.load %arg0[%c3, %c0_37, %c0_38] : memref<4x2x576xf32, #tpu.memory_space<vmem>>, vector<1x2x576xf32>
    %43 = vector.shape_cast %42 : vector<1x2x576xf32> to vector<2x576xf32>
    %c0_39 = arith.constant 0 : index
    %c0_40 = arith.constant 0 : index
    %44 = vector.load %arg1[%c0_39, %c0_40] : memref<576x64xf32, #tpu.memory_space<vmem>>, vector<576x64xf32>
    %cst_41 = arith.constant dense<0.000000e+00> : vector<2x64xf32>
    %45 = tpu.matmul %43, %44, %cst_41 {dimension_numbers = #tpu.dot_dimension_numbers<[1], [0], [0], [1], [0, 0, 1, 1], [], []>} : vector<2x576xf32>, vector<576x64xf32>, vector<2x64xf32> -> vector<2x64xf32>
    %c0_42 = arith.constant 0 : index
    %c0_43 = arith.constant 0 : index
    %46 = vector.load %arg2[%c0_42, %c0_43] : memref<1x64xf32, #tpu.memory_space<vmem>>, vector<1x64xf32>
    %47 = vector.broadcast %46 : vector<1x64xf32> to vector<2x64xf32>
    %48 = arith.addf %45, %47 : vector<2x64xf32>
    %cst_44 = arith.constant 0.000000e+00 : f32
    %49 = vector.broadcast %cst_44 : f32 to vector<2x64xf32>
    %50 = arith.maximumf %48, %49 : vector<2x64xf32>
    %c192 = arith.constant 192 : index
    %c0_45 = arith.constant 0 : index
    %51 = vector.load %arg5[%c192, %c0_45] : memref<256x512xf32, #tpu.memory_space<vmem>>, vector<64x512xf32>
    %cst_46 = arith.constant dense<0.000000e+00> : vector<2x512xf32>
    %52 = tpu.matmul %50, %51, %cst_46 {dimension_numbers = #tpu.dot_dimension_numbers<[1], [0], [0], [1], [0, 0, 1, 1], [], []>} : vector<2x64xf32>, vector<64x512xf32>, vector<2x512xf32> -> vector<2x512xf32>
    %53 = arith.addf %41, %52 : vector<2x512xf32>
    %54 = vector.extract_strided_slice %53 {offsets = [0, 0], sizes = [2, 128], strides = [1, 1]} : vector<2x512xf32> to vector<2x128xf32>
    %55 = arith.negf %54 : vector<2x128xf32>
    %56 = math.exp %55 : vector<2x128xf32>
    %cst_47 = arith.constant 1.000000e+00 : f32
    %57 = vector.broadcast %cst_47 : f32 to vector<2x128xf32>
    %58 = arith.addf %57, %56 : vector<2x128xf32>
    %59 = arith.divf %57, %58 : vector<2x128xf32>
    %60 = vector.extract_strided_slice %53 {offsets = [0, 128], sizes = [2, 128], strides = [1, 1]} : vector<2x512xf32> to vector<2x128xf32>
    %61 = arith.negf %60 : vector<2x128xf32>
    %62 = math.exp %61 : vector<2x128xf32>
    %cst_48 = arith.constant 1.000000e+00 : f32
    %63 = vector.broadcast %cst_48 : f32 to vector<2x128xf32>
    %64 = arith.addf %63, %62 : vector<2x128xf32>
    %65 = arith.divf %63, %64 : vector<2x128xf32>
    %66 = vector.extract_strided_slice %53 {offsets = [0, 256], sizes = [2, 128], strides = [1, 1]} : vector<2x512xf32> to vector<2x128xf32>
    %67 = math.tanh %66 : vector<2x128xf32>
    %68 = vector.extract_strided_slice %53 {offsets = [0, 384], sizes = [2, 128], strides = [1, 1]} : vector<2x512xf32> to vector<2x128xf32>
    %69 = arith.negf %68 : vector<2x128xf32>
    %70 = math.exp %69 : vector<2x128xf32>
    %cst_49 = arith.constant 1.000000e+00 : f32
    %71 = vector.broadcast %cst_49 : f32 to vector<2x128xf32>
    %72 = arith.addf %71, %70 : vector<2x128xf32>
    %73 = arith.divf %71, %72 : vector<2x128xf32>
    %c0_50 = arith.constant 0 : index
    %c0_51 = arith.constant 0 : index
    %74 = vector.load %arg4[%c0_50, %c0_51] : memref<2x128xf32, #tpu.memory_space<vmem>>, vector<2x128xf32>
    %75 = arith.mulf %65, %74 : vector<2x128xf32>
    %76 = arith.mulf %59, %67 : vector<2x128xf32>
    %77 = arith.addf %75, %76 : vector<2x128xf32>
    %78 = math.tanh %77 : vector<2x128xf32>
    %79 = arith.mulf %73, %78 : vector<2x128xf32>
    %c0_52 = arith.constant 0 : index
    %c0_53 = arith.constant 0 : index
    %80 = vector.load %arg10[%c0_52, %c0_53] : memref<2x128xf32, #tpu.memory_space<vmem>>, vector<2x128xf32>
    tpu.vector_store %arg10[%c0_52, %c0_53], %79 {strides = array<i32>} : memref<2x128xf32, #tpu.memory_space<vmem>>, vector<2x128xf32>,
    %c0_54 = arith.constant 0 : index
    %c0_55 = arith.constant 0 : index
    %81 = vector.load %arg11[%c0_54, %c0_55] : memref<2x128xf32, #tpu.memory_space<vmem>>, vector<2x128xf32>
    tpu.vector_store %arg11[%c0_54, %c0_55], %77 {strides = array<i32>} : memref<2x128xf32, #tpu.memory_space<vmem>>, vector<2x128xf32>,
    %c0_56 = arith.constant 0 : index
    %c0_57 = arith.constant 0 : index
    %82 = vector.load %arg8[%c0_56, %c0_57] : memref<128x128xf32, #tpu.memory_space<vmem>>, vector<128x128xf32>
    %cst_58 = arith.constant dense<0.000000e+00> : vector<2x128xf32>
    %83 = tpu.matmul %79, %82, %cst_58 {dimension_numbers = #tpu.dot_dimension_numbers<[1], [0], [0], [1], [0, 0, 1, 1], [], []>} : vector<2x128xf32>, vector<128x128xf32>, vector<2x128xf32> -> vector<2x128xf32>
    %c0_59 = arith.constant 0 : index
    %c0_60 = arith.constant 0 : index
    %84 = vector.load %arg9[%c0_59, %c0_60] : memref<1x128xf32, #tpu.memory_space<vmem>>, vector<1x128xf32>
    %85 = vector.broadcast %84 : vector<1x128xf32> to vector<2x128xf32>
    %86 = arith.addf %83, %85 : vector<2x128xf32>
    %c0_61 = arith.constant 0 : index
    %c0_62 = arith.constant 0 : index
    %87 = vector.load %arg12[%c0_61, %c0_62] : memref<2x128xf32, #tpu.memory_space<vmem>>, vector<2x128xf32>
    tpu.vector_store %arg12[%c0_61, %c0_62], %86 {strides = array<i32>} : memref<2x128xf32, #tpu.memory_space<vmem>>, vector<2x128xf32>,
    return
  }
}

</mosaic_0001>

<bundles_post_ra>
// kernel: actor_critic_forward.3
= control target key start
LH: loop header
LB: loop body
LE: loop exit
PB: predicated region body
PF: predicated region fallthrough
CT: control target
= control target key end

     0   :  { %vm363_vm0 = vcmask 261120   ;;  %vm394_vm1 = vcmask 254976   ;;  %s897_s1 = inlined_call_operand.vmem [shape: f32[256,32], index: 1, kind: input, shape index: {}]   ;;  %s898_s0 = inlined_call_operand.vmem [shape: f32[242,256], index: 0, kind: input, shape index: {}]   ;;  %s899_s2 = inlined_call_operand.vmem [shape: f32[1,32], index: 2, kind: input, shape index: {}]   ;;  %s900_s3 = inlined_call_operand.vmem [shape: f32[242,32], index: 3, kind: output, shape index: {}]  }
   0x1   :  { %v91_v0 = vld [vmem:[%s897_s1 + $0x78] sm:$0xff]  ;;  %v90_v2 = vld [vmem:[%s897_s1 + $0x70] sm:$0xff]  ;;  %v89_v4 = vld [vmem:[%s897_s1 + $0x68] sm:$0xff] }
   0x2   :  { %v107_v1 = vld [vmem:[%s897_s1 + $0xf8] sm:$0xff]  ;;  %400 = vmatpush.msra.mxu2 %v91_v0  ;;  %v106_v3 = vld [vmem:[%s897_s1 + $0xf0] sm:$0xff]  ;;  %v105_v5 = vld [vmem:[%s897_s1 + $0xe8] sm:$0xff]  ;;  %112 = vmatpush.msra.mxu0 %v91_v0 }
   0x3   :  { %222 = vmatpush.msra.mxu1 %v107_v1  ;;  %416 = vmatpush.msra.mxu3 %v107_v1  ;;  %v88_v6 = vld [vmem:[%s897_s1 + $0x60] sm:$0xff]  ;;  %v87_v8 = vld [vmem:[%s897_s1 + $0x58] sm:$0xff]  ;;  %v86_v10 = vld [vmem:[%s897_s1 + $0x50] sm:$0xff] }
   0x4   :  { %401 = vmatpush.msra.mxu2 %v90_v2  ;;  %v104_v7 = vld [vmem:[%s897_s1 + $0xe0] sm:$0xff]  ;;  %113 = vmatpush.msra.mxu0 %v90_v2  ;;  %v103_v9 = vld [vmem:[%s897_s1 + $0xd8] sm:$0xff]  ;;  %v102_v11 = vld [vmem:[%s897_s1 + $0xd0] sm:$0xff] }
   0x5   :  { %223 = vmatpush.msra.mxu1 %v106_v3  ;;  %417 = vmatpush.msra.mxu3 %v106_v3  ;;  %v85_v12 = vld [vmem:[%s897_s1 + $0x48] sm:$0xff]  ;;  %v84_v14 = vld [vmem:[%s897_s1 + $0x40] sm:$0xff]  ;;  %v83_v16 = vld [vmem:[%s897_s1 + $0x38] sm:$0xff] }
   0x6   :  { %402 = vmatpush.msra.mxu2 %v89_v4  ;;  %114 = vmatpush.msra.mxu0 %v89_v4  ;;  %v101_v13 = vld [vmem:[%s897_s1 + $0xc8] sm:$0xff]  ;;  %v100_v15 = vld [vmem:[%s897_s1 + $0xc0] sm:$0xff]  ;;  %v99_v17 = vld [vmem:[%s897_s1 + $0xb8] sm:$0xff] }
   0x7   :  { %224 = vmatpush.msra.mxu1 %v105_v5  ;;  %418 = vmatpush.msra.mxu3 %v105_v5  ;;  %v82_v18 = vld [vmem:[%s897_s1 + $0x30] sm:$0xff]  ;;  %v81_v20 = vld [vmem:[%s897_s1 + $0x28] sm:$0xff]  ;;  %v80_v22 = vld [vmem:[%s897_s1 + $0x20] sm:$0xff] }
   0x8   :  { %403 = vmatpush.msra.mxu2 %v88_v6  ;;  %115 = vmatpush.msra.mxu0 %v88_v6  ;;  %v98_v19 = vld [vmem:[%s897_s1 + $0xb0] sm:$0xff]  ;;  %v97_v21 = vld [vmem:[%s897_s1 + $0xa8] sm:$0xff]  ;;  %v96_v23 = vld [vmem:[%s897_s1 + $0xa0] sm:$0xff] }
   0x9   :  { %225 = vmatpush.msra.mxu1 %v104_v7  ;;  %419 = vmatpush.msra.mxu3 %v104_v7  ;;  %v79_v24 = vld [vmem:[%s897_s1 + $0x18] sm:$0xff]  ;;  %v78_v26 = vld [vmem:[%s897_s1 + $0x10] sm:$0xff]  ;;  %v77_v28 = vld [vmem:[%s897_s1 + $0x8] sm:$0xff] }
   0xa   :  { %404 = vmatpush.msra.mxu2 %v87_v8  ;;  %116 = vmatpush.msra.mxu0 %v87_v8  ;;  %v95_v25 = vld [vmem:[%s897_s1 + $0x98] sm:$0xff]  ;;  %v94_v27 = vld [vmem:[%s897_s1 + $0x90] sm:$0xff]  ;;  %v93_v29 = vld [vmem:[%s897_s1 + $0x88] sm:$0xff] }
   0xb   :  { %226 = vmatpush.msra.mxu1 %v103_v9  ;;  %420 = vmatpush.msra.mxu3 %v103_v9  ;;  %v76_v30 = vld [vmem:[%s897_s1] sm:$0xff]  ;;  %v44_v32 = vld [vmem:[%s898_s0 + $0xf0] sm:$0xff]  ;;  %v15_v33 = vld [vmem:[%s898_s0 + $0x8] sm:$0xff] }
   0xc   :  { %405 = vmatpush.msra.mxu2 %v86_v10  ;;  %117 = vmatpush.msra.mxu0 %v86_v10  ;;  %v92_v31 = vld [vmem:[%s897_s1 + $0x80] sm:$0xff]  ;;  %v47_v35 = vld [vmem:[%s898_s0 + $0x108] sm:$0xff]  ;;  %v17_v37 = vld [vmem:[%s898_s0 + $0x18] sm:$0xff] }
   0xd   :  { %227 = vmatpush.msra.mxu1 %v102_v11  ;;  %421 = vmatpush.msra.mxu3 %v102_v11  ;;  %v14_v34 = vld [vmem:[%s898_s0] sm:$0xff]  ;;  %v16_v38 = vld [vmem:[%s898_s0 + $0x10] sm:$0xff]  ;;  %v49_v39 = vld [vmem:[%s898_s0 + $0x118] sm:$0xff] }
   0xe   :  { %406 = vmatpush.msra.mxu2 %v85_v12  ;;  %118 = vmatpush.msra.mxu0 %v85_v12  ;;  %v46_v36 = vld [vmem:[%s898_s0 + $0x100] sm:$0xff]  ;;  %v48_v40 = vld [vmem:[%s898_s0 + $0x110] sm:$0xff]  ;;  %v19_v41 = vld [vmem:[%s898_s0 + $0x28] sm:$0xff] }
   0xf   :  { %228 = vmatpush.msra.mxu1 %v101_v13  ;;  %422 = vmatpush.msra.mxu3 %v101_v13  ;;  %v18_v42 = vld [vmem:[%s898_s0 + $0x20] sm:$0xff]  ;;  %v51_v43 = vld [vmem:[%s898_s0 + $0x128] sm:$0xff]  ;;  %v21_v45 = vld [vmem:[%s898_s0 + $0x38] sm:$0xff] }
  0x10   :  { %407 = vmatpush.msra.mxu2 %v84_v14  ;;  %119 = vmatpush.msra.mxu0 %v84_v14  ;;  %v50_v44 = vld [vmem:[%s898_s0 + $0x120] sm:$0xff]  ;;  %v20_v46 = vld [vmem:[%s898_s0 + $0x30] sm:$0xff]  ;;  %v53_v47 = vld [vmem:[%s898_s0 + $0x138] sm:$0xff] }
  0x11   :  { %229 = vmatpush.msra.mxu1 %v100_v15  ;;  %423 = vmatpush.msra.mxu3 %v100_v15  ;;  %v52_v48 = vld [vmem:[%s898_s0 + $0x130] sm:$0xff]  ;;  %v23_v49 = vld [vmem:[%s898_s0 + $0x48] sm:$0xff]  ;;  %v22_v50 = vld [vmem:[%s898_s0 + $0x40] sm:$0xff] }
  0x12   :  { %408 = vmatpush.msra.mxu2 %v83_v16  ;;  %120 = vmatpush.msra.mxu0 %v83_v16  ;;  %v55_v51 = vld [vmem:[%s898_s0 + $0x148] sm:$0xff]  ;;  %v54_v52 = vld [vmem:[%s898_s0 + $0x140] sm:$0xff]  ;;  %v25_v53 = vld [vmem:[%s898_s0 + $0x58] sm:$0xff] }
  0x13   :  { %230 = vmatpush.msra.mxu1 %v99_v17  ;;  %424 = vmatpush.msra.mxu3 %v99_v17  ;;  %v24_v54 = vld [vmem:[%s898_s0 + $0x50] sm:$0xff]  ;;  %v57_v55 = vld [vmem:[%s898_s0 + $0x158] sm:$0xff]  ;;  %v27_v57 = vld [vmem:[%s898_s0 + $0x68] sm:$0xff] }
  0x14   :  { %409 = vmatpush.msra.mxu2 %v82_v18  ;;  %121 = vmatpush.msra.mxu0 %v82_v18  ;;  %v56_v56 = vld [vmem:[%s898_s0 + $0x150] sm:$0xff]  ;;  %v26_v58 = vld [vmem:[%s898_s0 + $0x60] sm:$0xff]  ;;  %v59_v59 = vld [vmem:[%s898_s0 + $0x168] sm:$0xff] }
  0x15   :  { %231 = vmatpush.msra.mxu1 %v98_v19  ;;  %425 = vmatpush.msra.mxu3 %v98_v19  ;;  %v58_v60 = vld [vmem:[%s898_s0 + $0x160] sm:$0xff]  ;;  %v29_v61 = vld [vmem:[%s898_s0 + $0x78] sm:$0xff]  ;;  %v28_v62 = vld [vmem:[%s898_s0 + $0x70] sm:$0xff] }
  0x16   :  { %410 = vmatpush.msra.mxu2 %v81_v20  ;;  %122 = vmatpush.msra.mxu0 %v81_v20  ;;  %v61_v63 = vld [vmem:[%s898_s0 + $0x178] sm:$0xff]  ;;  %v60_v0 = vld [vmem:[%s898_s0 + $0x170] sm:$0xff]  ;;  %v31_v1 = vld [vmem:[%s898_s0 + $0x88] sm:$0xff] }
  0x17   :  { %232 = vmatpush.msra.mxu1 %v97_v21  ;;  %426 = vmatpush.msra.mxu3 %v97_v21  ;;  %v30_v2 = vld [vmem:[%s898_s0 + $0x80] sm:$0xff]  ;;  %v63_v3 = vld [vmem:[%s898_s0 + $0x188] sm:$0xff]  ;;  %v33_v5 = vld [vmem:[%s898_s0 + $0x98] sm:$0xff] }
  0x18   :  { %411 = vmatpush.msra.mxu2 %v80_v22  ;;  %123 = vmatpush.msra.mxu0 %v80_v22  ;;  %v62_v4 = vld [vmem:[%s898_s0 + $0x180] sm:$0xff]  ;;  %v32_v6 = vld [vmem:[%s898_s0 + $0x90] sm:$0xff]  ;;  %v65_v7 = vld [vmem:[%s898_s0 + $0x198] sm:$0xff] }
  0x19   :  { %233 = vmatpush.msra.mxu1 %v96_v23  ;;  %427 = vmatpush.msra.mxu3 %v96_v23  ;;  %v64_v8 = vld [vmem:[%s898_s0 + $0x190] sm:$0xff]  ;;  %v35_v9 = vld [vmem:[%s898_s0 + $0xa8] sm:$0xff]  ;;  %v34_v10 = vld [vmem:[%s898_s0 + $0xa0] sm:$0xff] }
  0x1a   :  { %412 = vmatpush.msra.mxu2 %v79_v24  ;;  %124 = vmatpush.msra.mxu0 %v79_v24  ;;  %v67_v11 = vld [vmem:[%s898_s0 + $0x1a8] sm:$0xff]  ;;  %v66_v12 = vld [vmem:[%s898_s0 + $0x1a0] sm:$0xff]  ;;  %v37_v13 = vld [vmem:[%s898_s0 + $0xb8] sm:$0xff] }
  0x1b   :  { %234 = vmatpush.msra.mxu1 %v95_v25  ;;  %428 = vmatpush.msra.mxu3 %v95_v25  ;;  %v36_v14 = vld [vmem:[%s898_s0 + $0xb0] sm:$0xff]  ;;  %v69_v15 = vld [vmem:[%s898_s0 + $0x1b8] sm:$0xff]  ;;  %v39_v17 = vld [vmem:[%s898_s0 + $0xc8] sm:$0xff] }
  0x1c   :  { %413 = vmatpush.msra.mxu2 %v78_v26  ;;  %125 = vmatpush.msra.mxu0 %v78_v26  ;;  %v68_v16 = vld [vmem:[%s898_s0 + $0x1b0] sm:$0xff]  ;;  %v38_v18 = vld [vmem:[%s898_s0 + $0xc0] sm:$0xff]  ;;  %v71_v19 = vld [vmem:[%s898_s0 + $0x1c8] sm:$0xff] }
  0x1d   :  { %235 = vmatpush.msra.mxu1 %v94_v27  ;;  %429 = vmatpush.msra.mxu3 %v94_v27  ;;  %v70_v20 = vld [vmem:[%s898_s0 + $0x1c0] sm:$0xff]  ;;  %v41_v21 = vld [vmem:[%s898_s0 + $0xd8] sm:$0xff]  ;;  %v40_v22 = vld [vmem:[%s898_s0 + $0xd0] sm:$0xff] }
  0x1e   :  { %414 = vmatpush.msra.mxu2 %v77_v28  ;;  %126 = vmatpush.msra.mxu0 %v77_v28  ;;  %v73_v23 = vld [vmem:[%s898_s0 + $0x1d8] sm:$0xff]  ;;  %v72_v24 = vld [vmem:[%s898_s0 + $0x1d0] sm:$0xff]  ;;  %v43_v25 = vld [vmem:[%s898_s0 + $0xe8] sm:$0xff] }
  0x1f   :  { %236 = vmatpush.msra.mxu1 %v93_v29  ;;  %430 = vmatpush.msra.mxu3 %v93_v29  ;;  %v42_v26 = vld [vmem:[%s898_s0 + $0xe0] sm:$0xff]  ;;  %v75_v27 = vld [vmem:[%s898_s0 + $0x1e8] sm:$0x3]  ;;  %v45_v29 = vld [vmem:[%s898_s0 + $0xf8] sm:$0xff] }
  0x20   :  { %415 = vmatpush.msra.mxu2 %v76_v30  ;;  %127 = vmatpush.msra.mxu0 %v76_v30  ;;  %v74_v28 = vld [vmem:[%s898_s0 + $0x1e0] sm:$0x3] }
  0x21   :  { %237 = vmatpush.msra.mxu1 %v92_v31  ;;  %173 = vmatmul.f32.vlgmr.msra.gmra.mxu2 %v44_v32  ;;  %v738_v30 = vld [vmem:[%s899_s2] ss:$0 sm:$0xff] }
  0x22   :  { %238 = vmatmul.f32.vlgmr.msra.gmra.mxu1 %v15_v33  ;;  %431 = vmatpush.msra.mxu3 %v92_v31 }
  0x23   :  { %128 = vmatmul.f32.vlgmr.msra.gmra.mxu0 %v14_v34  ;;  %286 = vmatmul.f32.vlgmr.msra.gmra.mxu3 %v47_v35 }
  0x29   :  { %176 = vmatmul.f32.gmra.mxu2 %v46_v36 }
  0x2a   :  { %241 = vmatmul.f32.gmra.mxu1 %v17_v37 }
  0x2b   :  { %131 = vmatmul.f32.gmra.mxu0 %v16_v38  ;;  %289 = vmatmul.f32.gmra.mxu3 %v49_v39 }
  0x31   :  { %179 = vmatmul.f32.gmra.mxu2 %v48_v40 }
  0x32   :  { %244 = vmatmul.f32.gmra.mxu1 %v19_v41 }
  0x33   :  { %134 = vmatmul.f32.gmra.mxu0 %v18_v42  ;;  %292 = vmatmul.f32.gmra.mxu3 %v51_v43 }
  0x39   :  { %182 = vmatmul.f32.gmra.mxu2 %v50_v44 }
  0x3a   :  { %247 = vmatmul.f32.gmra.mxu1 %v21_v45 }
  0x3b   :  { %137 = vmatmul.f32.gmra.mxu0 %v20_v46  ;;  %295 = vmatmul.f32.gmra.mxu3 %v53_v47 }
  0x41   :  { %185 = vmatmul.f32.gmra.mxu2 %v52_v48 }
  0x42   :  { %250 = vmatmul.f32.gmra.mxu1 %v23_v49 }
  0x43   :  { %140 = vmatmul.f32.gmra.mxu0 %v22_v50  ;;  %298 = vmatmul.f32.gmra.mxu3 %v55_v51 }
  0x49   :  { %188 = vmatmul.f32.gmra.mxu2 %v54_v52 }
  0x4a   :  { %253 = vmatmul.f32.gmra.mxu1 %v25_v53 }
  0x4b   :  { %143 = vmatmul.f32.gmra.mxu0 %v24_v54  ;;  %301 = vmatmul.f32.gmra.mxu3 %v57_v55 }
  0x51   :  { %191 = vmatmul.f32.gmra.mxu2 %v56_v56 }
  0x52   :  { %256 = vmatmul.f32.gmra.mxu1 %v27_v57 }
  0x53   :  { %146 = vmatmul.f32.gmra.mxu0 %v26_v58  ;;  %304 = vmatmul.f32.gmra.mxu3 %v59_v59 }
  0x59   :  { %194 = vmatmul.f32.gmra.mxu2 %v58_v60 }
  0x5a   :  { %259 = vmatmul.f32.gmra.mxu1 %v29_v61 }
  0x5b   :  { %149 = vmatmul.f32.gmra.mxu0 %v28_v62  ;;  %307 = vmatmul.f32.gmra.mxu3 %v61_v63 }
  0x61   :  { %197 = vmatmul.f32.gmra.mxu2 %v60_v0 }
  0x62   :  { %262 = vmatmul.f32.gmra.mxu1 %v31_v1 }
  0x63   :  { %152 = vmatmul.f32.gmra.mxu0 %v30_v2  ;;  %310 = vmatmul.f32.gmra.mxu3 %v63_v3 }
  0x69   :  { %200 = vmatmul.f32.gmra.mxu2 %v62_v4 }
  0x6a   :  { %265 = vmatmul.f32.gmra.mxu1 %v33_v5 }
  0x6b   :  { %155 = vmatmul.f32.gmra.mxu0 %v32_v6  ;;  %313 = vmatmul.f32.gmra.mxu3 %v65_v7 }
  0x71   :  { %203 = vmatmul.f32.gmra.mxu2 %v64_v8 }
  0x72   :  { %268 = vmatmul.f32.gmra.mxu1 %v35_v9 }
  0x73   :  { %158 = vmatmul.f32.gmra.mxu0 %v34_v10  ;;  %316 = vmatmul.f32.gmra.mxu3 %v67_v11 }
  0x79   :  { %206 = vmatmul.f32.gmra.mxu2 %v66_v12 }
  0x7a   :  { %271 = vmatmul.f32.gmra.mxu1 %v37_v13 }
  0x7b   :  { %161 = vmatmul.f32.gmra.mxu0 %v36_v14  ;;  %319 = vmatmul.f32.gmra.mxu3 %v69_v15 }
  0x81   :  { %209 = vmatmul.f32.gmra.mxu2 %v68_v16 }
  0x82   :  { %274 = vmatmul.f32.gmra.mxu1 %v39_v17 }
  0x83   :  { %164 = vmatmul.f32.gmra.mxu0 %v38_v18  ;;  %322 = vmatmul.f32.gmra.mxu3 %v71_v19 }
  0x89   :  { %212 = vmatmul.f32.gmra.mxu2 %v70_v20 }
  0x8a   :  { %277 = vmatmul.f32.gmra.mxu1 %v41_v21 }
  0x8b   :  { %167 = vmatmul.f32.gmra.mxu0 %v40_v22  ;;  %325 = vmatmul.f32.gmra.mxu3 %v73_v23 }
  0x91   :  { %215 = vmatmul.f32.gmra.mxu2 %v72_v24 }
  0x92   :  { %280 = vmatmul.f32.gmra.mxu1 %v43_v25 }
  0x93   :  { %170 = vmatmul.f32.gmra.mxu0 %v42_v26  ;;  %328 = vmatmul.f32.gmra.mxu3 %v75_v27 }
  0x99   :  { %218 = vmatmul.f32.gmra.mxu2 %v74_v28 }
  0x9a   :  { %283 = vmatmul.f32.gmra.mxu1 %v45_v29 }
  0x9f   :  { %v239_v31 = vpop.f32.mrf.mxu1 }
  0xa0   :  { %v129_v32 = vpop.f32.mrf.mxu0 }
  0xa1   :  { %v130_v33 = vadd.f32 %v738_v30, %v129_v32 }
  0xa3   :  { %v240_v34 = vadd.f32 %v239_v31, %v130_v33 }
  0xa4   :  { %v741_v35 = vpop.f32.mrf.mxu2 }
  0xa5   :  { %v332_v36 = vmax.f32 %v240_v34, 0.0 }
  0xa6   :  { %v287_v38 = vpop.f32.mrf.mxu3 }
  0xa7   :  { %v242_v37 = vpop.f32.mrf.mxu1  ;;  %364 = vst.msk [vmem:[%s900_s3] sm:$0xff] %vm363_vm0, %v332_v36 }
  0xa8   :  { %v132_v39 = vpop.f32.mrf.mxu0 }
  0xa9   :  { %v133_v40 = vadd.f32 %v738_v30, %v132_v39 }
  0xab   :  { %v243_v41 = vadd.f32 %v242_v37, %v133_v40 }
  0xac   :  { %v177_v42 = vpop.f32.mrf.mxu2 }
  0xad   :  { %v333_v43 = vmax.f32 %v243_v41, 0.0  ;;  %v178_v44 = vadd.f32 %v738_v30, %v177_v42 }
  0xae   :  { %v290_v46 = vpop.f32.mrf.mxu3 }
  0xaf   :  { %v245_v45 = vpop.f32.mrf.mxu1  ;;  %365 = vst.msk [vmem:[%s900_s3 + $0x8] sm:$0xff] %vm363_vm0, %v333_v43  ;;  %v288_v47 = vadd.f32 %v287_v38, %v178_v44 }
  0xb0   :  { %v135_v48 = vpop.f32.mrf.mxu0 }
  0xb1   :  { %v348_v49 = vmax.f32 %v288_v47, 0.0  ;;  %v136_v50 = vadd.f32 %v738_v30, %v135_v48 }
  0xb3   :  { %380 = vst.msk [vmem:[%s900_s3 + $0x80] sm:$0xff] %vm363_vm0, %v348_v49  ;;  %v246_v51 = vadd.f32 %v245_v45, %v136_v50 }
  0xb4   :  { %v180_v52 = vpop.f32.mrf.mxu2 }
  0xb5   :  { %v334_v53 = vmax.f32 %v246_v51, 0.0  ;;  %v181_v54 = vadd.f32 %v738_v30, %v180_v52 }
  0xb6   :  { %v293_v56 = vpop.f32.mrf.mxu3 }
  0xb7   :  { %v248_v55 = vpop.f32.mrf.mxu1  ;;  %366 = vst.msk [vmem:[%s900_s3 + $0x10] sm:$0xff] %vm363_vm0, %v334_v53  ;;  %v291_v57 = vadd.f32 %v290_v46, %v181_v54 }
  0xb8   :  { %v138_v58 = vpop.f32.mrf.mxu0 }
  0xb9   :  { %v349_v59 = vmax.f32 %v291_v57, 0.0  ;;  %v139_v60 = vadd.f32 %v738_v30, %v138_v58 }
  0xbb   :  { %381 = vst.msk [vmem:[%s900_s3 + $0x88] sm:$0xff] %vm363_vm0, %v349_v59  ;;  %v249_v61 = vadd.f32 %v248_v55, %v139_v60 }
  0xbc   :  { %v183_v62 = vpop.f32.mrf.mxu2 }
  0xbd   :  { %v335_v63 = vmax.f32 %v249_v61, 0.0  ;;  %v184_v0 = vadd.f32 %v738_v30, %v183_v62 }
  0xbe   :  { %v296_v2 = vpop.f32.mrf.mxu3 }
  0xbf   :  { %v251_v1 = vpop.f32.mrf.mxu1  ;;  %367 = vst.msk [vmem:[%s900_s3 + $0x18] sm:$0xff] %vm363_vm0, %v335_v63  ;;  %v294_v3 = vadd.f32 %v293_v56, %v184_v0 }
  0xc0   :  { %v141_v4 = vpop.f32.mrf.mxu0 }
  0xc1   :  { %v350_v5 = vmax.f32 %v294_v3, 0.0  ;;  %v142_v6 = vadd.f32 %v738_v30, %v141_v4 }
  0xc3   :  { %382 = vst.msk [vmem:[%s900_s3 + $0x90] sm:$0xff] %vm363_vm0, %v350_v5  ;;  %v252_v7 = vadd.f32 %v251_v1, %v142_v6 }
  0xc4   :  { %v186_v8 = vpop.f32.mrf.mxu2 }
  0xc5   :  { %v336_v9 = vmax.f32 %v252_v7, 0.0  ;;  %v187_v10 = vadd.f32 %v738_v30, %v186_v8 }
  0xc6   :  { %v299_v12 = vpop.f32.mrf.mxu3 }
  0xc7   :  { %v254_v11 = vpop.f32.mrf.mxu1  ;;  %368 = vst.msk [vmem:[%s900_s3 + $0x20] sm:$0xff] %vm363_vm0, %v336_v9  ;;  %v297_v13 = vadd.f32 %v296_v2, %v187_v10 }
  0xc8   :  { %v144_v14 = vpop.f32.mrf.mxu0 }
  0xc9   :  { %v351_v15 = vmax.f32 %v297_v13, 0.0  ;;  %v145_v16 = vadd.f32 %v738_v30, %v144_v14 }
  0xcb   :  { %383 = vst.msk [vmem:[%s900_s3 + $0x98] sm:$0xff] %vm363_vm0, %v351_v15  ;;  %v255_v17 = vadd.f32 %v254_v11, %v145_v16 }
  0xcc   :  { %v189_v18 = vpop.f32.mrf.mxu2 }
  0xcd   :  { %v337_v19 = vmax.f32 %v255_v17, 0.0  ;;  %v190_v20 = vadd.f32 %v738_v30, %v189_v18 }
  0xce   :  { %v302_v22 = vpop.f32.mrf.mxu3 }
  0xcf   :  { %v257_v21 = vpop.f32.mrf.mxu1  ;;  %369 = vst.msk [vmem:[%s900_s3 + $0x28] sm:$0xff] %vm363_vm0, %v337_v19  ;;  %v300_v23 = vadd.f32 %v299_v12, %v190_v20 }
  0xd0   :  { %v147_v24 = vpop.f32.mrf.mxu0 }
  0xd1   :  { %v352_v25 = vmax.f32 %v300_v23, 0.0  ;;  %v148_v26 = vadd.f32 %v738_v30, %v147_v24 }
  0xd3   :  { %384 = vst.msk [vmem:[%s900_s3 + $0xa0] sm:$0xff] %vm363_vm0, %v352_v25  ;;  %v258_v27 = vadd.f32 %v257_v21, %v148_v26 }
  0xd4   :  { %v192_v28 = vpop.f32.mrf.mxu2 }
  0xd5   :  { %v338_v29 = vmax.f32 %v258_v27, 0.0  ;;  %v193_v31 = vadd.f32 %v738_v30, %v192_v28 }
  0xd6   :  { %v305_v33 = vpop.f32.mrf.mxu3 }
  0xd7   :  { %v260_v32 = vpop.f32.mrf.mxu1  ;;  %370 = vst.msk [vmem:[%s900_s3 + $0x30] sm:$0xff] %vm363_vm0, %v338_v29  ;;  %v303_v34 = vadd.f32 %v302_v22, %v193_v31 }
  0xd8   :  { %v150_v36 = vpop.f32.mrf.mxu0 }
  0xd9   :  { %v353_v37 = vmax.f32 %v303_v34, 0.0  ;;  %v151_v38 = vadd.f32 %v738_v30, %v150_v36 }
  0xdb   :  { %385 = vst.msk [vmem:[%s900_s3 + $0xa8] sm:$0xff] %vm363_vm0, %v353_v37  ;;  %v261_v39 = vadd.f32 %v260_v32, %v151_v38 }
  0xdc   :  { %v195_v40 = vpop.f32.mrf.mxu2 }
  0xdd   :  { %v339_v41 = vmax.f32 %v261_v39, 0.0  ;;  %v196_v42 = vadd.f32 %v738_v30, %v195_v40 }
  0xde   :  { %v308_v44 = vpop.f32.mrf.mxu3 }
  0xdf   :  { %v263_v43 = vpop.f32.mrf.mxu1  ;;  %371 = vst.msk [vmem:[%s900_s3 + $0x38] sm:$0xff] %vm363_vm0, %v339_v41  ;;  %v306_v45 = vadd.f32 %v305_v33, %v196_v42 }
  0xe0   :  { %v153_v46 = vpop.f32.mrf.mxu0 }
  0xe1   :  { %v354_v47 = vmax.f32 %v306_v45, 0.0  ;;  %v154_v48 = vadd.f32 %v738_v30, %v153_v46 }
  0xe3   :  { %386 = vst.msk [vmem:[%s900_s3 + $0xb0] sm:$0xff] %vm363_vm0, %v354_v47  ;;  %v264_v49 = vadd.f32 %v263_v43, %v154_v48 }
  0xe4   :  { %v198_v50 = vpop.f32.mrf.mxu2 }
  0xe5   :  { %v340_v51 = vmax.f32 %v264_v49, 0.0  ;;  %v199_v52 = vadd.f32 %v738_v30, %v198_v50  ;;  %v175_v49 = vadd.f32 %v738_v30, %v741_v35 }
  0xe6   :  { %v311_v54 = vpop.f32.mrf.mxu3 }
  0xe7   :  { %v266_v53 = vpop.f32.mrf.mxu1  ;;  %372 = vst.msk [vmem:[%s900_s3 + $0x40] sm:$0xff] %vm363_vm0, %v340_v51  ;;  %v309_v55 = vadd.f32 %v308_v44, %v199_v52 }
  0xe8   :  { %v156_v56 = vpop.f32.mrf.mxu0 }
  0xe9   :  { %v355_v57 = vmax.f32 %v309_v55, 0.0  ;;  %v157_v58 = vadd.f32 %v738_v30, %v156_v56 }
  0xeb   :  { %387 = vst.msk [vmem:[%s900_s3 + $0xb8] sm:$0xff] %vm363_vm0, %v355_v57  ;;  %v267_v59 = vadd.f32 %v266_v53, %v157_v58 }
  0xec   :  { %v201_v60 = vpop.f32.mrf.mxu2 }
  0xed   :  { %v341_v61 = vmax.f32 %v267_v59, 0.0  ;;  %v202_v62 = vadd.f32 %v738_v30, %v201_v60 }
  0xee   :  { %v314_v0 = vpop.f32.mrf.mxu3 }
  0xef   :  { %v269_v63 = vpop.f32.mrf.mxu1  ;;  %373 = vst.msk [vmem:[%s900_s3 + $0x48] sm:$0xff] %vm363_vm0, %v341_v61  ;;  %v312_v1 = vadd.f32 %v311_v54, %v202_v62 }
  0xf0   :  { %v159_v2 = vpop.f32.mrf.mxu0 }
  0xf1   :  { %v356_v3 = vmax.f32 %v312_v1, 0.0  ;;  %v160_v4 = vadd.f32 %v738_v30, %v159_v2 }
  0xf3   :  { %388 = vst.msk [vmem:[%s900_s3 + $0xc0] sm:$0xff] %vm363_vm0, %v356_v3  ;;  %v270_v5 = vadd.f32 %v269_v63, %v160_v4 }
  0xf4   :  { %v204_v6 = vpop.f32.mrf.mxu2 }
  0xf5   :  { %v342_v7 = vmax.f32 %v270_v5, 0.0  ;;  %v205_v8 = vadd.f32 %v738_v30, %v204_v6 }
  0xf6   :  { %v317_v10 = vpop.f32.mrf.mxu3 }
  0xf7   :  { %v272_v9 = vpop.f32.mrf.mxu1  ;;  %374 = vst.msk [vmem:[%s900_s3 + $0x50] sm:$0xff] %vm363_vm0, %v342_v7  ;;  %v315_v11 = vadd.f32 %v314_v0, %v205_v8 }
  0xf8   :  { %v162_v12 = vpop.f32.mrf.mxu0 }
  0xf9   :  { %v357_v13 = vmax.f32 %v315_v11, 0.0  ;;  %v163_v14 = vadd.f32 %v738_v30, %v162_v12 }
  0xfb   :  { %389 = vst.msk [vmem:[%s900_s3 + $0xc8] sm:$0xff] %vm363_vm0, %v357_v13  ;;  %v273_v15 = vadd.f32 %v272_v9, %v163_v14 }
  0xfc   :  { %v207_v16 = vpop.f32.mrf.mxu2 }
  0xfd   :  { %v343_v17 = vmax.f32 %v273_v15, 0.0  ;;  %v208_v18 = vadd.f32 %v738_v30, %v207_v16 }
  0xfe   :  { %v320_v20 = vpop.f32.mrf.mxu3 }
  0xff   :  { %v275_v19 = vpop.f32.mrf.mxu1  ;;  %375 = vst.msk [vmem:[%s900_s3 + $0x58] sm:$0xff] %vm363_vm0, %v343_v17  ;;  %v318_v21 = vadd.f32 %v317_v10, %v208_v18 }
 0x100   :  { %v165_v22 = vpop.f32.mrf.mxu0 }
 0x101   :  { %v358_v23 = vmax.f32 %v318_v21, 0.0  ;;  %v166_v24 = vadd.f32 %v738_v30, %v165_v22 }
 0x103   :  { %390 = vst.msk [vmem:[%s900_s3 + $0xd0] sm:$0xff] %vm363_vm0, %v358_v23  ;;  %v276_v25 = vadd.f32 %v275_v19, %v166_v24 }
 0x104   :  { %v210_v26 = vpop.f32.mrf.mxu2 }
 0x105   :  { %v344_v27 = vmax.f32 %v276_v25, 0.0  ;;  %v211_v28 = vadd.f32 %v738_v30, %v210_v26 }
 0x106   :  { %v323_v33 = vpop.f32.mrf.mxu3 }
 0x107   :  { %v278_v29 = vpop.f32.mrf.mxu1  ;;  %376 = vst.msk [vmem:[%s900_s3 + $0x60] sm:$0xff] %vm363_vm0, %v344_v27  ;;  %v321_v31 = vadd.f32 %v320_v20, %v211_v28 }
 0x108   :  { %v168_v32 = vpop.f32.mrf.mxu0 }
 0x109   :  { %v359_v34 = vmax.f32 %v321_v31, 0.0  ;;  %v169_v36 = vadd.f32 %v738_v30, %v168_v32 }
 0x10b   :  { %391 = vst.msk [vmem:[%s900_s3 + $0xd8] sm:$0xff] %vm363_vm0, %v359_v34  ;;  %v279_v37 = vadd.f32 %v278_v29, %v169_v36 }
 0x10c   :  { %v213_v38 = vpop.f32.mrf.mxu2 }
 0x10d   :  { %v345_v39 = vmax.f32 %v279_v37, 0.0  ;;  %v214_v40 = vadd.f32 %v738_v30, %v213_v38 }
 0x10e   :  { %v326_v46 = vpop.f32.mrf.mxu3 }
 0x10f   :  { %v281_v41 = vpop.f32.mrf.mxu1  ;;  %377 = vst.msk [vmem:[%s900_s3 + $0x68] sm:$0xff] %vm363_vm0, %v345_v39  ;;  %v324_v42 = vadd.f32 %v323_v33, %v214_v40 }
 0x110   :  { %v171_v43 = vpop.f32.mrf.mxu0 }
 0x111   :  { %v360_v44 = vmax.f32 %v324_v42, 0.0  ;;  %v172_v45 = vadd.f32 %v738_v30, %v171_v43 }
 0x113   :  { %392 = vst.msk [vmem:[%s900_s3 + $0xe0] sm:$0xff] %vm363_vm0, %v360_v44  ;;  %v282_v47 = vadd.f32 %v281_v41, %v172_v45 }
 0x114   :  { %v216_v48 = vpop.f32.mrf.mxu2 }
 0x115   :  { %v346_v50 = vmax.f32 %v282_v47, 0.0  ;;  %v217_v51 = vadd.f32 %v738_v30, %v216_v48 }
 0x116   :  { %v329_v57 = vpop.f32.mrf.mxu3 }
 0x117   :  { %v284_v52 = vpop.f32.mrf.mxu1  ;;  %378 = vst.msk [vmem:[%s900_s3 + $0x70] sm:$0xff] %vm363_vm0, %v346_v50  ;;  %v327_v54 = vadd.f32 %v326_v46, %v217_v51 }
 0x118   :  { %v285_v53 = vadd.f32 %v284_v52, %v175_v49 }
 0x119   :  { %v361_v56 = vmax.f32 %v327_v54, 0.0 }
 0x11a   :  { %v347_v55 = vmax.f32 %v285_v53, 0.0 }
 0x11b   :  { %393 = vst.msk [vmem:[%s900_s3 + $0xe8] sm:$0xff] %vm363_vm0, %v361_v56 }
 0x11c   :  { %379 = vst.msk [vmem:[%s900_s3 + $0x78] sm:$0xff] %vm363_vm0, %v347_v55  ;;  %v219_v35 = vpop.f32.mrf.mxu2 }
 0x11d   :  { %v220_v58 = vadd.f32 %v738_v30, %v219_v35 }
 0x11f   :  { %v330_v59 = vadd.f32 %v329_v57, %v220_v58 }
 0x121   :  { %v362_v60 = vmax.f32 %v330_v59, 0.0 }
 0x123   :  { %395 = vst.msk [vmem:[%s900_s3 + $0xf0] sm:$0x3] %vm394_vm1, %v362_v60 }

// kernel: actor_critic_forward.4
= control target key start
LH: loop header
LB: loop body
LE: loop exit
PB: predicated region body
PF: predicated region fallthrough
CT: control target
= control target key end

     0   :  { %vm218_vm0 = vcmask 523264   ;;  %s507_s1 = inlined_call_operand.vmem [shape: f32[512,64], index: 1, kind: input, shape index: {}]   ;;  %s508_s2 = inlined_call_operand.vmem [shape: f32[1,64], index: 2, kind: input, shape index: {}]   ;;  %s509_s0 = inlined_call_operand.vmem [shape: f32[32,512], index: 0, kind: input, shape index: {}]   ;;  %s510_s3 = inlined_call_operand.vmem [shape: f32[32,64], index: 3, kind: output, shape index: {}]  }
   0x1   :  { %v77_v0 = vld [vmem:[%s507_s1 + $0x178] sm:$0xff]  ;;  %v76_v2 = vld [vmem:[%s507_s1 + $0x170] sm:$0xff]  ;;  %v75_v6 = vld [vmem:[%s507_s1 + $0x168] sm:$0xff] }
   0x2   :  { %v45_v1 = vld [vmem:[%s507_s1 + $0x78] sm:$0xff]  ;;  %156 = vmatpush.msra.mxu2 %v77_v0  ;;  %v44_v4 = vld [vmem:[%s507_s1 + $0x70] sm:$0xff]  ;;  %v43_v8 = vld [vmem:[%s507_s1 + $0x68] sm:$0xff] }
   0x3   :  { %98 = vmatpush.msra.mxu0 %v45_v1  ;;  %v93_v3 = vld [vmem:[%s507_s1 + $0x1f8] sm:$0xff]  ;;  %v92_v7 = vld [vmem:[%s507_s1 + $0x1f0] sm:$0xff]  ;;  %v91_v10 = vld [vmem:[%s507_s1 + $0x1e8] sm:$0xff] }
   0x4   :  { %v61_v5 = vld [vmem:[%s507_s1 + $0xf8] sm:$0xff]  ;;  %185 = vmatpush.msra.mxu3 %v93_v3  ;;  %157 = vmatpush.msra.mxu2 %v76_v2  ;;  %v60_v9 = vld [vmem:[%s507_s1 + $0xf0] sm:$0xff]  ;;  %v74_v11 = vld [vmem:[%s507_s1 + $0x160] sm:$0xff] }
   0x5   :  { %127 = vmatpush.msra.mxu1 %v61_v5  ;;  %99 = vmatpush.msra.mxu0 %v44_v4  ;;  %v42_v12 = vld [vmem:[%s507_s1 + $0x60] sm:$0xff]  ;;  %v59_v13 = vld [vmem:[%s507_s1 + $0xe8] sm:$0xff]  ;;  %v73_v16 = vld [vmem:[%s507_s1 + $0x158] sm:$0xff] }
   0x6   :  { %186 = vmatpush.msra.mxu3 %v92_v7  ;;  %158 = vmatpush.msra.mxu2 %v75_v6  ;;  %v90_v14 = vld [vmem:[%s507_s1 + $0x1e0] sm:$0xff]  ;;  %v41_v17 = vld [vmem:[%s507_s1 + $0x58] sm:$0xff]  ;;  %v72_v20 = vld [vmem:[%s507_s1 + $0x150] sm:$0xff] }
   0x7   :  { %128 = vmatpush.msra.mxu1 %v60_v9  ;;  %100 = vmatpush.msra.mxu0 %v43_v8  ;;  %v58_v15 = vld [vmem:[%s507_s1 + $0xe0] sm:$0xff]  ;;  %v89_v18 = vld [vmem:[%s507_s1 + $0x1d8] sm:$0xff]  ;;  %v40_v21 = vld [vmem:[%s507_s1 + $0x50] sm:$0xff] }
   0x8   :  { %187 = vmatpush.msra.mxu3 %v91_v10  ;;  %159 = vmatpush.msra.mxu2 %v74_v11  ;;  %v57_v19 = vld [vmem:[%s507_s1 + $0xd8] sm:$0xff]  ;;  %v88_v22 = vld [vmem:[%s507_s1 + $0x1d0] sm:$0xff]  ;;  %v71_v24 = vld [vmem:[%s507_s1 + $0x148] sm:$0xff] }
   0x9   :  { %129 = vmatpush.msra.mxu1 %v59_v13  ;;  %101 = vmatpush.msra.mxu0 %v42_v12  ;;  %v56_v23 = vld [vmem:[%s507_s1 + $0xd0] sm:$0xff]  ;;  %v39_v25 = vld [vmem:[%s507_s1 + $0x48] sm:$0xff]  ;;  %v70_v28 = vld [vmem:[%s507_s1 + $0x140] sm:$0xff] }
   0xa   :  { %188 = vmatpush.msra.mxu3 %v90_v14  ;;  %160 = vmatpush.msra.mxu2 %v73_v16  ;;  %v87_v26 = vld [vmem:[%s507_s1 + $0x1c8] sm:$0xff]  ;;  %v38_v29 = vld [vmem:[%s507_s1 + $0x40] sm:$0xff]  ;;  %v69_v32 = vld [vmem:[%s507_s1 + $0x138] sm:$0xff] }
   0xb   :  { %130 = vmatpush.msra.mxu1 %v58_v15  ;;  %102 = vmatpush.msra.mxu0 %v41_v17  ;;  %v55_v27 = vld [vmem:[%s507_s1 + $0xc8] sm:$0xff]  ;;  %v86_v30 = vld [vmem:[%s507_s1 + $0x1c0] sm:$0xff]  ;;  %v37_v33 = vld [vmem:[%s507_s1 + $0x38] sm:$0xff] }
   0xc   :  { %189 = vmatpush.msra.mxu3 %v89_v18  ;;  %161 = vmatpush.msra.mxu2 %v72_v20  ;;  %v54_v31 = vld [vmem:[%s507_s1 + $0xc0] sm:$0xff]  ;;  %v85_v34 = vld [vmem:[%s507_s1 + $0x1b8] sm:$0xff]  ;;  %v68_v36 = vld [vmem:[%s507_s1 + $0x130] sm:$0xff] }
   0xd   :  { %131 = vmatpush.msra.mxu1 %v57_v19  ;;  %103 = vmatpush.msra.mxu0 %v40_v21  ;;  %v53_v35 = vld [vmem:[%s507_s1 + $0xb8] sm:$0xff]  ;;  %v36_v37 = vld [vmem:[%s507_s1 + $0x30] sm:$0xff]  ;;  %v67_v40 = vld [vmem:[%s507_s1 + $0x128] sm:$0xff] }
   0xe   :  { %190 = vmatpush.msra.mxu3 %v88_v22  ;;  %162 = vmatpush.msra.mxu2 %v71_v24  ;;  %v84_v38 = vld [vmem:[%s507_s1 + $0x1b0] sm:$0xff]  ;;  %v35_v41 = vld [vmem:[%s507_s1 + $0x28] sm:$0xff]  ;;  %v66_v44 = vld [vmem:[%s507_s1 + $0x120] sm:$0xff] }
   0xf   :  { %132 = vmatpush.msra.mxu1 %v56_v23  ;;  %104 = vmatpush.msra.mxu0 %v39_v25  ;;  %v52_v39 = vld [vmem:[%s507_s1 + $0xb0] sm:$0xff]  ;;  %v83_v42 = vld [vmem:[%s507_s1 + $0x1a8] sm:$0xff]  ;;  %v34_v45 = vld [vmem:[%s507_s1 + $0x20] sm:$0xff] }
  0x10   :  { %191 = vmatpush.msra.mxu3 %v87_v26  ;;  %163 = vmatpush.msra.mxu2 %v70_v28  ;;  %v51_v43 = vld [vmem:[%s507_s1 + $0xa8] sm:$0xff]  ;;  %v82_v46 = vld [vmem:[%s507_s1 + $0x1a0] sm:$0xff]  ;;  %v65_v48 = vld [vmem:[%s507_s1 + $0x118] sm:$0xff] }
  0x11   :  { %133 = vmatpush.msra.mxu1 %v55_v27  ;;  %105 = vmatpush.msra.mxu0 %v38_v29  ;;  %v50_v47 = vld [vmem:[%s507_s1 + $0xa0] sm:$0xff]  ;;  %v33_v49 = vld [vmem:[%s507_s1 + $0x18] sm:$0xff]  ;;  %v64_v52 = vld [vmem:[%s507_s1 + $0x110] sm:$0xff] }
  0x12   :  { %192 = vmatpush.msra.mxu3 %v86_v30  ;;  %164 = vmatpush.msra.mxu2 %v69_v32  ;;  %v81_v50 = vld [vmem:[%s507_s1 + $0x198] sm:$0xff]  ;;  %v32_v53 = vld [vmem:[%s507_s1 + $0x10] sm:$0xff]  ;;  %v63_v56 = vld [vmem:[%s507_s1 + $0x108] sm:$0xff] }
  0x13   :  { %134 = vmatpush.msra.mxu1 %v54_v31  ;;  %106 = vmatpush.msra.mxu0 %v37_v33  ;;  %v49_v51 = vld [vmem:[%s507_s1 + $0x98] sm:$0xff]  ;;  %v80_v54 = vld [vmem:[%s507_s1 + $0x190] sm:$0xff]  ;;  %v31_v57 = vld [vmem:[%s507_s1 + $0x8] sm:$0xff] }
  0x14   :  { %193 = vmatpush.msra.mxu3 %v85_v34  ;;  %165 = vmatpush.msra.mxu2 %v68_v36  ;;  %v48_v55 = vld [vmem:[%s507_s1 + $0x90] sm:$0xff]  ;;  %v79_v58 = vld [vmem:[%s507_s1 + $0x188] sm:$0xff]  ;;  %v62_v60 = vld [vmem:[%s507_s1 + $0x100] sm:$0xff] }
  0x15   :  { %135 = vmatpush.msra.mxu1 %v53_v35  ;;  %107 = vmatpush.msra.mxu0 %v36_v37  ;;  %v47_v59 = vld [vmem:[%s507_s1 + $0x88] sm:$0xff]  ;;  %v30_v61 = vld [vmem:[%s507_s1] sm:$0xff]  ;;  %v16_v62 = vld [vmem:[%s509_s0 + $0x10] sm:$0xff] }
  0x16   :  { %194 = vmatpush.msra.mxu3 %v84_v38  ;;  %166 = vmatpush.msra.mxu2 %v67_v40  ;;  %v78_v63 = vld [vmem:[%s507_s1 + $0x180] sm:$0xff]  ;;  %v17_v1 = vld [vmem:[%s509_s0 + $0x18] sm:$0xff]  ;;  %v15_v3 = vld [vmem:[%s509_s0 + $0x8] sm:$0xff] }
  0x17   :  { %136 = vmatpush.msra.mxu1 %v52_v39  ;;  %108 = vmatpush.msra.mxu0 %v35_v41  ;;  %v14_v0 = vld [vmem:[%s509_s0] sm:$0xff]  ;;  %v20_v4 = vld [vmem:[%s509_s0 + $0x30] sm:$0xff]  ;;  %v21_v6 = vld [vmem:[%s509_s0 + $0x38] sm:$0xff] }
  0x18   :  { %195 = vmatpush.msra.mxu3 %v83_v42  ;;  %167 = vmatpush.msra.mxu2 %v66_v44  ;;  %v46_v2 = vld [vmem:[%s507_s1 + $0x80] sm:$0xff]  ;;  %v19_v7 = vld [vmem:[%s509_s0 + $0x28] sm:$0xff]  ;;  %v24_v8 = vld [vmem:[%s509_s0 + $0x50] sm:$0xff] }
  0x19   :  { %137 = vmatpush.msra.mxu1 %v51_v43  ;;  %109 = vmatpush.msra.mxu0 %v34_v45  ;;  %v18_v5 = vld [vmem:[%s509_s0 + $0x20] sm:$0xff]  ;;  %v25_v10 = vld [vmem:[%s509_s0 + $0x58] sm:$0xff]  ;;  %v23_v11 = vld [vmem:[%s509_s0 + $0x48] sm:$0xff] }
  0x1a   :  { %196 = vmatpush.msra.mxu3 %v82_v46  ;;  %168 = vmatpush.msra.mxu2 %v65_v48  ;;  %v22_v9 = vld [vmem:[%s509_s0 + $0x40] sm:$0xff]  ;;  %v28_v12 = vld [vmem:[%s509_s0 + $0x70] sm:$0xff]  ;;  %v29_v14 = vld [vmem:[%s509_s0 + $0x78] sm:$0xff] }
  0x1b   :  { %138 = vmatpush.msra.mxu1 %v50_v47  ;;  %110 = vmatpush.msra.mxu0 %v33_v49  ;;  %v26_v13 = vld [vmem:[%s509_s0 + $0x60] sm:$0xff]  ;;  %v27_v15 = vld [vmem:[%s509_s0 + $0x68] sm:$0xff] }
  0x1c   :  { %197 = vmatpush.msra.mxu3 %v81_v50  ;;  %169 = vmatpush.msra.mxu2 %v64_v52  ;;  %v227_v16 = vld [vmem:[%s508_s2] ss:$0 sm:$0xff] }
  0x1d   :  { %139 = vmatpush.msra.mxu1 %v49_v51  ;;  %111 = vmatpush.msra.mxu0 %v32_v53 }
  0x1e   :  { %198 = vmatpush.msra.mxu3 %v80_v54  ;;  %170 = vmatpush.msra.mxu2 %v63_v56 }
  0x1f   :  { %140 = vmatpush.msra.mxu1 %v48_v55  ;;  %112 = vmatpush.msra.mxu0 %v31_v57 }
  0x20   :  { %199 = vmatpush.msra.mxu3 %v79_v58  ;;  %171 = vmatpush.msra.mxu2 %v62_v60 }
  0x21   :  { %141 = vmatpush.msra.mxu1 %v47_v59  ;;  %113 = vmatpush.msra.mxu0 %v30_v61 }
  0x22   :  { %172 = vmatmul.f32.vlgmr.msra.gmra.mxu2 %v16_v62  ;;  %200 = vmatpush.msra.mxu3 %v78_v63 }
  0x23   :  { %114 = vmatmul.f32.vlgmr.msra.gmra.mxu0 %v14_v0  ;;  %201 = vmatmul.f32.vlgmr.msra.gmra.mxu3 %v17_v1 }
  0x24   :  { %142 = vmatpush.msra.mxu1 %v46_v2 }
  0x25   :  { %143 = vmatmul.f32.vlgmr.msra.gmra.mxu1 %v15_v3 }
  0x2a   :  { %175 = vmatmul.f32.gmra.mxu2 %v20_v4 }
  0x2b   :  { %117 = vmatmul.f32.gmra.mxu0 %v18_v5  ;;  %204 = vmatmul.f32.gmra.mxu3 %v21_v6 }
  0x2d   :  { %146 = vmatmul.f32.gmra.mxu1 %v19_v7 }
  0x32   :  { %178 = vmatmul.f32.gmra.mxu2 %v24_v8 }
  0x33   :  { %120 = vmatmul.f32.gmra.mxu0 %v22_v9  ;;  %207 = vmatmul.f32.gmra.mxu3 %v25_v10 }
  0x35   :  { %149 = vmatmul.f32.gmra.mxu1 %v23_v11 }
  0x3a   :  { %181 = vmatmul.f32.gmra.mxu2 %v28_v12 }
  0x3b   :  { %123 = vmatmul.f32.gmra.mxu0 %v26_v13  ;;  %210 = vmatmul.f32.gmra.mxu3 %v29_v14 }
  0x3d   :  { %152 = vmatmul.f32.gmra.mxu1 %v27_v15 }
  0xa0   :  { %v115_v17 = vpop.f32.mrf.mxu0 }
  0xa1   :  { %v116_v18 = vadd.f32 %v227_v16, %v115_v17 }
  0xa2   :  { %v144_v19 = vpop.f32.mrf.mxu1 }
  0xa3   :  { %v145_v20 = vadd.f32 %v144_v19, %v116_v18 }
  0xa5   :  { %v173_v21 = vpop.f32.mrf.mxu2 }
  0xa6   :  { %v174_v22 = vadd.f32 %v173_v21, %v145_v20  ;;  %v202_v23 = vpop.f32.mrf.mxu3 }
  0xa8   :  { %v203_v24 = vadd.f32 %v202_v23, %v174_v22  ;;  %v118_v25 = vpop.f32.mrf.mxu0 }
  0xa9   :  { %v119_v26 = vadd.f32 %v227_v16, %v118_v25 }
  0xaa   :  { %v214_v27 = vmax.f32 %v203_v24, 0.0  ;;  %v147_v28 = vpop.f32.mrf.mxu1 }
  0xab   :  { %v148_v29 = vadd.f32 %v147_v28, %v119_v26 }
  0xac   :  { %219 = vst.msk [vmem:[%s510_s3] sm:$0xff] %vm218_vm0, %v214_v27 }
  0xad   :  { %v176_v30 = vpop.f32.mrf.mxu2 }
  0xae   :  { %v177_v31 = vadd.f32 %v176_v30, %v148_v29  ;;  %v205_v32 = vpop.f32.mrf.mxu3 }
  0xb0   :  { %v206_v33 = vadd.f32 %v205_v32, %v177_v31  ;;  %v121_v34 = vpop.f32.mrf.mxu0 }
  0xb1   :  { %v122_v35 = vadd.f32 %v227_v16, %v121_v34 }
  0xb2   :  { %v215_v36 = vmax.f32 %v206_v33, 0.0  ;;  %v150_v37 = vpop.f32.mrf.mxu1 }
  0xb3   :  { %v151_v38 = vadd.f32 %v150_v37, %v122_v35 }
  0xb4   :  { %220 = vst.msk [vmem:[%s510_s3 + $0x8] sm:$0xff] %vm218_vm0, %v215_v36 }
  0xb5   :  { %v179_v39 = vpop.f32.mrf.mxu2 }
  0xb6   :  { %v180_v40 = vadd.f32 %v179_v39, %v151_v38  ;;  %v208_v41 = vpop.f32.mrf.mxu3 }
  0xb8   :  { %v209_v42 = vadd.f32 %v208_v41, %v180_v40  ;;  %v124_v43 = vpop.f32.mrf.mxu0 }
  0xb9   :  { %v125_v44 = vadd.f32 %v227_v16, %v124_v43 }
  0xba   :  { %v216_v45 = vmax.f32 %v209_v42, 0.0  ;;  %v153_v46 = vpop.f32.mrf.mxu1 }
  0xbb   :  { %v154_v47 = vadd.f32 %v153_v46, %v125_v44 }
  0xbc   :  { %221 = vst.msk [vmem:[%s510_s3 + $0x10] sm:$0xff] %vm218_vm0, %v216_v45 }
  0xbd   :  { %v182_v48 = vpop.f32.mrf.mxu2 }
  0xbe   :  { %v183_v49 = vadd.f32 %v182_v48, %v154_v47  ;;  %v211_v50 = vpop.f32.mrf.mxu3 }
  0xc0   :  { %v212_v51 = vadd.f32 %v211_v50, %v183_v49 }
  0xc2   :  { %v217_v52 = vmax.f32 %v212_v51, 0.0 }
  0xc4   :  { %222 = vst.msk [vmem:[%s510_s3 + $0x18] sm:$0xff] %vm218_vm0, %v217_v52 }

// kernel: actor_critic_forward.5
= control target key start
LH: loop header
LB: loop body
LE: loop exit
PB: predicated region body
PF: predicated region fallthrough
CT: control target
= control target key end

     0   :  { %18 = vsyncpa [#allocation3], 0  ;;  %s3109_s0 = inlined_call_operand.vmem [shape: f32[4,2,576], index: 0, kind: input, shape index: {}]   ;;  %s3110_s1 = inlined_call_operand.vmem [shape: f32[576,64], index: 1, kind: input, shape index: {}]   ;;  %s3111_s2 = inlined_call_operand.vmem [shape: f32[1,64], index: 2, kind: input, shape index: {}]   ;;  %s3112_s3 = inlined_call_operand.vmem [shape: f32[2,128], index: 3, kind: input, shape index: {}]   ;;  %s3113_s4 = inlined_call_operand.vmem [shape: f32[2,128], index: 4, kind: input, shape index: {}]   ;;  %s3114_s5 = inlined_call_operand.vmem [shape: f32[256,512], index: 5, kind: input, shape index: {}]   ;;  %s3115_s6 = inlined_call_operand.vmem [shape: f32[128,512], index: 6, kind: input, shape index: {}]   ;;  %s3116_s7 = inlined_call_operand.vmem [shape: f32[1,512], index: 7, kind: input, shape index: {}]   ;;  %s3117_s8 = inlined_call_operand.vmem [shape: f32[128,128], index: 8, kind: input, shape index: {}]   ;;  %s3118_s9 = inlined_call_operand.vmem [shape: f32[1,128], index: 9, kind: input, shape index: {}]   ;;  %s3119_s10 = inlined_call_operand.hbm [shape: f32[2,128], index: 10, kind: output, shape index: {0}]   ;;  %s3120_s11 = inlined_call_operand.hbm [shape: f32[2,128], index: 11, kind: output, shape index: {1}]   ;;  %s3121_s12 = inlined_call_operand.vmem [shape: f32[2,128], index: 12, kind: output, shape index: {2}]  }
   0x1   :  { %v102_v0 = vld [vmem:[%s3115_s6 + $0x1e8] sm:$0xff]  ;;  %v103_v2 = vld [vmem:[%s3115_s6 + $0x1f0] sm:$0xff]  ;;  %v101_v3 = vld [vmem:[%s3115_s6 + $0x1e0] sm:$0xff] }
   0x2   :  { %v98_v1 = vld [vmem:[%s3115_s6 + $0x1c8] sm:$0xff]  ;;  %135 = vmatpush.msra.mxu1 %v102_v0  ;;  %155 = vmatpush.msra.mxu2 %v103_v2  ;;  %v99_v4 = vld [vmem:[%s3115_s6 + $0x1d0] sm:$0xff]  ;;  %v104_v6 = vld [vmem:[%s3115_s6 + $0x1f8] sm:$0xff] }
   0x3   :  { %v94_v5 = vld [vmem:[%s3115_s6 + $0x1a8] sm:$0xff]  ;;  %115 = vmatpush.msra.mxu0 %v101_v3  ;;  %v97_v7 = vld [vmem:[%s3115_s6 + $0x1c0] sm:$0xff]  ;;  %v95_v8 = vld [vmem:[%s3115_s6 + $0x1b0] sm:$0xff]  ;;  %175 = vmatpush.msra.mxu3 %v104_v6 }
   0x4   :  { %136 = vmatpush.msra.mxu1 %v98_v1  ;;  %156 = vmatpush.msra.mxu2 %v99_v4  ;;  %v100_v9 = vld [vmem:[%s3115_s6 + $0x1d8] sm:$0xff]  ;;  %v90_v10 = vld [vmem:[%s3115_s6 + $0x188] sm:$0xff]  ;;  %v93_v11 = vld [vmem:[%s3115_s6 + $0x1a0] sm:$0xff] }
   0x5   :  { %116 = vmatpush.msra.mxu0 %v97_v7  ;;  %v91_v12 = vld [vmem:[%s3115_s6 + $0x190] sm:$0xff]  ;;  %v96_v13 = vld [vmem:[%s3115_s6 + $0x1b8] sm:$0xff]  ;;  %v89_v14 = vld [vmem:[%s3115_s6 + $0x180] sm:$0xff]  ;;  %176 = vmatpush.msra.mxu3 %v100_v9 }
   0x6   :  { %137 = vmatpush.msra.mxu1 %v94_v5  ;;  %157 = vmatpush.msra.mxu2 %v95_v8  ;;  %v86_v15 = vld [vmem:[%s3115_s6 + $0x168] sm:$0xff]  ;;  %v87_v16 = vld [vmem:[%s3115_s6 + $0x170] sm:$0xff]  ;;  %v92_v17 = vld [vmem:[%s3115_s6 + $0x198] sm:$0xff] }
   0x7   :  { %117 = vmatpush.msra.mxu0 %v93_v11  ;;  %v85_v18 = vld [vmem:[%s3115_s6 + $0x160] sm:$0xff]  ;;  %177 = vmatpush.msra.mxu3 %v96_v13  ;;  %v82_v19 = vld [vmem:[%s3115_s6 + $0x148] sm:$0xff]  ;;  %v83_v20 = vld [vmem:[%s3115_s6 + $0x150] sm:$0xff] }
   0x8   :  { %138 = vmatpush.msra.mxu1 %v90_v10  ;;  %158 = vmatpush.msra.mxu2 %v91_v12  ;;  %v88_v21 = vld [vmem:[%s3115_s6 + $0x178] sm:$0xff]  ;;  %v81_v22 = vld [vmem:[%s3115_s6 + $0x140] sm:$0xff]  ;;  %v78_v23 = vld [vmem:[%s3115_s6 + $0x128] sm:$0xff] }
   0x9   :  { %118 = vmatpush.msra.mxu0 %v89_v14  ;;  %178 = vmatpush.msra.mxu3 %v92_v17  ;;  %v79_v24 = vld [vmem:[%s3115_s6 + $0x130] sm:$0xff]  ;;  %v84_v25 = vld [vmem:[%s3115_s6 + $0x158] sm:$0xff]  ;;  %v77_v26 = vld [vmem:[%s3115_s6 + $0x120] sm:$0xff] }
   0xa   :  { %139 = vmatpush.msra.mxu1 %v86_v15  ;;  %159 = vmatpush.msra.mxu2 %v87_v16  ;;  %v74_v27 = vld [vmem:[%s3115_s6 + $0x108] sm:$0xff]  ;;  %v75_v28 = vld [vmem:[%s3115_s6 + $0x110] sm:$0xff]  ;;  %v80_v29 = vld [vmem:[%s3115_s6 + $0x138] sm:$0xff] }
   0xb   :  { %119 = vmatpush.msra.mxu0 %v85_v18  ;;  %179 = vmatpush.msra.mxu3 %v88_v21  ;;  %v73_v30 = vld [vmem:[%s3115_s6 + $0x100] sm:$0xff]  ;;  %v70_v31 = vld [vmem:[%s3115_s6 + $0xe8] sm:$0xff]  ;;  %v71_v32 = vld [vmem:[%s3115_s6 + $0xf0] sm:$0xff] }
   0xc   :  { %140 = vmatpush.msra.mxu1 %v82_v19  ;;  %160 = vmatpush.msra.mxu2 %v83_v20  ;;  %v76_v33 = vld [vmem:[%s3115_s6 + $0x118] sm:$0xff]  ;;  %v69_v34 = vld [vmem:[%s3115_s6 + $0xe0] sm:$0xff]  ;;  %v66_v35 = vld [vmem:[%s3115_s6 + $0xc8] sm:$0xff] }
   0xd   :  { %120 = vmatpush.msra.mxu0 %v81_v22  ;;  %180 = vmatpush.msra.mxu3 %v84_v25  ;;  %v67_v36 = vld [vmem:[%s3115_s6 + $0xd0] sm:$0xff]  ;;  %v72_v37 = vld [vmem:[%s3115_s6 + $0xf8] sm:$0xff]  ;;  %v65_v38 = vld [vmem:[%s3115_s6 + $0xc0] sm:$0xff] }
   0xe   :  { %141 = vmatpush.msra.mxu1 %v78_v23  ;;  %161 = vmatpush.msra.mxu2 %v79_v24  ;;  %v62_v39 = vld [vmem:[%s3115_s6 + $0xa8] sm:$0xff]  ;;  %v63_v40 = vld [vmem:[%s3115_s6 + $0xb0] sm:$0xff]  ;;  %v68_v41 = vld [vmem:[%s3115_s6 + $0xd8] sm:$0xff] }
   0xf   :  { %121 = vmatpush.msra.mxu0 %v77_v26  ;;  %181 = vmatpush.msra.mxu3 %v80_v29  ;;  %v61_v42 = vld [vmem:[%s3115_s6 + $0xa0] sm:$0xff]  ;;  %v58_v43 = vld [vmem:[%s3115_s6 + $0x88] sm:$0xff]  ;;  %v59_v44 = vld [vmem:[%s3115_s6 + $0x90] sm:$0xff] }
  0x10   :  { %142 = vmatpush.msra.mxu1 %v74_v27  ;;  %162 = vmatpush.msra.mxu2 %v75_v28  ;;  %v64_v45 = vld [vmem:[%s3115_s6 + $0xb8] sm:$0xff]  ;;  %v57_v46 = vld [vmem:[%s3115_s6 + $0x80] sm:$0xff]  ;;  %v54_v47 = vld [vmem:[%s3115_s6 + $0x68] sm:$0xff] }
  0x11   :  { %122 = vmatpush.msra.mxu0 %v73_v30  ;;  %182 = vmatpush.msra.mxu3 %v76_v33  ;;  %v55_v48 = vld [vmem:[%s3115_s6 + $0x70] sm:$0xff]  ;;  %v60_v49 = vld [vmem:[%s3115_s6 + $0x98] sm:$0xff]  ;;  %v53_v50 = vld [vmem:[%s3115_s6 + $0x60] sm:$0xff] }
  0x12   :  { %143 = vmatpush.msra.mxu1 %v70_v31  ;;  %163 = vmatpush.msra.mxu2 %v71_v32  ;;  %v50_v51 = vld [vmem:[%s3115_s6 + $0x48] sm:$0xff]  ;;  %v51_v52 = vld [vmem:[%s3115_s6 + $0x50] sm:$0xff]  ;;  %v56_v53 = vld [vmem:[%s3115_s6 + $0x78] sm:$0xff] }
  0x13   :  { %123 = vmatpush.msra.mxu0 %v69_v34  ;;  %183 = vmatpush.msra.mxu3 %v72_v37  ;;  %v49_v54 = vld [vmem:[%s3115_s6 + $0x40] sm:$0xff]  ;;  %v46_v55 = vld [vmem:[%s3115_s6 + $0x28] sm:$0xff]  ;;  %v47_v56 = vld [vmem:[%s3115_s6 + $0x30] sm:$0xff] }
  0x14   :  { %144 = vmatpush.msra.mxu1 %v66_v35  ;;  %164 = vmatpush.msra.mxu2 %v67_v36  ;;  %v52_v57 = vld [vmem:[%s3115_s6 + $0x58] sm:$0xff]  ;;  %v45_v58 = vld [vmem:[%s3115_s6 + $0x20] sm:$0xff]  ;;  %v42_v59 = vld [vmem:[%s3115_s6 + $0x8] sm:$0xff] }
  0x15   :  { %124 = vmatpush.msra.mxu0 %v65_v38  ;;  %184 = vmatpush.msra.mxu3 %v68_v41  ;;  %v43_v60 = vld [vmem:[%s3115_s6 + $0x10] sm:$0xff]  ;;  %v1782_v61 = vld [vmem:[%s3110_s1 + $0xf8] sm:$0xff]  ;;  %v41_v0 = vld [vmem:[%s3115_s6] sm:$0xff] }
  0x16   :  { %145 = vmatpush.msra.mxu1 %v62_v39  ;;  %165 = vmatpush.msra.mxu2 %v63_v40  ;;  %v48_v62 = vld [vmem:[%s3115_s6 + $0x38] sm:$0xff]  ;;  %v1798_v1 = vld [vmem:[%s3110_s1 + $0xf0] sm:$0xff]  ;;  %v1818_v5 = vld [vmem:[%s3110_s1 + $0xe8] sm:$0xff] }
  0x17   :  { %125 = vmatpush.msra.mxu0 %v61_v42  ;;  %185 = vmatpush.msra.mxu3 %v64_v45  ;;  %v1790_v63 = vld [vmem:[%s3110_s1 + $0x178] sm:$0xff]  ;;  %v1812_v4 = vld [vmem:[%s3110_s1 + $0x170] sm:$0xff]  ;;  %v1834_v8 = vld [vmem:[%s3110_s1 + $0x168] sm:$0xff] }
  0x18   :  { %146 = vmatpush.msra.mxu1 %v58_v43  ;;  %166 = vmatpush.msra.mxu2 %v59_v44  ;;  %v44_v2 = vld [vmem:[%s3115_s6 + $0x18] sm:$0xff]  ;;  %v1829_v7 = vld [vmem:[%s3110_s1 + $0x70] sm:$0xff]  ;;  %v1841_v9 = vld [vmem:[%s3110_s1 + $0xe0] sm:$0xff] }
  0x19   :  { %126 = vmatpush.msra.mxu0 %v57_v46  ;;  %186 = vmatpush.msra.mxu3 %v60_v49  ;;  %v1807_v3 = vld [vmem:[%s3110_s1 + $0x78] sm:$0xff]  ;;  %v1846_v10 = vld [vmem:[%s3110_s1 + $0x1f0] sm:$0xff]  ;;  %v1853_v11 = vld [vmem:[%s3110_s1 + $0x68] sm:$0xff] }
  0x1a   :  { %147 = vmatpush.msra.mxu1 %v54_v47  ;;  %167 = vmatpush.msra.mxu2 %v55_v48  ;;  %v1823_v6 = vld [vmem:[%s3110_s1 + $0x1f8] sm:$0xff]  ;;  %v1858_v12 = vld [vmem:[%s3110_s1 + $0x160] sm:$0xff]  ;;  %v1870_v14 = vld [vmem:[%s3110_s1 + $0x1e8] sm:$0xff] }
  0x1b   :  { %127 = vmatpush.msra.mxu0 %v53_v50  ;;  %187 = vmatpush.msra.mxu3 %v56_v53  ;;  %v1865_v13 = vld [vmem:[%s3110_s1 + $0xd8] sm:$0xff]  ;;  %v1877_v15 = vld [vmem:[%s3110_s1 + $0x60] sm:$0xff]  ;;  %v1889_v17 = vld [vmem:[%s3110_s1 + $0xd0] sm:$0xff] }
  0x1c   :  { %148 = vmatpush.msra.mxu1 %v50_v51  ;;  %168 = vmatpush.msra.mxu2 %v51_v52  ;;  %v1882_v16 = vld [vmem:[%s3110_s1 + $0x158] sm:$0xff]  ;;  %v1894_v18 = vld [vmem:[%s3110_s1 + $0x1e0] sm:$0xff]  ;;  %v1906_v20 = vld [vmem:[%s3110_s1 + $0x150] sm:$0xff] }
  0x1d   :  { %128 = vmatpush.msra.mxu0 %v49_v54  ;;  %188 = vmatpush.msra.mxu3 %v52_v57  ;;  %v1901_v19 = vld [vmem:[%s3110_s1 + $0x58] sm:$0xff]  ;;  %v1913_v21 = vld [vmem:[%s3110_s1 + $0xc8] sm:$0xff]  ;;  %v1925_v23 = vld [vmem:[%s3110_s1 + $0xc0] sm:$0xff] }
  0x1e   :  { %149 = vmatpush.msra.mxu1 %v46_v55  ;;  %169 = vmatpush.msra.mxu2 %v47_v56  ;;  %v1918_v22 = vld [vmem:[%s3110_s1 + $0x1d8] sm:$0xff]  ;;  %v1930_v24 = vld [vmem:[%s3110_s1 + $0x50] sm:$0xff]  ;;  %v1935_v25 = vld [vmem:[%s3110_s1 + $0x148] sm:$0xff] }
  0x1f   :  { %129 = vmatpush.msra.mxu0 %v45_v58  ;;  %189 = vmatpush.msra.mxu3 %v48_v62  ;;  %v1942_v26 = vld [vmem:[%s3110_s1 + $0x1d0] sm:$0xff]  ;;  %v1947_v27 = vld [vmem:[%s3110_s1 + $0xb8] sm:$0xff]  ;;  %v195_v28 = vld [vmem:[%s3109_s0] sm:$0xff] }
  0x20   :  { %150 = vmatpush.msra.mxu1 %v42_v59  ;;  %170 = vmatpush.msra.mxu2 %v43_v60  ;;  %v1957_v29 = vld [vmem:[%s3110_s1 + $0x48] sm:$0xff]  ;;  %v1962_v30 = vld [vmem:[%s3110_s1 + $0x140] sm:$0xff]  ;;  %275 = vst [vmem:[#allocation1] ss:$4 sm:$0xff] %v195_v28  ;;  %v1974_v32 = vld [vmem:[%s3110_s1 + $0xb0] sm:$0xff] }
  0x21   :  { %130 = vmatpush.msra.mxu0 %v41_v0  ;;  %190 = vmatpush.msra.mxu3 %v44_v2  ;;  %v1967_v31 = vld [vmem:[%s3110_s1 + $0x1c8] sm:$0xff]  ;;  %v1979_v33 = vld [vmem:[%s3110_s1 + $0x40] sm:$0xff]  ;;  %v1984_v34 = vld [vmem:[%s3110_s1 + $0x138] sm:$0xff] }
  0x22   :  { %310 = vmatpush.msrb.mxu1 %v1782_v61  ;;  %330 = vmatpush.msrb.mxu2 %v1790_v63  ;;  %3166 = vst [vmem:[#allocation8_spill] sm:$0xff] %v1984_v34  ;;  %v1991_v35 = vld [vmem:[%s3110_s1 + $0x1c0] sm:$0xff]  ;;  %v196_v36 = vld [vmem:[%s3109_s0 + $0x8] sm:$0x3]  ;;  %v2006_v38 = vld [vmem:[%s3110_s1 + $0x38] sm:$0xff] }
  0x23   :  { %290 = vmatpush.msrb.mxu0 %v1807_v3  ;;  %350 = vmatpush.msrb.mxu3 %v1823_v6  ;;  %3167 = vst [vmem:[#allocation9_spill] sm:$0xff] %v1991_v35  ;;  %v2001_v37 = vld [vmem:[%s3110_s1 + $0xa8] sm:$0xff]  ;;  %v2013_v39 = vld [vmem:[%s3110_s1 + $0x130] sm:$0xff]  ;;  %v2018_v40 = vld [vmem:[%s3110_s1 + $0x1b8] sm:$0xff] }
  0x24   :  { %311 = vmatpush.msrb.mxu1 %v1798_v1  ;;  %331 = vmatpush.msrb.mxu2 %v1812_v4  ;;  %277 = vst [vmem:[#allocation1 + $0x20] ss:$4 sm:$0xff] %v196_v36 }
  0x25   :  { %291 = vmatpush.msrb.mxu0 %v1829_v7  ;;  %351 = vmatpush.msrb.mxu3 %v1846_v10  ;;  %3168 = vst [vmem:[#allocation10_spill] sm:$0xff] %v2013_v39 }
  0x26   :  { %312 = vmatpush.msrb.mxu1 %v1818_v5  ;;  %332 = vmatpush.msrb.mxu2 %v1834_v8  ;;  %3169 = vst [vmem:[#allocation11_spill] sm:$0xff] %v2018_v40 }
  0x27   :  { %292 = vmatpush.msrb.mxu0 %v1853_v11  ;;  %352 = vmatpush.msrb.mxu3 %v1870_v14 }
  0x28   :  { %313 = vmatpush.msrb.mxu1 %v1841_v9  ;;  %333 = vmatpush.msrb.mxu2 %v1858_v12 }
  0x29   :  { %293 = vmatpush.msrb.mxu0 %v1877_v15  ;;  %353 = vmatpush.msrb.mxu3 %v1894_v18 }
  0x2a   :  { %314 = vmatpush.msrb.mxu1 %v1865_v13  ;;  %334 = vmatpush.msrb.mxu2 %v1882_v16 }
  0x2b   :  { %294 = vmatpush.msrb.mxu0 %v1901_v19  ;;  %354 = vmatpush.msrb.mxu3 %v1918_v22 }
  0x2c   :  { %315 = vmatpush.msrb.mxu1 %v1889_v17  ;;  %335 = vmatpush.msrb.mxu2 %v1906_v20 }
  0x2d   :  { %295 = vmatpush.msrb.mxu0 %v1930_v24  ;;  %355 = vmatpush.msrb.mxu3 %v1942_v26 }
  0x2e   :  { %316 = vmatpush.msrb.mxu1 %v1913_v21  ;;  %336 = vmatpush.msrb.mxu2 %v1935_v25 }
  0x2f   :  { %296 = vmatpush.msrb.mxu0 %v1957_v29  ;;  %356 = vmatpush.msrb.mxu3 %v1967_v31 }
  0x30   :  { %317 = vmatpush.msrb.mxu1 %v1925_v23  ;;  %337 = vmatpush.msrb.mxu2 %v1962_v30 }
  0x32   :  { %318 = vmatpush.msrb.mxu1 %v1947_v27 }
  0x33   :  { %19 = vsyncpa [#allocation5], 0  ;;  %297 = vmatpush.msrb.mxu0 %v1979_v33  ;;  %338 = vmatpush.msrb.mxu2 %v1984_v34  ;;  %v2025_v41 = vld [vmem:[%s3110_s1 + $0xa0] sm:$0xff]  ;;  %v2030_v42 = vld [vmem:[%s3110_s1 + $0x30] sm:$0xff]  ;;  %vm287_vm0 = vcmask 523264   ;;  %s1341_s20 = sshll.u32 %s3119_s10, 4  ;;  %s1342_s20 = int_to_ptr.hbm [resolvable:$true] %s1341_s20 }
  0x34   :  { %v2035_v43 = vld [vmem:[%s3110_s1 + $0x128] sm:$0xff]  ;;  %v2040_v44 = vld [vmem:[%s3110_s1 + $0x1b0] sm:$0xff]  ;;  %319 = vmatpush.msrb.mxu1 %v1974_v32  ;;  %357 = vmatpush.msrb.mxu3 %v1991_v35  ;;  %v2052_v46 = vld [vmem:[%s3110_s1 + $0x120] sm:$0xff]  ;;  %s1530_s21 = smov [#allocation4]   ;;  %s1352_s24 = sshll.u32 %s3120_s11, 4  ;;  %s1353_s24 = int_to_ptr.hbm [resolvable:$true] %s1352_s24 }
  0x35   :  { %3170 = vst [vmem:[#allocation12_spill] sm:$0xff] %v2035_v43  ;;  %v2047_v45 = vld [vmem:[%s3110_s1 + $0x28] sm:$0xff]  ;;  %v1376_v48 = vld [vmem:[%s3109_s0 + $0x12] sm:$0x3]  ;;  %298 = vmatpush.msrb.mxu0 %v2006_v38  ;;  %339 = vmatpush.msrb.mxu2 %v2013_v39  ;;  %v2075_v53 = vld [vmem:[%s3110_s1 + $0x98] sm:$0xff]  ;;  %s1350_s22 = sshll.u32 %s1530_s21, 4  ;;  %s1351_s22 = int_to_ptr.vmem [resolvable:$true] %s1350_s22 }
  0x36   :  { %3171 = vst [vmem:[#allocation13_spill] sm:$0xff] %v2040_v44  ;;  %v1375_v47 = vld [vmem:[%s3109_s0 + $0xa] sm:$0xff]  ;;  %v2062_v50 = vld.sshfl [vmem:[#allocation1] sm:$0xff pattern:$0x73625140]  ;;  %320 = vmatpush.msrb.mxu1 %v2001_v37  ;;  %358 = vmatpush.msrb.mxu3 %v2018_v40  ;;  %v2104_v59 = vld [vmem:[%s3110_s1 + $0x118] sm:$0xff] }
  0x37   :  { %3172 = vst [vmem:[#allocation14_spill] sm:$0xff] %v2052_v46  ;;  %v280_v49 = vld.sshfl [vmem:[#allocation1 + $0x10] sm:$0xff pattern:$0x73625140]  ;;  %299 = vmatpush.msrb.mxu0 %v2030_v42  ;;  %340 = vmatpush.msrb.mxu2 %v2035_v43  ;;  %v2080_v54 = vld [vmem:[%s3110_s1 + $0x1a8] sm:$0xff]  ;;  %v2090_v56 = vld [vmem:[%s3110_s1 + $0x20] sm:$0xff] }
  0x38   :  { %v2066_v51 = vld.sshfl [vmem:[#allocation1 + $0x18] sm:$0xff pattern:$0x73625140]  ;;  %v2068_v52 = vld.sshfl [vmem:[#allocation1 + $0x8] sm:$0xff pattern:$0x73625140]  ;;  %321 = vmatpush.msrb.mxu1 %v2025_v41  ;;  %359 = vmatpush.msrb.mxu3 %v2040_v44 }
  0x39   :  { %3173 = vst [vmem:[#allocation15_spill] sm:$0xff] %v2075_v53  ;;  %v40_v55 = vld [vmem:[%s3112_s3] sm:$0x3]  ;;  %300 = vmatpush.msrb.mxu0 %v2047_v45  ;;  %341 = vmatpush.msrb.mxu2 %v2052_v46  ;;  %v2099_v58 = vld [vmem:[%s3110_s1 + $0x90] sm:$0xff]  ;;  %v2117_v62 = vld [vmem:[%s3110_s1 + $0x88] sm:$0xff] }
  0x3a   :  { %3174 = vst [vmem:[#allocation16_spill] sm:$0xff] %v2080_v54  ;;  %v2092_v57 = vld.sshfl [vmem:[#allocation1 + $0x20] sm:$0xff pattern:$0x73625140]  ;;  %322 = vmatpush.msrb.mxu1 %v2075_v53  ;;  %360 = vmatpush.msrb.mxu3 %v2080_v54  ;;  %v2124_v0 = vld [vmem:[%s3110_s1 + $0x18] sm:$0xff]  ;;  %v2129_v2 = vld [vmem:[%s3110_s1 + $0x110] sm:$0xff] }
  0x3b   :  { %515 = vst [vmem:[#allocation1] ss:$4 sm:$0xff] %v1375_v47  ;;  %v2111_v60 = vld [vmem:[%s3110_s1 + $0x1a0] sm:$0xff]  ;;  %171 = vmatmul.f32.vlgmr.msra.gmra.mxu2 %v40_v55  ;;  %301 = vmatpush.msrb.mxu0 %v2090_v56  ;;  %v2135_v28 = vld [vmem:[%s3110_s1 + $0x198] sm:$0xff]  ;;  %v2146_v47 = vld [vmem:[%s3110_s1 + $0x10] sm:$0xff] }
  0x3c   :  { %3175 = vst [vmem:[#allocation17_spill] sm:$0xff] %v2099_v58  ;;  %323 = vmatpush.msrb.mxu1 %v2099_v58  ;;  %342 = vmatpush.msrb.mxu2 %v2104_v59  ;;  %v2141_v36 = vld [vmem:[%s3110_s1 + $0x80] sm:$0xff]  ;;  %v2164_v54 = vld [vmem:[%s3110_s1 + $0x238] sm:$0xff]  ;;  %v2169_v44 = vld [vmem:[%s3110_s1 + $0x8] sm:$0xff] }
  0x3d   :  { %3176 = vst [vmem:[#allocation18_spill] sm:$0xff] %v2104_v59  ;;  %361 = vmatpush.msrb.mxu3 %v2111_v60  ;;  %131 = vmatmul.f32.vlgmr.msra.gmra.mxu0 %v40_v55  ;;  %v2195_v40 = vld [vmem:[%s3110_s1] sm:$0xff] }
  0x3e   :  { %517 = vst [vmem:[#allocation1 + $0x20] ss:$4 sm:$0xff] %v1376_v48  ;;  %191 = vmatmul.f32.vlgmr.msra.gmra.mxu3 %v40_v55  ;;  %324 = vmatpush.msrb.mxu1 %v2117_v62  ;;  %v2153_v48 = vld [vmem:[%s3110_s1 + $0x108] sm:$0xff] }
  0x3f   :  { %3177 = vst [vmem:[#allocation19_spill] sm:$0xff] %v2111_v60  ;;  %302 = vmatpush.msrb.mxu0 %v2124_v0  ;;  %343 = vmatpush.msrb.mxu2 %v2129_v2  ;;  %v2158_v60 = vld [vmem:[%s3110_s1 + $0x190] sm:$0xff] }
  0x40   :  { %3178 = vst [vmem:[#allocation20_spill] sm:$0xff] %v2117_v62  ;;  %362 = vmatpush.msrb.mxu3 %v2135_v28  ;;  %151 = vmatmul.f32.vlgmr.msra.gmra.mxu1 %v40_v55  ;;  %v2181_v55 = vld [vmem:[%s3110_s1 + $0x188] sm:$0xff] }
  0x41   :  { %3179 = vst [vmem:[#allocation21_spill] sm:$0xff] %v2129_v2  ;;  %325 = vmatpush.msrb.mxu1 %v2141_v36  ;;  %303 = vmatpush.msrb.mxu0 %v2146_v47  ;;  %v2176_v2 = vld [vmem:[%s3110_s1 + $0x100] sm:$0xff] }
  0x42   :  { %3180 = vst [vmem:[#allocation22_spill] sm:$0xff] %v2135_v28  ;;  %344 = vmatpush.msrb.mxu2 %v2153_v48  ;;  %363 = vmatpush.msrb.mxu3 %v2158_v60  ;;  %v2188_v28 = vld [vmem:[%s3110_s1 + $0x230] sm:$0xff] }
  0x43   :  { %3181 = vst [vmem:[#allocation23_spill] sm:$0xff] %v2141_v36  ;;  %378 = vmatpush.msra.mxu1 %v2164_v54  ;;  %304 = vmatpush.msrb.mxu0 %v2169_v44 }
  0x44   :  { %3182 = vst [vmem:[#allocation24_spill] sm:$0xff] %v2153_v48  ;;  %v2200_v48 = vld [vmem:[%s3110_s1 + $0x180] sm:$0xff]  ;;  %345 = vmatpush.msrb.mxu2 %v2176_v2  ;;  %364 = vmatpush.msrb.mxu3 %v2181_v55 }
  0x45   :  { %3183 = vst [vmem:[#allocation25_spill] sm:$0xff] %v2158_v60  ;;  %379 = vmatpush.msra.mxu1 %v2188_v28  ;;  %346 = vmatmul.f32.vlgmr.msrb.gmra.mxu2 %v280_v49  ;;  %v2215_v60 = vld [vmem:[%s3110_s1 + $0x220] sm:$0xff]  ;;  %v421_v49 = vld [vmem:[%s3114_s5 + $0xf0] sm:$0xff] }
  0x46   :  { %3184 = vst [vmem:[#allocation26_spill] sm:$0xff] %v2164_v54  ;;  %v2207_v54 = vld [vmem:[%s3110_s1 + $0x228] sm:$0xff]  ;;  %305 = vmatpush.msrb.mxu0 %v2195_v40  ;;  %365 = vmatpush.msrb.mxu3 %v2200_v48 }
  0x47   :  { %3185 = vst [vmem:[#allocation27_spill] sm:$0xff] %v2176_v2  ;;  %380 = vmatpush.msra.mxu1 %v2207_v54  ;;  %306 = vmatmul.f32.vlgmr.msrb.gmra.mxu0 %v2062_v50  ;;  %v416_v50 = vld [vmem:[%s3114_s5 + $0xc8] sm:$0xff] }
  0x48   :  { %3186 = vst [vmem:[#allocation28_spill] sm:$0xff] %v2181_v55  ;;  %v420_v55 = vld [vmem:[%s3114_s5 + $0xe8] sm:$0xff]  ;;  %366 = vmatmul.f32.vlgmr.msrb.gmra.mxu3 %v2066_v51  ;;  %326 = vmatmul.f32.vlgmr.msrb.gmra.mxu1 %v2068_v52  ;;  %v418_v51 = vld [vmem:[%s3114_s5 + $0xd8] sm:$0xff]  ;;  %v2248_v52 = vld [vmem:[%s3110_s1 + $0x210] sm:$0xff] }
  0x49   :  { %3187 = vst [vmem:[#allocation29_spill] sm:$0xff] %v2188_v28  ;;  %v422_v28 = vld [vmem:[%s3114_s5 + $0xf8] sm:$0xff]  ;;  %381 = vmatpush.msra.mxu1 %v2215_v60  ;;  %454 = vmatpush.msra.mxu2 %v420_v55  ;;  %v412_v2 = vld [vmem:[%s3114_s5 + $0xa8] sm:$0xff]  ;;  %v413_v55 = vld [vmem:[%s3114_s5 + $0xb0] sm:$0xff] }
  0x4a   :  { %3188 = vst [vmem:[#allocation30_spill] sm:$0xff] %v2200_v48  ;;  %v2233_v48 = vld [vmem:[%s3110_s1 + $0x218] sm:$0xff]  ;;  %474 = vmatpush.msra.mxu3 %v421_v49  ;;  %494 = vmatpush.msra.mxu0 %v422_v28  ;;  %v2263_v49 = vld [vmem:[%s3110_s1 + $0x208] sm:$0xff] }
  0x4b   :  { %3189 = vst [vmem:[#allocation31_spill] sm:$0xff] %v2207_v54  ;;  %v417_v54 = vld [vmem:[%s3114_s5 + $0xd0] sm:$0xff]  ;;  %382 = vmatpush.msra.mxu1 %v2233_v48  ;;  %455 = vmatpush.msra.mxu2 %v416_v50  ;;  %v408_v28 = vld [vmem:[%s3114_s5 + $0x88] sm:$0xff] }
  0x4c   :  { %3190 = vst [vmem:[#allocation32_spill] sm:$0xff] %v2215_v60  ;;  %v414_v60 = vld [vmem:[%s3114_s5 + $0xb8] sm:$0xff]  ;;  %475 = vmatpush.msra.mxu3 %v417_v54  ;;  %495 = vmatpush.msra.mxu0 %v418_v51  ;;  %v409_v50 = vld [vmem:[%s3114_s5 + $0x90] sm:$0xff]  ;;  %v404_v54 = vld [vmem:[%s3114_s5 + $0x68] sm:$0xff] }
  0x4d   :  { %3191 = vst [vmem:[#allocation33_spill] sm:$0xff] %v2233_v48  ;;  %383 = vmatpush.msra.mxu1 %v2248_v52  ;;  %456 = vmatpush.msra.mxu2 %v412_v2  ;;  %v2275_v48 = vld [vmem:[%s3110_s1 + $0x200] sm:$0xff]  ;;  %v405_v2 = vld [vmem:[%s3114_s5 + $0x70] sm:$0xff] }
  0x4e   :  { %3192 = vst [vmem:[#allocation34_spill] sm:$0xff] %v2275_v48  ;;  %476 = vmatpush.msra.mxu3 %v413_v55  ;;  %496 = vmatpush.msra.mxu0 %v414_v60  ;;  %v419_v51 = vld [vmem:[%s3114_s5 + $0xe0] sm:$0xff]  ;;  %v400_v55 = vld [vmem:[%s3114_s5 + $0x48] sm:$0xff]  ;;  %v401_v60 = vld [vmem:[%s3114_s5 + $0x50] sm:$0xff] }
  0x4f   :  { %384 = vmatpush.msra.mxu1 %v2263_v49  ;;  %457 = vmatpush.msra.mxu2 %v408_v28  ;;  %v415_v28 = vld [vmem:[%s3114_s5 + $0xc0] sm:$0xff] }
  0x50   :  { %477 = vmatpush.msra.mxu3 %v409_v50  ;;  %v396_v50 = vld [vmem:[%s3114_s5 + $0x28] sm:$0xff] }
  0x51   :  { %385 = vmatpush.msra.mxu1 %v2275_v48  ;;  %458 = vmatpush.msra.mxu2 %v404_v54  ;;  %v397_v54 = vld [vmem:[%s3114_s5 + $0x30] sm:$0xff]  ;;  %v411_v48 = vld [vmem:[%s3114_s5 + $0xa0] sm:$0xff] }
  0x52   :  { %1370 = vmatmul.msk.f32.vlgmr.msra.gmra.mxu1 %vm287_vm0, %v2092_v57  ;;  %478 = vmatpush.msra.mxu3 %v405_v2  ;;  %v392_v57 = vld [vmem:[%s3114_s5 + $0x8] sm:$0xff]  ;;  %v407_v2 = vld [vmem:[%s3114_s5 + $0x80] sm:$0xff] }
  0x53   :  { %434 = vmatpush.msrb.mxu1 %v419_v51  ;;  %459 = vmatpush.msra.mxu2 %v400_v55  ;;  %v403_v51 = vld [vmem:[%s3114_s5 + $0x60] sm:$0xff] }
  0x54   :  { %479 = vmatpush.msra.mxu3 %v401_v60  ;;  %v399_v55 = vld [vmem:[%s3114_s5 + $0x40] sm:$0xff] }
  0x55   :  { %435 = vmatpush.msrb.mxu1 %v415_v28  ;;  %460 = vmatpush.msra.mxu2 %v396_v50  ;;  %v395_v60 = vld [vmem:[%s3114_s5 + $0x20] sm:$0xff]  ;;  %v393_v28 = vld [vmem:[%s3114_s5 + $0x10] sm:$0xff]  ;;  %v410_v50 = vld [vmem:[%s3114_s5 + $0x98] sm:$0xff] }
  0x56   :  { %480 = vmatpush.msra.mxu3 %v397_v54  ;;  %497 = vmatpush.msra.mxu0 %v410_v50  ;;  %v406_v54 = vld [vmem:[%s3114_s5 + $0x78] sm:$0xff] }
  0x57   :  { %436 = vmatpush.msrb.mxu1 %v411_v48  ;;  %461 = vmatpush.msra.mxu2 %v392_v57  ;;  %v391_v48 = vld [vmem:[%s3114_s5] sm:$0xff]  ;;  %v402_v57 = vld [vmem:[%s3114_s5 + $0x58] sm:$0xff] }
  0x58   :  { %481 = vmatpush.msra.mxu3 %v393_v28  ;;  %498 = vmatpush.msra.mxu0 %v406_v54  ;;  %v3196_v28 = vld [vmem:[#allocation24_spill] sm:$0xff] }
  0x59   :  { %549 = vmatpush.msrb.mxu2 %v1782_v61  ;;  %437 = vmatpush.msrb.mxu1 %v407_v2  ;;  %v398_v2 = vld [vmem:[%s3114_s5 + $0x38] sm:$0xff]  ;;  %v3198_v54 = vld [vmem:[#allocation16_spill] sm:$0xff] }
  0x5a   :  { %569 = vmatpush.msrb.mxu3 %v1790_v63  ;;  %499 = vmatpush.msra.mxu0 %v402_v57  ;;  %v3199_v57 = vld [vmem:[#allocation27_spill] sm:$0xff] }
  0x5b   :  { %550 = vmatpush.msrb.mxu2 %v1798_v1  ;;  %438 = vmatpush.msrb.mxu1 %v403_v51  ;;  %v394_v51 = vld [vmem:[%s3114_s5 + $0x18] sm:$0xff] }
  0x5c   :  { %570 = vmatpush.msrb.mxu3 %v1812_v4  ;;  %500 = vmatpush.msra.mxu0 %v398_v2 }
  0x5d   :  { %551 = vmatpush.msrb.mxu2 %v1818_v5  ;;  %439 = vmatpush.msrb.mxu1 %v399_v55  ;;  %v3193_v55 = vld [vmem:[#allocation11_spill] sm:$0xff] }
  0x5e   :  { %571 = vmatpush.msrb.mxu3 %v1834_v8  ;;  %501 = vmatpush.msra.mxu0 %v394_v51  ;;  %v3201_v51 = vld [vmem:[#allocation19_spill] sm:$0xff] }
  0x5f   :  { %552 = vmatpush.msrb.mxu2 %v1841_v9  ;;  %440 = vmatpush.msrb.mxu1 %v395_v60  ;;  %v3194_v60 = vld [vmem:[#allocation21_spill] sm:$0xff] }
  0x60   :  { %572 = vmatpush.msrb.mxu3 %v1858_v12  ;;  %589 = vmatpush.msrb.mxu0 %v1823_v6 }
  0x61   :  { %553 = vmatpush.msrb.mxu2 %v1865_v13  ;;  %441 = vmatpush.msrb.mxu1 %v391_v48  ;;  %v3195_v48 = vld [vmem:[#allocation13_spill] sm:$0xff] }
  0x62   :  { %573 = vmatpush.msrb.mxu3 %v1882_v16  ;;  %590 = vmatpush.msrb.mxu0 %v1846_v10 }
  0x63   :  { %529 = vmatpush.msra.mxu1 %v1807_v3  ;;  %554 = vmatpush.msrb.mxu2 %v1889_v17 }
  0x64   :  { %574 = vmatpush.msrb.mxu3 %v1906_v20  ;;  %591 = vmatpush.msrb.mxu0 %v1870_v14 }
  0x65   :  { %530 = vmatpush.msra.mxu1 %v1829_v7  ;;  %555 = vmatpush.msrb.mxu2 %v1913_v21 }
  0x66   :  { %575 = vmatpush.msrb.mxu3 %v1935_v25  ;;  %592 = vmatpush.msrb.mxu0 %v1894_v18 }
  0x67   :  { %531 = vmatpush.msra.mxu1 %v1853_v11  ;;  %556 = vmatpush.msrb.mxu2 %v1925_v23 }
  0x68   :  { %576 = vmatpush.msrb.mxu3 %v1962_v30  ;;  %593 = vmatpush.msrb.mxu0 %v1918_v22 }
  0x69   :  { %532 = vmatpush.msra.mxu1 %v1877_v15  ;;  %557 = vmatpush.msrb.mxu2 %v1947_v27 }
  0x6a   :  { %577 = vmatpush.msrb.mxu3 %v1984_v34  ;;  %594 = vmatpush.msrb.mxu0 %v1942_v26 }
  0x6b   :  { %533 = vmatpush.msra.mxu1 %v1901_v19  ;;  %558 = vmatpush.msrb.mxu2 %v1974_v32 }
  0x6c   :  { %578 = vmatpush.msrb.mxu3 %v2013_v39  ;;  %595 = vmatpush.msrb.mxu0 %v1967_v31  ;;  %v522_v39 = vld.sshfl [vmem:[#allocation1 + $0x20] sm:$0xff pattern:$0x73625140] }
  0x6d   :  { %534 = vmatpush.msra.mxu1 %v1930_v24  ;;  %559 = vmatpush.msrb.mxu2 %v2001_v37 }
  0x6e   :  { %579 = vmatpush.msrb.mxu3 %v2035_v43  ;;  %596 = vmatpush.msrb.mxu0 %v1991_v35  ;;  %v3205_v43 = vld [vmem:[#allocation25_spill] sm:$0xff] }
  0x6f   :  { %535 = vmatpush.msra.mxu1 %v1957_v29  ;;  %560 = vmatpush.msrb.mxu2 %v2025_v41 }
  0x70   :  { %580 = vmatpush.msrb.mxu3 %v2052_v46  ;;  %597 = vmatpush.msrb.mxu0 %v3193_v55  ;;  %v3207_v55 = vld [vmem:[#allocation30_spill] sm:$0xff] }
  0x71   :  { %536 = vmatpush.msra.mxu1 %v1979_v33  ;;  %561 = vmatpush.msrb.mxu2 %v2075_v53 }
  0x72   :  { %581 = vmatpush.msrb.mxu3 %v2104_v59  ;;  %598 = vmatpush.msrb.mxu0 %v3195_v48  ;;  %v3203_v59 = vld [vmem:[#allocation22_spill] sm:$0xff]  ;;  %v520_v48 = vld.sshfl [vmem:[#allocation1 + $0x10] sm:$0xff pattern:$0x73625140] }
  0x73   :  { %537 = vmatpush.msra.mxu1 %v2006_v38  ;;  %562 = vmatpush.msrb.mxu2 %v2099_v58 }
  0x74   :  { %582 = vmatpush.msrb.mxu3 %v3194_v60  ;;  %599 = vmatpush.msrb.mxu0 %v3198_v54  ;;  %v2414_v60 = vld [vmem:[%s3111_s2] ss:$0 sm:$0xff] }
  0x75   :  { %538 = vmatpush.msra.mxu1 %v2030_v42  ;;  %563 = vmatpush.msrb.mxu2 %v2117_v62  ;;  %v518_v54 = vld.sshfl [vmem:[#allocation1] sm:$0xff pattern:$0x73625140] }
  0x76   :  { %583 = vmatpush.msrb.mxu3 %v3196_v28  ;;  %600 = vmatpush.msrb.mxu0 %v3201_v51  ;;  %v519_v28 = vld.sshfl [vmem:[#allocation1 + $0x8] sm:$0xff pattern:$0x73625140]  ;;  %v1382_v51 = vld [vmem:[%s3109_s0 + $0x14] sm:$0xff] }
  0x77   :  { %539 = vmatpush.msra.mxu1 %v2047_v45  ;;  %564 = vmatpush.msrb.mxu2 %v2141_v36 }
  0x78   :  { %584 = vmatpush.msrb.mxu3 %v3199_v57  ;;  %601 = vmatpush.msrb.mxu0 %v3203_v59  ;;  %v521_v57 = vld.sshfl [vmem:[#allocation1 + $0x18] sm:$0xff pattern:$0x73625140] }
  0x79   :  { %540 = vmatpush.msra.mxu1 %v2090_v56  ;;  %754 = vst [vmem:[#allocation1] ss:$4 sm:$0xff] %v1382_v51 }
  0x7a   :  { %602 = vmatpush.msrb.mxu0 %v3205_v43 }
  0x7b   :  { %541 = vmatpush.msra.mxu1 %v2124_v0 }
  0x7d   :  { %542 = vmatpush.msra.mxu1 %v2146_v47 }
  0x7f   :  { %543 = vmatpush.msra.mxu1 %v2169_v44 }
  0x81   :  { %544 = vmatpush.msra.mxu1 %v2195_v40 }
  0xba   :  { %v2401_v50 = vpop.f32.mrf.mxu0 }
  0xbb   :  { %3197 = vst [vmem:[#allocation35_spill] sm:$0xff] %v2401_v50 }
  0xbd   :  { %v2405_v2 = vpop.f32.mrf.mxu1 }
  0xbe   :  { %3200 = vst [vmem:[#allocation36_spill] sm:$0xff] %v2405_v2  ;;  %v2408_v46 = vpop.f32.mrf.mxu2 }
  0xbf   :  { %3202 = vst [vmem:[#allocation37_spill] sm:$0xff] %v2408_v46  ;;  %v3206_v46 = vld [vmem:[#allocation28_spill] sm:$0xff] }
  0xc0   :  { %603 = vmatpush.msrb.mxu0 %v3206_v46 }
  0xc1   :  { %v2416_v36 = vpop.f32.mrf.mxu3 }
  0xc2   :  { %3204 = vst [vmem:[#allocation38_spill] sm:$0xff] %v2416_v36  ;;  %604 = vmatpush.msrb.mxu0 %v3207_v55  ;;  %v1383_v36 = vld [vmem:[%s3109_s0 + $0x1c] sm:$0x3] }
  0xc3   :  { %756 = vst [vmem:[#allocation1 + $0x20] ss:$4 sm:$0xff] %v1383_v36  ;;  %v659_v36 = vld [vmem:[%s3114_s5 + $0x1e8] sm:$0xff] }
  0xc4   :  { %v307_v59 = vpop.f32.mrf.mxu0 }
  0xc5   :  { %v308_v2 = vadd.f32 %v2414_v60, %v307_v59  ;;  %v327_v62 = vpop.f32.mrf.mxu1  ;;  %v658_v59 = vld [vmem:[%s3114_s5 + $0x1e0] sm:$0xff] }
  0xc7   :  { %v328_v43 = vadd.f32 %v327_v62, %v308_v2  ;;  %v3209_v62 = vld [vmem:[#allocation29_spill] sm:$0xff]  ;;  %v3210_v2 = vld [vmem:[#allocation31_spill] sm:$0xff] }
  0xc8   :  { %v347_v58 = vpop.f32.mrf.mxu2 }
  0xc9   :  { %v348_v50 = vadd.f32 %v347_v58, %v328_v43  ;;  %v660_v43 = vld [vmem:[%s3114_s5 + $0x1f0] sm:$0xff]  ;;  %v650_v58 = vld [vmem:[%s3114_s5 + $0x1a0] sm:$0xff] }
  0xcb   :  { %v367_v35 = vpop.f32.mrf.mxu3 }
  0xcc   :  { %v368_v34 = vadd.f32 %v367_v35, %v348_v50  ;;  %v3208_v35 = vld [vmem:[#allocation26_spill] sm:$0xff]  ;;  %v651_v50 = vld [vmem:[%s3114_s5 + $0x1a8] sm:$0xff] }
  0xcf   :  { %v387_v53 = vpop.f32.mrf.mxu1 }
  0xd0   :  { %v388_v46 = vadd.f32 %v387_v53, %v368_v34  ;;  %v654_v34 = vld [vmem:[%s3114_s5 + $0x1c0] sm:$0xff]  ;;  %v656_v53 = vld [vmem:[%s3114_s5 + $0x1d0] sm:$0xff] }
  0xd2   :  { %v390_v51 = vmax.f32 %v388_v46, 0.0  ;;  %v655_v46 = vld [vmem:[%s3114_s5 + $0x1c8] sm:$0xff] }
  0xd4   :  { %1371 = vmatmul.msk.f32.vlgmr.msrb.gmra.mxu1 %vm287_vm0, %v390_v51  ;;  %1372 = vmatmul.msk.f32.vlgmr.msra.gmra.mxu2 %vm287_vm0, %v390_v51 }
  0xd5   :  { %1373 = vmatmul.msk.f32.vlgmr.msra.gmra.mxu3 %vm287_vm0, %v390_v51  ;;  %1374 = vmatmul.msk.f32.vlgmr.msra.gmra.mxu0 %vm287_vm0, %v390_v51  ;;  %v3211_v51 = vld [vmem:[#allocation32_spill] sm:$0xff] }
  0xd6   :  { %617 = vmatpush.msrb.mxu1 %v3208_v35  ;;  %673 = vmatpush.msra.mxu2 %v658_v59  ;;  %v646_v59 = vld [vmem:[%s3114_s5 + $0x180] sm:$0xff] }
  0xd7   :  { %693 = vmatpush.msra.mxu3 %v659_v36  ;;  %713 = vmatpush.msra.mxu0 %v660_v43  ;;  %v647_v36 = vld [vmem:[%s3114_s5 + $0x188] sm:$0xff]  ;;  %v3212_v43 = vld [vmem:[#allocation33_spill] sm:$0xff] }
  0xd8   :  { %618 = vmatpush.msrb.mxu1 %v3209_v62  ;;  %674 = vmatpush.msra.mxu2 %v654_v34  ;;  %v642_v34 = vld [vmem:[%s3114_s5 + $0x160] sm:$0xff] }
  0xd9   :  { %694 = vmatpush.msra.mxu3 %v655_v46  ;;  %714 = vmatpush.msra.mxu0 %v656_v53  ;;  %v661_v46 = vld [vmem:[%s3114_s5 + $0x1f8] sm:$0xff] }
  0xda   :  { %619 = vmatpush.msrb.mxu1 %v3210_v2  ;;  %675 = vmatpush.msra.mxu2 %v650_v58  ;;  %v3213_v53 = vld [vmem:[#allocation34_spill] sm:$0xff] }
  0xdb   :  { %695 = vmatpush.msra.mxu3 %v651_v50  ;;  %v630_v58 = vld [vmem:[%s3114_s5 + $0x100] sm:$0xff]  ;;  %v644_v50 = vld [vmem:[%s3114_s5 + $0x170] sm:$0xff] }
  0xdc   :  { %565 = vmatmul.f32.vlgmr.msrb.gmra.mxu2 %v519_v28  ;;  %620 = vmatpush.msrb.mxu1 %v3211_v51  ;;  %v643_v28 = vld [vmem:[%s3114_s5 + $0x168] sm:$0xff] }
  0xdd   :  { %585 = vmatmul.f32.vlgmr.msrb.gmra.mxu3 %v520_v48  ;;  %545 = vmatmul.f32.vlgmr.msra.gmra.mxu1 %v518_v54  ;;  %v638_v48 = vld [vmem:[%s3114_s5 + $0x140] sm:$0xff]  ;;  %v639_v54 = vld [vmem:[%s3114_s5 + $0x148] sm:$0xff] }
  0xde   :  { %621 = vmatpush.msrb.mxu1 %v3212_v43  ;;  %605 = vmatmul.f32.vlgmr.msrb.gmra.mxu0 %v521_v57  ;;  %v634_v57 = vld [vmem:[%s3114_s5 + $0x120] sm:$0xff] }
  0xdf   :  { %676 = vmatpush.msra.mxu2 %v646_v59  ;;  %696 = vmatpush.msra.mxu3 %v647_v36  ;;  %v649_v59 = vld [vmem:[%s3114_s5 + $0x198] sm:$0xff]  ;;  %v640_v36 = vld [vmem:[%s3114_s5 + $0x150] sm:$0xff] }
  0xe0   :  { %622 = vmatpush.msrb.mxu1 %v2248_v52 }
  0xe1   :  { %677 = vmatpush.msra.mxu2 %v642_v34  ;;  %697 = vmatpush.msra.mxu3 %v643_v28  ;;  %v645_v34 = vld [vmem:[%s3114_s5 + $0x178] sm:$0xff]  ;;  %v636_v28 = vld [vmem:[%s3114_s5 + $0x130] sm:$0xff] }
  0xe2   :  { %623 = vmatpush.msrb.mxu1 %v2263_v49 }
  0xe3   :  { %678 = vmatpush.msra.mxu2 %v638_v48  ;;  %698 = vmatpush.msra.mxu3 %v639_v54  ;;  %v637_v48 = vld [vmem:[%s3114_s5 + $0x138] sm:$0xff] }
  0xe4   :  { %624 = vmatpush.msrb.mxu1 %v3213_v53  ;;  %v633_v54 = vld [vmem:[%s3114_s5 + $0x118] sm:$0xff] }
  0xe5   :  { %1377 = vmatmul.msk.f32.vlgmr.msrb.gmra.mxu1 %vm287_vm0, %v522_v39  ;;  %679 = vmatpush.msra.mxu2 %v634_v57  ;;  %v653_v39 = vld [vmem:[%s3114_s5 + $0x1b8] sm:$0xff]  ;;  %v3228_v57 = vld [vmem:[#allocation36_spill] sm:$0xff] }
  0xe6   :  { %733 = vmatpush.msra.mxu1 %v661_v46 }
  0xe7   :  { %680 = vmatpush.msra.mxu2 %v630_v58  ;;  %v3229_v58 = vld [vmem:[#allocation37_spill] sm:$0xff] }
  0xe9   :  { %768 = vmatpush.msrb.mxu2 %v1807_v3  ;;  %v635_v3 = vld [vmem:[%s3114_s5 + $0x128] sm:$0xff] }
  0xea   :  { %699 = vmatpush.msra.mxu3 %v635_v3 }
  0xeb   :  { %769 = vmatpush.msrb.mxu2 %v1829_v7  ;;  %v652_v7 = vld [vmem:[%s3114_s5 + $0x1b0] sm:$0xff] }
  0xec   :  { %715 = vmatpush.msra.mxu0 %v652_v7 }
  0xed   :  { %770 = vmatpush.msrb.mxu2 %v1853_v11  ;;  %v657_v11 = vld [vmem:[%s3114_s5 + $0x1d8] sm:$0xff] }
  0xee   :  { %734 = vmatpush.msra.mxu1 %v657_v11  ;;  %v3230_v11 = vld [vmem:[#allocation18_spill] sm:$0xff] }
  0xef   :  { %771 = vmatpush.msrb.mxu2 %v1877_v15  ;;  %v631_v15 = vld [vmem:[%s3114_s5 + $0x108] sm:$0xff] }
  0xf0   :  { %700 = vmatpush.msra.mxu3 %v631_v15  ;;  %735 = vmatpush.msra.mxu1 %v653_v39  ;;  %v3231_v15 = vld [vmem:[#allocation19_spill] sm:$0xff] }
  0xf1   :  { %772 = vmatpush.msrb.mxu2 %v1901_v19  ;;  %v648_v19 = vld [vmem:[%s3114_s5 + $0x190] sm:$0xff] }
  0xf2   :  { %716 = vmatpush.msra.mxu0 %v648_v19  ;;  %788 = vmatpush.msrb.mxu3 %v1782_v61  ;;  %v641_v61 = vld [vmem:[%s3114_s5 + $0x158] sm:$0xff] }
  0xf3   :  { %773 = vmatpush.msrb.mxu2 %v1930_v24  ;;  %736 = vmatpush.msra.mxu1 %v649_v59  ;;  %v3232_v59 = vld [vmem:[#allocation21_spill] sm:$0xff] }
  0xf4   :  { %717 = vmatpush.msra.mxu0 %v644_v50  ;;  %789 = vmatpush.msrb.mxu3 %v1798_v1  ;;  %v632_v1 = vld [vmem:[%s3114_s5 + $0x110] sm:$0xff] }
  0xf5   :  { %774 = vmatpush.msrb.mxu2 %v1957_v29  ;;  %737 = vmatpush.msra.mxu1 %v645_v34 }
  0xf6   :  { %718 = vmatpush.msra.mxu0 %v640_v36  ;;  %790 = vmatpush.msrb.mxu3 %v1818_v5  ;;  %v3233_v36 = vld [vmem:[#allocation22_spill] sm:$0xff] }
  0xf7   :  { %775 = vmatpush.msrb.mxu2 %v1979_v33  ;;  %738 = vmatpush.msra.mxu1 %v641_v61  ;;  %v3235_v61 = vld [vmem:[#allocation25_spill] sm:$0xff] }
  0xf8   :  { %719 = vmatpush.msra.mxu0 %v636_v28  ;;  %791 = vmatpush.msrb.mxu3 %v1841_v9  ;;  %v3216_v9 = vld [vmem:[#allocation9_spill] sm:$0xff]  ;;  %v3234_v28 = vld [vmem:[#allocation24_spill] sm:$0xff] }
  0xf9   :  { %776 = vmatpush.msrb.mxu2 %v2006_v38  ;;  %739 = vmatpush.msra.mxu1 %v637_v48  ;;  %v1390_v48 = vld [vmem:[%s3109_s0 + $0x26] sm:$0x3] }
  0xfa   :  { %720 = vmatpush.msra.mxu0 %v632_v1  ;;  %792 = vmatpush.msrb.mxu3 %v1865_v13  ;;  %v3218_v13 = vld [vmem:[#allocation17_spill] sm:$0xff]  ;;  %v761_v1 = vld.sshfl [vmem:[#allocation1 + $0x20] sm:$0xff pattern:$0x73625140] }
  0xfb   :  { %777 = vmatpush.msrb.mxu2 %v2030_v42  ;;  %740 = vmatpush.msra.mxu1 %v633_v54  ;;  %995 = vst [vmem:[#allocation1 + $0x20] ss:$4 sm:$0xff] %v1390_v48  ;;  %v1426_v48 = vld [vmem:[%s3110_s1 + $0x1f0] sm:$0xff] }
  0xfc   :  { %808 = vmatpush.msrb.mxu0 %v1790_v63  ;;  %793 = vmatpush.msrb.mxu3 %v1889_v17  ;;  %v105_v63 = vld [vmem:[%s3116_s7] sm:$0xf] }
  0xfd   :  { %778 = vmatpush.msrb.mxu2 %v2047_v45  ;;  %828 = vmatpush.msrb.mxu1 %v1823_v6  ;;  %v110_v5 = vperm.slane %v105_v63, 3  ;;  %v3214_v6 = vld [vmem:[#allocation15_spill] sm:$0xff] }
  0xfe   :  { %809 = vmatpush.msrb.mxu0 %v1812_v4  ;;  %794 = vmatpush.msrb.mxu3 %v1913_v21  ;;  %v107_v4 = vperm.slane %v105_v63, 0  ;;  %v108_v21 = vperm.slane %v105_v63, 1 }
  0xff   :  { %779 = vmatpush.msrb.mxu2 %v2090_v56  ;;  %829 = vmatpush.msrb.mxu1 %v1846_v10  ;;  %v3217_v10 = vld [vmem:[#allocation35_spill] sm:$0xff] }
 0x100   :  { %810 = vmatpush.msrb.mxu0 %v1834_v8  ;;  %795 = vmatpush.msrb.mxu3 %v1925_v23  ;;  %v3215_v8 = vld [vmem:[#allocation8_spill] sm:$0xff]  ;;  %v153_v46 = vadd.f32 %v3228_v57, %v108_v21  ;;  %v893_v21 = vld [vmem:[%s3114_s5 + $0x2c0] sm:$0xff]  ;;  %v1419_v57 = vld [vmem:[%s3110_s1 + $0x78] sm:$0xff] }
 0x101   :  { %780 = vmatpush.msrb.mxu2 %v2124_v0  ;;  %830 = vmatpush.msrb.mxu1 %v1870_v14  ;;  %v3219_v14 = vld [vmem:[#allocation38_spill] sm:$0xff] }
 0x102   :  { %811 = vmatpush.msrb.mxu0 %v1858_v12  ;;  %796 = vmatpush.msrb.mxu3 %v1947_v27  ;;  %v133_v12 = vadd.f32 %v3217_v10, %v107_v4  ;;  %v3237_v4 = vld [vmem:[#allocation28_spill] sm:$0xff] }
 0x103   :  { %781 = vmatpush.msrb.mxu2 %v2146_v47  ;;  %831 = vmatpush.msrb.mxu1 %v1894_v18  ;;  %v3220_v18 = vld [vmem:[#allocation10_spill] sm:$0xff] }
 0x104   :  { %812 = vmatpush.msrb.mxu0 %v1882_v16  ;;  %797 = vmatpush.msrb.mxu3 %v1974_v32  ;;  %v193_v16 = vadd.f32 %v3219_v14, %v110_v5  ;;  %v3225_v32 = vld [vmem:[#allocation23_spill] sm:$0xff] }
 0x105   :  { %782 = vmatpush.msrb.mxu2 %v2169_v44  ;;  %832 = vmatpush.msrb.mxu1 %v1918_v22 }
 0x106   :  { %813 = vmatpush.msrb.mxu0 %v1906_v20  ;;  %798 = vmatpush.msrb.mxu3 %v2001_v37  ;;  %v3221_v20 = vld [vmem:[#allocation11_spill] sm:$0xff]  ;;  %v3226_v37 = vld [vmem:[#allocation14_spill] sm:$0xff] }
 0x107   :  { %783 = vmatpush.msrb.mxu2 %v2195_v40  ;;  %833 = vmatpush.msrb.mxu1 %v1942_v26  ;;  %v109_v26 = vperm.slane %v105_v63, 2  ;;  %v3236_v63 = vld [vmem:[#allocation27_spill] sm:$0xff] }
 0x108   :  { %814 = vmatpush.msrb.mxu0 %v1935_v25  ;;  %799 = vmatpush.msrb.mxu3 %v2025_v41  ;;  %v3222_v25 = vld [vmem:[#allocation20_spill] sm:$0xff] }
 0x109   :  { %834 = vmatpush.msrb.mxu1 %v1967_v31  ;;  %v3224_v31 = vld [vmem:[#allocation13_spill] sm:$0xff]  ;;  %v3227_v41 = vld [vmem:[#allocation16_spill] sm:$0xff]  ;;  %v173_v3 = vadd.f32 %v3229_v58, %v109_v26 }
 0x10a   :  { %815 = vmatpush.msrb.mxu0 %v1962_v30  ;;  %800 = vmatpush.msrb.mxu3 %v3214_v6  ;;  %v3223_v30 = vld [vmem:[#allocation12_spill] sm:$0xff] }
 0x10b   :  { %835 = vmatpush.msrb.mxu1 %v3216_v9  ;;  %v758_v26 = vld.sshfl [vmem:[#allocation1 + $0x8] sm:$0xff pattern:$0x73625140] }
 0x10c   :  { %816 = vmatpush.msrb.mxu0 %v3215_v8  ;;  %801 = vmatpush.msrb.mxu3 %v3218_v13  ;;  %v1421_v58 = vld [vmem:[%s3110_s1 + $0x68] sm:$0xff] }
 0x10d   :  { %836 = vmatpush.msrb.mxu1 %v3221_v20  ;;  %v899_v20 = vld [vmem:[%s3114_s5 + $0x2f0] sm:$0xff] }
 0x10e   :  { %817 = vmatpush.msrb.mxu0 %v3220_v18  ;;  %802 = vmatpush.msrb.mxu3 %v3222_v25  ;;  %v898_v18 = vld [vmem:[%s3114_s5 + $0x2e8] sm:$0xff]  ;;  %v889_v25 = vld [vmem:[%s3114_s5 + $0x2a0] sm:$0xff] }
 0x10f   :  { %837 = vmatpush.msrb.mxu1 %v3224_v31  ;;  %v760_v31 = vld.sshfl [vmem:[#allocation1 + $0x18] sm:$0xff pattern:$0x73625140] }
 0x110   :  { %818 = vmatpush.msrb.mxu0 %v3223_v30  ;;  %803 = vmatpush.msrb.mxu3 %v3225_v32  ;;  %v757_v30 = vld.sshfl [vmem:[#allocation1] sm:$0xff pattern:$0x73625140] }
 0x111   :  { %838 = vmatpush.msrb.mxu1 %v3227_v41  ;;  %v885_v32 = vld [vmem:[%s3114_s5 + $0x280] sm:$0xff]  ;;  %v892_v41 = vld [vmem:[%s3114_s5 + $0x2b8] sm:$0xff] }
 0x112   :  { %819 = vmatpush.msrb.mxu0 %v3226_v37  ;;  %v896_v37 = vld [vmem:[%s3114_s5 + $0x2d8] sm:$0xff] }
 0x113   :  { %839 = vmatpush.msrb.mxu1 %v3231_v15  ;;  %v874_v15 = vld [vmem:[%s3114_s5 + $0x228] sm:$0xff] }
 0x114   :  { %820 = vmatpush.msrb.mxu0 %v3230_v11  ;;  %v876_v11 = vld [vmem:[%s3114_s5 + $0x238] sm:$0xff] }
 0x115   :  { %840 = vmatpush.msrb.mxu1 %v3233_v36  ;;  %v870_v36 = vld [vmem:[%s3114_s5 + $0x208] sm:$0xff] }
 0x116   :  { %821 = vmatpush.msrb.mxu0 %v3232_v59  ;;  %v872_v59 = vld [vmem:[%s3114_s5 + $0x218] sm:$0xff] }
 0x117   :  { %841 = vmatpush.msrb.mxu1 %v3235_v61  ;;  %v871_v61 = vld [vmem:[%s3114_s5 + $0x210] sm:$0xff] }
 0x118   :  { %822 = vmatpush.msrb.mxu0 %v3234_v28  ;;  %v1424_v28 = vld [vmem:[%s3110_s1 + $0x1f8] sm:$0xff] }
 0x119   :  { %842 = vmatpush.msrb.mxu1 %v3237_v4  ;;  %v1429_v4 = vld [vmem:[%s3110_s1 + $0x1e8] sm:$0xff] }
 0x11a   :  { %823 = vmatpush.msrb.mxu0 %v3236_v63  ;;  %v1428_v63 = vld [vmem:[%s3110_s1 + $0x178] sm:$0xff] }
 0x11b   :  { %843 = vmatpush.msrb.mxu1 %v3207_v55 }
 0x151   :  { %v443_v17 = vpop.f32.mrf.mxu1 }
 0x152   :  { %v2591_v22 = vadd.f32 %v443_v17, %v133_v12  ;;  %v503_v23 = vpop.f32.mrf.mxu0  ;;  %v897_v17 = vld [vmem:[%s3114_s5 + $0x2e0] sm:$0xff] }
 0x153   :  { %v2594_v27 = vadd.f32 %v503_v23, %v193_v16  ;;  %v894_v23 = vld [vmem:[%s3114_s5 + $0x2c8] sm:$0xff] }
 0x157   :  { %v463_v7 = vpop.f32.mrf.mxu2 }
 0x158   :  { %v2605_v19 = vadd.f32 %v463_v7, %v153_v46  ;;  %v483_v39 = vpop.f32.mrf.mxu3  ;;  %v1420_v46 = vld [vmem:[%s3110_s1 + $0x70] sm:$0xff]  ;;  %v1423_v7 = vld [vmem:[%s3110_s1 + $0x58] sm:$0xff] }
 0x159   :  { %v2607_v50 = vadd.f32 %v483_v39, %v173_v3  ;;  %v1422_v3 = vld [vmem:[%s3110_s1 + $0x60] sm:$0xff]  ;;  %v879_v39 = vld [vmem:[%s3114_s5 + $0x250] sm:$0xff] }
 0x15a   :  { %v546_v34 = vpop.f32.mrf.mxu1 }
 0x15b   :  { %v547_v54 = vadd.f32 %v2414_v60, %v546_v34  ;;  %v606_v9 = vpop.f32.mrf.mxu0  ;;  %v875_v34 = vld [vmem:[%s3114_s5 + $0x230] sm:$0xff] }
 0x15f   :  { %v566_v5 = vpop.f32.mrf.mxu2 }
 0x160   :  { %v567_v6 = vadd.f32 %v566_v5, %v547_v54  ;;  %v586_v8 = vpop.f32.mrf.mxu3  ;;  %v1427_v54 = vld [vmem:[%s3110_s1 + $0xf0] sm:$0xff]  ;;  %v1430_v5 = vld [vmem:[%s3110_s1 + $0xe8] sm:$0xff] }
 0x162   :  { %v587_v10 = vadd.f32 %v586_v8, %v567_v6  ;;  %v626_v12 = vpop.f32.mrf.mxu1  ;;  %v1431_v6 = vld [vmem:[%s3110_s1 + $0x170] sm:$0xff]  ;;  %v1432_v8 = vld [vmem:[%s3110_s1 + $0x1e0] sm:$0xff] }
 0x164   :  { %v607_v13 = vadd.f32 %v606_v9, %v587_v10  ;;  %v1433_v9 = vld [vmem:[%s3110_s1 + $0xe0] sm:$0xff]  ;;  %v1434_v10 = vld [vmem:[%s3110_s1 + $0x168] sm:$0xff] }
 0x166   :  { %v627_v14 = vadd.f32 %v626_v12, %v607_v13  ;;  %v1435_v12 = vld [vmem:[%s3110_s1 + $0x1d8] sm:$0xff] }
 0x167   :  { %v1436_v13 = vld [vmem:[%s3110_s1 + $0xd8] sm:$0xff] }
 0x168   :  { %v629_v16 = vmax.f32 %v627_v14, 0.0  ;;  %v1437_v14 = vld [vmem:[%s3110_s1 + $0x160] sm:$0xff] }
 0x16a   :  { %1378 = vmatmul.msk.f32.vlgmr.msra.gmra.mxu2 %vm287_vm0, %v629_v16  ;;  %1379 = vmatmul.msk.f32.vlgmr.msra.gmra.mxu3 %vm287_vm0, %v629_v16 }
 0x16b   :  { %1380 = vmatmul.msk.f32.vlgmr.msra.gmra.mxu0 %vm287_vm0, %v629_v16  ;;  %1381 = vmatmul.msk.f32.vlgmr.msra.gmra.mxu1 %vm287_vm0, %v629_v16  ;;  %v1438_v16 = vld [vmem:[%s3110_s1 + $0x1d0] sm:$0xff] }
 0x16c   :  { %856 = vmatpush.msra.mxu2 %v3208_v35  ;;  %912 = vmatpush.msra.mxu3 %v897_v17  ;;  %v759_v35 = vld.sshfl [vmem:[#allocation1 + $0x10] sm:$0xff pattern:$0x73625140] }
 0x16d   :  { %932 = vmatpush.msra.mxu0 %v898_v18  ;;  %952 = vmatpush.msra.mxu1 %v899_v20  ;;  %v1439_v17 = vld [vmem:[%s3110_s1 + $0xd0] sm:$0xff]  ;;  %v1440_v18 = vld [vmem:[%s3110_s1 + $0x158] sm:$0xff]  ;;  %v1441_v20 = vld [vmem:[%s3110_s1 + $0x1c8] sm:$0xff] }
 0x16e   :  { %857 = vmatpush.msra.mxu2 %v3209_v62  ;;  %913 = vmatpush.msra.mxu3 %v893_v21  ;;  %v881_v62 = vld [vmem:[%s3114_s5 + $0x260] sm:$0xff]  ;;  %v1442_v21 = vld [vmem:[%s3110_s1 + $0xc8] sm:$0xff] }
 0x16f   :  { %933 = vmatpush.msra.mxu0 %v894_v23  ;;  %v1443_v23 = vld [vmem:[%s3110_s1 + $0x150] sm:$0xff] }
 0x170   :  { %858 = vmatpush.msra.mxu2 %v3210_v2  ;;  %914 = vmatpush.msra.mxu3 %v889_v25  ;;  %v877_v2 = vld [vmem:[%s3114_s5 + $0x240] sm:$0xff] }
 0x171   :  { %v1444_v25 = vld [vmem:[%s3110_s1 + $0x1c0] sm:$0xff] }
 0x172   :  { %859 = vmatpush.msra.mxu2 %v3211_v51  ;;  %804 = vmatmul.f32.vlgmr.msrb.gmra.mxu3 %v758_v26  ;;  %v873_v51 = vld [vmem:[%s3114_s5 + $0x220] sm:$0xff] }
 0x173   :  { %784 = vmatmul.f32.vlgmr.msrb.gmra.mxu2 %v757_v30  ;;  %824 = vmatmul.f32.vlgmr.msrb.gmra.mxu0 %v759_v35  ;;  %v1445_v26 = vld [vmem:[%s3110_s1 + $0xc0] sm:$0xff]  ;;  %v1446_v30 = vld [vmem:[%s3110_s1 + $0x148] sm:$0xff]  ;;  %v1447_v35 = vld [vmem:[%s3110_s1 + $0x1b8] sm:$0xff] }
 0x174   :  { %860 = vmatpush.msra.mxu2 %v3212_v43  ;;  %844 = vmatmul.f32.vlgmr.msrb.gmra.mxu1 %v760_v31  ;;  %v900_v43 = vld [vmem:[%s3114_s5 + $0x2f8] sm:$0xff] }
 0x175   :  { %915 = vmatpush.msra.mxu3 %v885_v32  ;;  %v1389_v31 = vld [vmem:[%s3109_s0 + $0x1e] sm:$0xff] }
 0x176   :  { %861 = vmatpush.msra.mxu2 %v2248_v52  ;;  %v869_v52 = vld [vmem:[%s3114_s5 + $0x200] sm:$0xff]  ;;  %v1448_v32 = vld [vmem:[%s3110_s1 + $0xb8] sm:$0xff]  ;;  %993 = vst [vmem:[#allocation1] ss:$4 sm:$0xff] %v1389_v31  ;;  %v1129_v31 = vld [vmem:[%s3114_s5 + $0x3a8] sm:$0xff] }
 0x177   :  { %916 = vmatpush.msra.mxu3 %v881_v62  ;;  %v1449_v62 = vld [vmem:[%s3110_s1 + $0x140] sm:$0xff] }
 0x178   :  { %862 = vmatpush.msra.mxu2 %v2263_v49 }
 0x179   :  { %917 = vmatpush.msra.mxu3 %v877_v2  ;;  %v1450_v2 = vld [vmem:[%s3110_s1 + $0x1b0] sm:$0xff] }
 0x17a   :  { %863 = vmatpush.msra.mxu2 %v3213_v53 }
 0x17b   :  { %1384 = vmatmul.msk.f32.vlgmr.msra.gmra.mxu2 %vm287_vm0, %v761_v1  ;;  %918 = vmatpush.msra.mxu3 %v873_v51  ;;  %v1425_v1 = vld [vmem:[%s3110_s1 + $0xf8] sm:$0xff]  ;;  %v1451_v51 = vld [vmem:[%s3110_s1 + $0xb0] sm:$0xff] }
 0x17c   :  { %972 = vmatpush.msrb.mxu2 %v900_v43  ;;  %v1452_v43 = vld [vmem:[%s3110_s1 + $0x138] sm:$0xff] }
 0x17d   :  { %919 = vmatpush.msra.mxu3 %v869_v52  ;;  %v1453_v52 = vld [vmem:[%s3110_s1 + $0x1a8] sm:$0xff] }
 0x17e   :  { %973 = vmatpush.msrb.mxu2 %v896_v37 }
 0x17f   :  { %1007 = vmatpush.msrb.mxu3 %v1419_v57  ;;  %v1454_v57 = vld [vmem:[%s3110_s1 + $0xa8] sm:$0xff] }
 0x180   :  { %974 = vmatpush.msrb.mxu2 %v892_v41 }
 0x181   :  { %1008 = vmatpush.msrb.mxu3 %v1420_v46 }
 0x183   :  { %1009 = vmatpush.msrb.mxu3 %v1421_v58 }
 0x185   :  { %1010 = vmatpush.msrb.mxu3 %v1422_v3  ;;  %v1455_v3 = vld [vmem:[%s3110_s1 + $0x130] sm:$0xff] }
 0x187   :  { %1011 = vmatpush.msrb.mxu3 %v1423_v7  ;;  %v1456_v7 = vld [vmem:[%s3110_s1 + $0x1a0] sm:$0xff] }
 0x189   :  { %1012 = vmatpush.msrb.mxu3 %v1930_v24  ;;  %v890_v24 = vld [vmem:[%s3114_s5 + $0x2a8] sm:$0xff] }
 0x18a   :  { %934 = vmatpush.msra.mxu0 %v890_v24  ;;  %v1457_v24 = vld [vmem:[%s3110_s1 + $0xa0] sm:$0xff] }
 0x18b   :  { %1013 = vmatpush.msrb.mxu3 %v1957_v29  ;;  %v895_v29 = vld [vmem:[%s3114_s5 + $0x2d0] sm:$0xff] }
 0x18c   :  { %953 = vmatpush.msra.mxu1 %v895_v29  ;;  %v1460_v29 = vld [vmem:[%s3110_s1 + $0x98] sm:$0xff] }
 0x18d   :  { %1014 = vmatpush.msrb.mxu3 %v1979_v33  ;;  %v888_v33 = vld [vmem:[%s3114_s5 + $0x298] sm:$0xff] }
 0x18e   :  { %975 = vmatpush.msrb.mxu2 %v888_v33 }
 0x18f   :  { %1015 = vmatpush.msrb.mxu3 %v2006_v38  ;;  %v886_v38 = vld [vmem:[%s3114_s5 + $0x288] sm:$0xff] }
 0x190   :  { %935 = vmatpush.msra.mxu0 %v886_v38 }
 0x191   :  { %1016 = vmatpush.msrb.mxu3 %v2030_v42  ;;  %v884_v42 = vld [vmem:[%s3114_s5 + $0x278] sm:$0xff] }
 0x192   :  { %976 = vmatpush.msrb.mxu2 %v884_v42  ;;  %v1462_v42 = vld [vmem:[%s3110_s1 + $0x190] sm:$0xff] }
 0x193   :  { %1017 = vmatpush.msrb.mxu3 %v2047_v45  ;;  %v887_v45 = vld [vmem:[%s3114_s5 + $0x290] sm:$0xff] }
 0x195   :  { %1018 = vmatpush.msrb.mxu3 %v2090_v56  ;;  %v880_v56 = vld [vmem:[%s3114_s5 + $0x258] sm:$0xff] }
 0x196   :  { %977 = vmatpush.msrb.mxu2 %v880_v56  ;;  %v1463_v56 = vld [vmem:[%s3110_s1 + $0x90] sm:$0xff] }
 0x197   :  { %1019 = vmatpush.msrb.mxu3 %v2124_v0  ;;  %v878_v0 = vld [vmem:[%s3114_s5 + $0x248] sm:$0xff] }
 0x198   :  { %978 = vmatpush.msrb.mxu2 %v876_v11  ;;  %v1468_v11 = vld [vmem:[%s3110_s1 + $0x80] sm:$0xff] }
 0x199   :  { %1020 = vmatpush.msrb.mxu3 %v2146_v47  ;;  %v883_v47 = vld [vmem:[%s3114_s5 + $0x270] sm:$0xff] }
 0x19a   :  { %979 = vmatpush.msrb.mxu2 %v872_v59 }
 0x19b   :  { %1021 = vmatpush.msrb.mxu3 %v2169_v44  ;;  %v882_v44 = vld [vmem:[%s3114_s5 + $0x268] sm:$0xff] }
 0x19c   :  { %936 = vmatpush.msra.mxu0 %v882_v44  ;;  %1067 = vmatpush.msra.mxu2 %v1424_v28 }
 0x19d   :  { %1022 = vmatpush.msrb.mxu3 %v2195_v40  ;;  %v891_v40 = vld [vmem:[%s3114_s5 + $0x2b0] sm:$0xff] }
 0x19e   :  { %954 = vmatpush.msra.mxu1 %v891_v40  ;;  %937 = vmatpush.msra.mxu0 %v878_v0  ;;  %v1461_v40 = vld [vmem:[%s3110_s1 + $0x120] sm:$0xff]  ;;  %v1464_v0 = vld [vmem:[%s3110_s1 + $0x118] sm:$0xff] }
 0x19f   :  { %1068 = vmatpush.msra.mxu2 %v1426_v48 }
 0x1a0   :  { %955 = vmatpush.msra.mxu1 %v887_v45  ;;  %938 = vmatpush.msra.mxu0 %v874_v15  ;;  %v1469_v15 = vld [vmem:[%s3110_s1 + $0x108] sm:$0xff] }
 0x1a1   :  { %1069 = vmatpush.msra.mxu2 %v1429_v4 }
 0x1a2   :  { %956 = vmatpush.msra.mxu1 %v883_v47  ;;  %939 = vmatpush.msra.mxu0 %v870_v36  ;;  %v1465_v47 = vld [vmem:[%s3110_s1 + $0x188] sm:$0xff] }
 0x1a3   :  { %1070 = vmatpush.msra.mxu2 %v1432_v8  ;;  %v997_v8 = vld.sshfl [vmem:[#allocation1 + $0x8] sm:$0xff pattern:$0x73625140] }
 0x1a4   :  { %957 = vmatpush.msra.mxu1 %v879_v39  ;;  %1027 = vmatpush.msrb.mxu0 %v1425_v1  ;;  %v1470_v39 = vld [vmem:[%s3110_s1 + $0x100] sm:$0xff] }
 0x1a5   :  { %1071 = vmatpush.msra.mxu2 %v1435_v12  ;;  %v999_v12 = vld.sshfl [vmem:[#allocation1 + $0x18] sm:$0xff pattern:$0x73625140] }
 0x1a6   :  { %958 = vmatpush.msra.mxu1 %v875_v34  ;;  %1028 = vmatpush.msrb.mxu0 %v1427_v54 }
 0x1a7   :  { %1072 = vmatpush.msra.mxu2 %v1438_v16  ;;  %v1475_v16 = vld [vmem:[%s3110_s1 + $0x218] sm:$0xff] }
 0x1a8   :  { %959 = vmatpush.msra.mxu1 %v871_v61  ;;  %1029 = vmatpush.msrb.mxu0 %v1430_v5  ;;  %v1471_v5 = vld [vmem:[%s3110_s1 + $0x238] sm:$0xff] }
 0x1a9   :  { %1073 = vmatpush.msra.mxu2 %v1441_v20  ;;  %v1136_v20 = vld [vmem:[%s3114_s5 + $0x3e0] sm:$0xff] }
 0x1aa   :  { %1047 = vmatpush.msrb.mxu1 %v1428_v63  ;;  %1030 = vmatpush.msrb.mxu0 %v1433_v9  ;;  %v1473_v9 = vld [vmem:[%s3110_s1 + $0x228] sm:$0xff] }
 0x1ab   :  { %1074 = vmatpush.msra.mxu2 %v1444_v25  ;;  %v1133_v25 = vld [vmem:[%s3114_s5 + $0x3c8] sm:$0xff] }
 0x1ac   :  { %1048 = vmatpush.msrb.mxu1 %v1431_v6  ;;  %1031 = vmatpush.msrb.mxu0 %v1436_v13  ;;  %v1472_v6 = vld [vmem:[%s3110_s1 + $0x230] sm:$0xff] }
 0x1ad   :  { %1075 = vmatpush.msra.mxu2 %v1447_v35  ;;  %v998_v13 = vld.sshfl [vmem:[#allocation1 + $0x10] sm:$0xff pattern:$0x73625140]  ;;  %v1128_v35 = vld [vmem:[%s3114_s5 + $0x3a0] sm:$0xff] }
 0x1ae   :  { %1049 = vmatpush.msrb.mxu1 %v1434_v10  ;;  %1032 = vmatpush.msrb.mxu0 %v1439_v17  ;;  %v996_v10 = vld.sshfl [vmem:[#allocation1] sm:$0xff pattern:$0x73625140]  ;;  %v1476_v17 = vld [vmem:[%s3110_s1 + $0x210] sm:$0xff] }
 0x1af   :  { %1076 = vmatpush.msra.mxu2 %v1450_v2  ;;  %v1124_v2 = vld [vmem:[%s3114_s5 + $0x380] sm:$0xff] }
 0x1b0   :  { %1050 = vmatpush.msrb.mxu1 %v1437_v14  ;;  %1033 = vmatpush.msrb.mxu0 %v1442_v21  ;;  %v1474_v14 = vld [vmem:[%s3110_s1 + $0x220] sm:$0xff]  ;;  %v1137_v21 = vld [vmem:[%s3114_s5 + $0x3e8] sm:$0xff] }
 0x1b1   :  { %1077 = vmatpush.msra.mxu2 %v1453_v52  ;;  %v1127_v52 = vld [vmem:[%s3114_s5 + $0x398] sm:$0xff] }
 0x1b2   :  { %1051 = vmatpush.msrb.mxu1 %v1440_v18  ;;  %1034 = vmatpush.msrb.mxu0 %v1445_v26  ;;  %v1000_v18 = vld.sshfl [vmem:[#allocation1 + $0x20] sm:$0xff pattern:$0x73625140]  ;;  %v1134_v26 = vld [vmem:[%s3114_s5 + $0x3d0] sm:$0xff] }
 0x1b3   :  { %1078 = vmatpush.msra.mxu2 %v1456_v7  ;;  %v1116_v7 = vld [vmem:[%s3114_s5 + $0x340] sm:$0xff] }
 0x1b4   :  { %1052 = vmatpush.msrb.mxu1 %v1443_v23  ;;  %1035 = vmatpush.msrb.mxu0 %v1448_v32  ;;  %v1138_v23 = vld [vmem:[%s3114_s5 + $0x3f0] sm:$0xff] }
 0x1b5   :  { %v1130_v32 = vld [vmem:[%s3114_s5 + $0x3b0] sm:$0xff] }
 0x1b6   :  { %1053 = vmatpush.msrb.mxu1 %v1446_v30  ;;  %1036 = vmatpush.msrb.mxu0 %v1451_v51  ;;  %v1135_v30 = vld [vmem:[%s3114_s5 + $0x3d8] sm:$0xff]  ;;  %v1125_v51 = vld [vmem:[%s3114_s5 + $0x388] sm:$0xff] }
 0x1b8   :  { %1054 = vmatpush.msrb.mxu1 %v1449_v62  ;;  %1037 = vmatpush.msrb.mxu0 %v1454_v57  ;;  %v1131_v62 = vld [vmem:[%s3114_s5 + $0x3b8] sm:$0xff]  ;;  %v1122_v57 = vld [vmem:[%s3114_s5 + $0x370] sm:$0xff] }
 0x1ba   :  { %1055 = vmatpush.msrb.mxu1 %v1452_v43  ;;  %1038 = vmatpush.msrb.mxu0 %v1457_v24  ;;  %v1126_v43 = vld [vmem:[%s3114_s5 + $0x390] sm:$0xff]  ;;  %v1117_v24 = vld [vmem:[%s3114_s5 + $0x348] sm:$0xff] }
 0x1bc   :  { %1056 = vmatpush.msrb.mxu1 %v1455_v3  ;;  %1039 = vmatpush.msrb.mxu0 %v1460_v29  ;;  %v1123_v3 = vld [vmem:[%s3114_s5 + $0x378] sm:$0xff]  ;;  %v1112_v29 = vld [vmem:[%s3114_s5 + $0x320] sm:$0xff] }
 0x1be   :  { %1040 = vmatpush.msrb.mxu0 %v1463_v56  ;;  %v1109_v56 = vld [vmem:[%s3114_s5 + $0x308] sm:$0xff] }
 0x1e8   :  { %v722_v37 = vpop.f32.mrf.mxu0  ;;  %v742_v41 = vpop.f32.mrf.mxu1 }
 0x1e9   :  { %v2852_v46 = vadd.f32 %v722_v37, %v2607_v50  ;;  %v2855_v58 = vadd.f32 %v742_v41, %v2594_v27  ;;  %v1458_v27 = vld [vmem:[%s3110_s1 + $0x128] sm:$0xff]  ;;  %v1459_v50 = vld [vmem:[%s3110_s1 + $0x198] sm:$0xff]  ;;  %v1120_v37 = vld [vmem:[%s3114_s5 + $0x360] sm:$0xff] }
 0x1ea   :  { %1057 = vmatpush.msrb.mxu1 %v1458_v27  ;;  %1079 = vmatpush.msra.mxu2 %v1459_v50  ;;  %v1121_v41 = vld [vmem:[%s3114_s5 + $0x368] sm:$0xff]  ;;  %v1118_v27 = vld [vmem:[%s3114_s5 + $0x350] sm:$0xff]  ;;  %v1119_v50 = vld [vmem:[%s3114_s5 + $0x358] sm:$0xff] }
 0x1ec   :  { %1058 = vmatpush.msrb.mxu1 %v1461_v40  ;;  %1080 = vmatpush.msra.mxu2 %v1462_v42  ;;  %v1115_v40 = vld [vmem:[%s3114_s5 + $0x338] sm:$0xff]  ;;  %v1108_v42 = vld [vmem:[%s3114_s5 + $0x300] sm:$0xff] }
 0x1ed   :  { %v682_v33 = vpop.f32.mrf.mxu2  ;;  %v702_v38 = vpop.f32.mrf.mxu3 }
 0x1ee   :  { %v2882_v44 = vadd.f32 %v682_v33, %v2591_v22  ;;  %v2885_v45 = vadd.f32 %v702_v38, %v2605_v19  ;;  %1059 = vmatpush.msrb.mxu1 %v1464_v0  ;;  %1081 = vmatpush.msra.mxu2 %v1465_v47  ;;  %v1466_v22 = vld [vmem:[%s3110_s1 + $0x88] sm:$0xff]  ;;  %v1467_v19 = vld [vmem:[%s3110_s1 + $0x110] sm:$0xff]  ;;  %v1111_v47 = vld [vmem:[%s3114_s5 + $0x318] sm:$0xff] }
 0x1ef   :  { %1041 = vmatpush.msrb.mxu0 %v1466_v22  ;;  %v1113_v33 = vld [vmem:[%s3114_s5 + $0x328] sm:$0xff]  ;;  %v1114_v38 = vld [vmem:[%s3114_s5 + $0x330] sm:$0xff] }
 0x1f0   :  { %1060 = vmatpush.msrb.mxu1 %v1467_v19  ;;  %1082 = vmatpush.msra.mxu2 %v3207_v55  ;;  %v825_v55 = vpop.f32.mrf.mxu0  ;;  %v1110_v0 = vld [vmem:[%s3114_s5 + $0x310] sm:$0xff] }
 0x1f1   :  { %1042 = vmatpush.msrb.mxu0 %v1468_v11  ;;  %v845_v61 = vpop.f32.mrf.mxu1 }
 0x1f2   :  { %1061 = vmatpush.msrb.mxu1 %v1469_v15 }
 0x1f4   :  { %1062 = vmatpush.msrb.mxu1 %v1470_v39 }
 0x1f5   :  { %v805_v36 = vpop.f32.mrf.mxu3 }
 0x1f6   :  { %v785_v59 = vpop.f32.mrf.mxu2 }
 0x1f7   :  { %v786_v34 = vadd.f32 %v2414_v60, %v785_v59 }
 0x1f9   :  { %v806_v28 = vadd.f32 %v805_v36, %v786_v34 }
 0x1fb   :  { %v826_v1 = vadd.f32 %v825_v55, %v806_v28 }
 0x1fd   :  { %v846_v48 = vadd.f32 %v845_v61, %v826_v1 }
 0x1fe   :  { %v865_v54 = vpop.f32.mrf.mxu2 }
 0x1ff   :  { %v866_v63 = vadd.f32 %v865_v54, %v846_v48 }
 0x201   :  { %v868_v4 = vmax.f32 %v866_v63, 0.0 }
 0x203   :  { %1385 = vmatmul.msk.f32.vlgmr.msra.gmra.mxu3 %vm287_vm0, %v868_v4  ;;  %1386 = vmatmul.msk.f32.vlgmr.msra.gmra.mxu0 %vm287_vm0, %v868_v4 }
 0x204   :  { %1387 = vmatmul.msk.f32.vlgmr.msra.gmra.mxu1 %vm287_vm0, %v868_v4  ;;  %1388 = vmatmul.msk.f32.vlgmr.msrb.gmra.mxu2 %vm287_vm0, %v868_v4 }
 0x205   :  { %1095 = vmatpush.msra.mxu3 %v1471_v5  ;;  %1151 = vmatpush.msra.mxu0 %v1136_v20 }
 0x206   :  { %1171 = vmatpush.msra.mxu1 %v1137_v21  ;;  %1191 = vmatpush.msrb.mxu2 %v1138_v23  ;;  %v1298_v21 = vld [vmem:[%s3117_s8 + $0x28] sm:$0xff] }
 0x207   :  { %1096 = vmatpush.msra.mxu3 %v1472_v6 }
 0x208   :  { %1172 = vmatpush.msra.mxu1 %v1133_v25  ;;  %1192 = vmatpush.msrb.mxu2 %v1134_v26  ;;  %v1296_v25 = vld [vmem:[%s3117_s8 + $0x18] sm:$0xff]  ;;  %v1295_v26 = vld [vmem:[%s3117_s8 + $0x10] sm:$0xff] }
 0x209   :  { %1097 = vmatpush.msra.mxu3 %v1473_v9  ;;  %v1303_v9 = vld [vmem:[%s3117_s8 + $0x50] sm:$0xff] }
 0x20a   :  { %1173 = vmatpush.msra.mxu1 %v1129_v31  ;;  %1193 = vmatpush.msrb.mxu2 %v1130_v32  ;;  %v1293_v32 = vld [vmem:[%s3117_s8] sm:$0xff] }
 0x20b   :  { %1098 = vmatpush.msra.mxu3 %v1474_v14  ;;  %1043 = vmatmul.f32.vlgmr.msrb.gmra.mxu0 %v997_v8  ;;  %v1304_v8 = vld [vmem:[%s3117_s8 + $0x58] sm:$0xff]  ;;  %v1299_v14 = vld [vmem:[%s3117_s8 + $0x30] sm:$0xff] }
 0x20c   :  { %1023 = vmatmul.f32.vlgmr.msrb.gmra.mxu3 %v996_v10  ;;  %1083 = vmatmul.f32.vlgmr.msra.gmra.mxu2 %v999_v12  ;;  %v1302_v10 = vld [vmem:[%s3117_s8 + $0x48] sm:$0xff]  ;;  %v1301_v12 = vld [vmem:[%s3117_s8 + $0x40] sm:$0xff] }
 0x20d   :  { %1099 = vmatpush.msra.mxu3 %v1475_v16  ;;  %1063 = vmatmul.f32.vlgmr.msrb.gmra.mxu1 %v998_v13  ;;  %v1300_v13 = vld [vmem:[%s3117_s8 + $0x38] sm:$0xff] }
 0x20e   :  { %1174 = vmatpush.msra.mxu1 %v1125_v51  ;;  %1194 = vmatpush.msrb.mxu2 %v1126_v43 }
 0x20f   :  { %1100 = vmatpush.msra.mxu3 %v1476_v17 }
 0x210   :  { %1175 = vmatpush.msra.mxu1 %v1121_v41  ;;  %1195 = vmatpush.msrb.mxu2 %v1122_v57 }
 0x211   :  { %1101 = vmatpush.msra.mxu3 %v2263_v49  ;;  %v1139_v49 = vld [vmem:[%s3114_s5 + $0x3f8] sm:$0xff] }
 0x212   :  { %1176 = vmatpush.msra.mxu1 %v1117_v24  ;;  %1196 = vmatpush.msrb.mxu2 %v1118_v27 }
 0x213   :  { %1102 = vmatpush.msra.mxu3 %v3213_v53  ;;  %v1132_v53 = vld [vmem:[%s3114_s5 + $0x3c0] sm:$0xff] }
 0x214   :  { %1391 = vmatmul.msk.f32.vlgmr.msra.gmra.mxu3 %vm287_vm0, %v1000_v18  ;;  %1152 = vmatpush.msra.mxu0 %v1132_v53  ;;  %v1297_v53 = vld [vmem:[%s3117_s8 + $0x20] sm:$0xff] }
 0x215   :  { %1211 = vmatpush.msrb.mxu3 %v1139_v49  ;;  %1177 = vmatpush.msra.mxu1 %v1113_v33 }
 0x216   :  { %1153 = vmatpush.msra.mxu0 %v1128_v35  ;;  %1197 = vmatpush.msrb.mxu2 %v1114_v38  ;;  %v1294_v35 = vld [vmem:[%s3117_s8 + $0x8] sm:$0xff] }
 0x217   :  { %1212 = vmatpush.msrb.mxu3 %v1135_v30  ;;  %1178 = vmatpush.msra.mxu1 %v1109_v56 }
 0x218   :  { %1154 = vmatpush.msra.mxu0 %v1124_v2  ;;  %1198 = vmatpush.msrb.mxu2 %v1110_v0 }
 0x219   :  { %1213 = vmatpush.msrb.mxu3 %v1131_v62 }
 0x21a   :  { %1155 = vmatpush.msra.mxu0 %v1120_v37 }
 0x21b   :  { %1214 = vmatpush.msrb.mxu3 %v1127_v52 }
 0x21c   :  { %1156 = vmatpush.msra.mxu0 %v1116_v7 }
 0x21d   :  { %1215 = vmatpush.msrb.mxu3 %v1123_v3 }
 0x21e   :  { %1157 = vmatpush.msra.mxu0 %v1112_v29 }
 0x21f   :  { %1216 = vmatpush.msrb.mxu3 %v1119_v50 }
 0x220   :  { %1158 = vmatpush.msra.mxu0 %v1108_v42 }
 0x221   :  { %1217 = vmatpush.msrb.mxu3 %v1115_v40 }
 0x223   :  { %1218 = vmatpush.msrb.mxu3 %v1111_v47 }
 0x280   :  { %v941_v22 = vpop.f32.mrf.mxu0 }
 0x281   :  { %v985_v19 = vadd.f32 %v941_v22, %v2885_v45  ;;  %v961_v11 = vpop.f32.mrf.mxu1 }
 0x282   :  { %v3036_v15 = vadd.f32 %v961_v11, %v2852_v46  ;;  %v1307_v46 = vld [vmem:[%s3117_s8 + $0x70] sm:$0xff] }
 0x286   :  { %v921_v39 = vpop.f32.mrf.mxu3 }
 0x287   :  { %v984_v59 = vadd.f32 %v921_v39, %v2882_v44  ;;  %v981_v36 = vpop.f32.mrf.mxu2  ;;  %v1305_v44 = vld [vmem:[%s3117_s8 + $0x60] sm:$0xff] }
 0x288   :  { %v987_v34 = vadd.f32 %v981_v36, %v2855_v58  ;;  %v1044_v28 = vpop.f32.mrf.mxu0  ;;  %v1306_v58 = vld [vmem:[%s3117_s8 + $0x68] sm:$0xff] }
 0x28a   :  { %v1064_v1 = vpop.f32.mrf.mxu1 }
 0x28f   :  { %v1024_v55 = vpop.f32.mrf.mxu3  ;;  %v1084_v54 = vpop.f32.mrf.mxu2 }
 0x290   :  { %v1025_v61 = vadd.f32 %v2414_v60, %v1024_v55  ;;  %v1308_v60 = vld [vmem:[%s3117_s8 + $0x78] sm:$0xff] }
 0x291   :  { %1313 = vmatpush.msrb.mxu0 %v1308_v60 }
 0x292   :  { %v1045_v48 = vadd.f32 %v1044_v28, %v1025_v61 }
 0x293   :  { %1314 = vmatpush.msrb.mxu0 %v1307_v46 }
 0x294   :  { %v1065_v63 = vadd.f32 %v1064_v1, %v1045_v48 }
 0x295   :  { %1315 = vmatpush.msrb.mxu0 %v1306_v58 }
 0x296   :  { %v1085_v4 = vadd.f32 %v1084_v54, %v1065_v63 }
 0x297   :  { %v1104_v45 = vpop.f32.mrf.mxu3  ;;  %1316 = vmatpush.msrb.mxu0 %v1305_v44 }
 0x298   :  { %v1105_v5 = vadd.f32 %v1104_v45, %v1085_v4 }
 0x299   :  { %1317 = vmatpush.msrb.mxu0 %v1304_v8 }
 0x29a   :  { %v1107_v6 = vmax.f32 %v1105_v5, 0.0 }
 0x29b   :  { %1318 = vmatpush.msrb.mxu0 %v1303_v9 }
 0x29c   :  { %1392 = vmatmul.msk.f32.vlgmr.msra.gmra.mxu0 %vm287_vm0, %v1107_v6  ;;  %1393 = vmatmul.msk.f32.vlgmr.msra.gmra.mxu1 %vm287_vm0, %v1107_v6 }
 0x29d   :  { %1394 = vmatmul.msk.f32.vlgmr.msrb.gmra.mxu2 %vm287_vm0, %v1107_v6  ;;  %1395 = vmatmul.msk.f32.vlgmr.msrb.gmra.mxu3 %vm287_vm0, %v1107_v6 }
 0x29e   :  { %1319 = vmatpush.msrb.mxu0 %v1302_v10  ;;  %v1402_v10 = vld [vmem:[%s3118_s9] ss:$0 sm:$0xff] }
 0x2a0   :  { %1320 = vmatpush.msrb.mxu0 %v1301_v12 }
 0x2a2   :  { %1321 = vmatpush.msrb.mxu0 %v1300_v13 }
 0x2a4   :  { %1322 = vmatpush.msrb.mxu0 %v1299_v14 }
 0x2a6   :  { %1323 = vmatpush.msrb.mxu0 %v1298_v21 }
 0x2a8   :  { %1324 = vmatpush.msrb.mxu0 %v1297_v53 }
 0x2aa   :  { %1325 = vmatpush.msrb.mxu0 %v1296_v25 }
 0x2ac   :  { %1326 = vmatpush.msrb.mxu0 %v1295_v26 }
 0x2ae   :  { %1327 = vmatpush.msrb.mxu0 %v1294_v35 }
 0x2b0   :  { %1328 = vmatpush.msrb.mxu0 %v1293_v32 }
 0x319   :  { %v1160_v16 = vpop.f32.mrf.mxu0  ;;  %v1180_v17 = vpop.f32.mrf.mxu1 }
 0x31a   :  { %v1223_v18 = vadd.f32 %v1160_v16, %v984_v59  ;;  %v1224_v20 = vadd.f32 %v1180_v17, %v985_v19 }
 0x31c   :  { %v1396_v23 = vmul.f32 -1.442695, %v1223_v18  ;;  %v1397_v49 = vmul.f32 -1.442695, %v1224_v20 }
 0x31e   :  { %1403 = vpow2.f32 %v1396_v23 }
 0x31f   :  { %1405 = vpow2.f32 %v1397_v49 }
 0x320   :  { %v1220_v30 = vpop.f32.mrf.mxu3  ;;  %v1200_v37 = vpop.f32.mrf.mxu2 }
 0x321   :  { %v1226_v31 = vadd.f32 %v1220_v30, %v987_v34  ;;  %v1225_v7 = vadd.f32 %v1200_v37, %v3036_v15  ;;  %v1285_v34 = vld [vmem:[%s3113_s4] sm:$0x3]  ;;  %s1529_s4 = smov [#allocation2]  }
 0x322   :  { %s1339_s18 = sshll.u32 %s1529_s4, 4  ;;  %s1340_s18 = int_to_ptr.vmem [resolvable:$true] %s1339_s18 }
 0x323   :  { %v1398_v62 = vmul.f32 -1.442695, %v1226_v31 }
 0x324   :  { %v1404_v2 = vpop.eup %1403 }
 0x325   :  { %v1406_v51 = vpop.eup %1405  ;;  %v1230_v43 = vadd.f32 1.0, %v1404_v2  ;;  %1407 = vpow2.f32 %v1398_v62 }
 0x326   :  { %v1249_v52 = vadd.f32 1.0, %v1406_v51 }
 0x327   :  { %1409 = vrcp.f32 %v1230_v43  ;;  %v1242_v38 = vand.u32 2147483648, %v1230_v43  ;;  %v1240_v56 = vand.u32 2147483647, %v1230_v43  ;;  %vm1236_vm3 = vweird.f32 %v1230_v43 }
 0x328   :  { %1411 = vrcp.f32 %v1249_v52  ;;  %v1261_v40 = vand.u32 2147483648, %v1249_v52  ;;  %v1259_v47 = vand.u32 2147483647, %v1249_v52  ;;  %vm1255_vm4 = vweird.f32 %v1249_v52 }
 0x329   :  { %v1243_v11 = vor.u32 1.1754944e-38, %v1242_v38  ;;  %vm1241_vm7 = vcmp.eq.f32.partialorder %v1240_v56, 8.507059e+37 }
 0x32a   :  { %v1262_v59 = vor.u32 1.1754944e-38, %v1261_v40  ;;  %vm1260_vm8 = vcmp.eq.f32.partialorder %v1259_v47, 8.507059e+37 }
 0x32b   :  { %v1408_v41 = vpop.eup %1407 }
 0x32c   :  { %v1269_v57 = vadd.f32 1.0, %v1408_v41 }
 0x32d   :  { %v1410_v3 = vpop.eup %1409 }
 0x32e   :  { %v1412_v24 = vpop.eup %1411  ;;  %v1232_v27 = vmul.f32 %v1410_v3, %v1230_v43  ;;  %1413 = vrcp.f32 %v1269_v57  ;;  %vm1237_vm1 = vweird.f32 %v1410_v3  ;;  %v1281_v6 = vand.u32 2147483648, %v1269_v57 }
 0x32f   :  { %v1251_v50 = vmul.f32 %v1412_v24, %v1249_v52  ;;  %1415 = vtanh.f32 %v1225_v7  ;;  %vm1256_vm2 = vweird.f32 %v1412_v24  ;;  %vm1238_vm5 = vmor %vm1236_vm3, %vm1237_vm1  ;;  %vm1275_vm10 = vweird.f32 %v1269_v57 }
 0x330   :  { %v1233_v29 = vsub.f32 1.0, %v1232_v27  ;;  %vm1257_vm6 = vmor %vm1255_vm4, %vm1256_vm2  ;;  %v1279_v60 = vand.u32 2147483647, %v1269_v57  ;;  %v1282_v58 = vor.u32 1.1754944e-38, %v1281_v6 }
 0x331   :  { %v1252_v33 = vsub.f32 1.0, %v1251_v50 }
 0x332   :  { %v1234_v42 = vmul.f32 %v1410_v3, %v1233_v29  ;;  %vm1280_vm12 = vcmp.eq.f32.partialorder %v1279_v60, 8.507059e+37 }
 0x333   :  { %v1253_v0 = vmul.f32 %v1412_v24, %v1252_v33 }
 0x334   :  { %v1414_v22 = vpop.eup %1413  ;;  %v1235_v19 = vadd.f32 %v1410_v3, %v1234_v42 }
 0x335   :  { %v1254_v15 = vadd.f32 %v1412_v24, %v1253_v0  ;;  %v1271_v39 = vmul.f32 %v1414_v22, %v1269_v57  ;;  %v1416_v55 = vpop.eup %1415  ;;  %vm1276_vm9 = vweird.f32 %v1414_v22 }
 0x336   :  { %v1239_v36 = vsel %vm1238_vm5, %v1410_v3, %v1235_v19  ;;  %vm1277_vm11 = vmor %vm1275_vm10, %vm1276_vm9 }
 0x337   :  { %v1244_v28 = vsel %vm1241_vm7, %v1243_v11, %v1239_v36  ;;  %v1258_v61 = vsel %vm1257_vm6, %v1412_v24, %v1254_v15  ;;  %v1272_v1 = vsub.f32 1.0, %v1271_v39 }
 0x338   :  { %v1263_v48 = vsel %vm1260_vm8, %v1262_v59, %v1258_v61  ;;  %v1287_v54 = vmul.f32 %v1416_v55, %v1244_v28 }
 0x339   :  { %v1286_v63 = vmul.f32 %v1285_v34, %v1263_v48  ;;  %v1273_v4 = vmul.f32 %v1414_v22, %v1272_v1 }
 0x33b   :  { %v1288_v45 = vadd.f32 %v1287_v54, %v1286_v63  ;;  %v1274_v5 = vadd.f32 %v1414_v22, %v1273_v4 }
 0x33d   :  { %1417 = vtanh.f32 %v1288_v45  ;;  %1292 = vst [vmem:[#allocation4] sm:$0x3] %v1288_v45  ;;  %v1278_v46 = vsel %vm1277_vm11, %v1414_v22, %v1274_v5 }
 0x33e   :  { %v1283_v8 = vsel %vm1280_vm12, %v1282_v58, %v1278_v46  ;;  %1355 = dma.vmem_to_hbm [thread:$0]  %s1351_s22, 32, %s1353_s24, [#allocation5]  }
 0x343   :  { %v1418_v44 = vpop.eup %1417 }
 0x344   :  { %v1290_v9 = vmul.f32 %v1418_v44, %v1283_v8 }
 0x346   :  { %1329 = vmatmul.f32.vlgmr.msrb.gmra.mxu0 %v1290_v9  ;;  %1291 = vst [vmem:[#allocation2] sm:$0x3] %v1290_v9 }
 0x347   :  { %1344 = dma.vmem_to_hbm [thread:$0]  %s1340_s18, 32, %s1342_s20, [#allocation3]  }
 0x3c3   :  { %v1330_v12 = vpop.f32.mrf.mxu0 }
 0x3c4   :  { %v1331_v13 = vadd.f32 %v1402_v10, %v1330_v12 }
 0x3c6   :  { %1333 = vst [vmem:[%s3121_s12] sm:$0x3] %v1331_v13 }
 0x3c7   :  { %1525 = dma.done.wait [#allocation3], 32  }
 0x3c8   :  { %1526 = vsyncadd [#allocation3], 4294967264 }
 0x3c9   :  { %1527 = dma.done.wait [#allocation5], 32  }
 0x3ca   :  { %1528 = vsyncadd [#allocation5], 4294967264 }
 0x3cb   :  { %1368 = vsyncpa [#allocation3], 1 }
 0x3cc   :  { %1369 = vsyncpa [#allocation5], 1 }

</bundles_post_ra>
